<compile_context>
chip_gen: v6e
topology: v6e:2x2x1
jax: 0.10.0
libtpu: 0.0.40
codegen_flags: <defaults>
</compile_context>

<pallas_src>
import math
import functools

import jax
import jax.numpy as jnp
from jax.experimental import pallas as pl
from jax.experimental.pallas import tpu as pltpu

# ---- BCQCD hyperparameters (module defaults, with small hidden dims for demo) ----
STATE_DIM = 11
ACTION_DIM = 3
LATENT_DIM = 10
HIDDEN_VAE = (64, 64)     # hidden_dim_VAE   (default [750, 750], shrunk for demo)
HIDDEN_Q = (64, 32)       # hidden_dim_Q     (default [400, 300], shrunk for demo)
PHI = 0.05
N_SAMPLES = 10
ROLLOUT = 1000

SC_DIM = STATE_DIM + 1                     # [states, countdowns/1000] = 12
DEC_IN = SC_DIM + LATENT_DIM               # 22
AC_IN = SC_DIM + ACTION_DIM                # 15
OUT_W = 128                                # lane-dense packed output width


# ----------------------------- Pallas kernel --------------------------------
def _bcq_kernel(phi,
                x_ref,
                wd1_ref, bd1_ref, wd2_ref, bd2_ref, wd3_ref, bd3_ref,
                wa1x_ref, wa1a_ref, ba1_ref, wa2_ref, ba2_ref, wa3_ref, ba3_ref,
                wq1x_ref, wq1a_ref, bq1_ref, wq2_ref, bq2_ref, wq3_ref, bq3_ref,
                out_ref):
    f32 = jnp.float32
    x = x_ref[...]                          # (TB, DEC_IN) = [sc | z]

    dot = lambda a, b: jnp.dot(a, b, preferred_element_type=f32)
    relu = lambda v: jnp.maximum(v, 0.0)

    # --- VAE.call_samples: decoder([sc | z]) with Tanh head ---
    h = relu(dot(x, wd1_ref[...]) + bd1_ref[...])
    h = relu(dot(h, wd2_ref[...]) + bd2_ref[...])
    a_vae = jnp.tanh(dot(h, wd3_ref[...]) + bd3_ref[...])          # (TB, 3)

    # --- Actor_disturb: clamp(phi * tanhMLP(cat(sc, a)) + a, -1, 1) ---
    # cat(sc, a) @ wa1 == x @ wa1x + a @ wa1a   (z rows of wa1x are zero)
    h = relu(dot(x, wa1x_ref[...]) + dot(a_vae, wa1a_ref[...]) + ba1_ref[...])
    h = relu(dot(h, wa2_ref[...]) + ba2_ref[...])
    pert = jnp.tanh(dot(h, wa3_ref[...]) + ba3_ref[...])
    act = jnp.clip(phi * pert + a_vae, -1.0, 1.0)                   # (TB, 3)

    # --- Fused critic Q1|Q2 (side-by-side / block-diagonal weights) ---
    h = relu(dot(x, wq1x_ref[...]) + dot(act, wq1a_ref[...]) + bq1_ref[...])  # (TB, 128)
    h = relu(dot(h, wq2_ref[...]) + bq2_ref[...])                              # (TB, 64)
    q12 = dot(h, wq3_ref[...]) + bq3_ref[...]                                  # (TB, 2)
    qmin = jnp.min(q12, axis=1, keepdims=True)                                 # (TB, 1)

    # --- Lane-dense packed output: [act | minQ | zeros] -> (TB, OUT_W) ---
    pad = jnp.zeros((act.shape[0], OUT_W - ACTION_DIM - 1), f32)
    out_ref[...] = jnp.concatenate([act, qmin, pad], axis=1)


def bcq_batch_eval(x, packed_params, *, row_tile=256):
    """Fused VAE-decode / actor-perturb / critic-min pipeline.

    x: (B, DEC_IN) = [states | countdown/1000 | z].
    Returns (actions (B, ACTION_DIM), min-Q (B, 1)).
    """
    B = x.shape[0]
    B_pad = int(pl.cdiv(B, row_tile)) * row_tile
    if B_pad != B:
        x = jnp.pad(x, ((0, B_pad - B), (0, 0)))      # padded rows dropped below
    grid = (B_pad // row_tile,)

    rows = lambda i: (i, 0)       # row-tiled input/output
    full = lambda i: (0, 0)       # weights: whole array every step

    in_specs = [pl.BlockSpec((row_tile, DEC_IN), rows)]
    in_specs += [pl.BlockSpec(p.shape, full) for p in packed_params]
    out_specs = pl.BlockSpec((row_tile, OUT_W), rows)
    out_shape = jax.ShapeDtypeStruct((B_pad, OUT_W), jnp.float32)

    kernel = functools.partial(_bcq_kernel, PHI)
    out = pl.pallas_call(
        kernel,
        grid=grid,
        in_specs=in_specs,
        out_specs=out_specs,
        out_shape=out_shape,
        compiler_params=pltpu.CompilerParams(dimension_semantics=("parallel",)),
    )(x, *packed_params)

    actions = out[:B, :ACTION_DIM]
    q = out[:B, ACTION_DIM:ACTION_DIM + 1]
    return actions, q


# ------------------------------ parameter init ------------------------------
def _linear_init(key, fan_in, fan_out):
    # PyTorch nn.Linear default: U(-1/sqrt(fan_in), 1/sqrt(fan_in)) for W and b.
    kw, kb = jax.random.split(key)
    bound = 1.0 / math.sqrt(fan_in)
    w = jax.random.uniform(kw, (fan_in, fan_out), jnp.float32, -bound, bound)
    b = jax.random.uniform(kb, (1, fan_out), jnp.float32, -bound, bound)
    return w, b


def init_params(key):
    """Raw per-module parameters (same layout as the PyTorch module)."""
    keys = jax.random.split(key, 12)
    params = []
    # VAE decoder: (SC+latent) -> Hv1 -> Hv0 -> action_dim
    params += _linear_init(keys[0], DEC_IN, HIDDEN_VAE[1])
    params += _linear_init(keys[1], HIDDEN_VAE[1], HIDDEN_VAE[0])
    params += _linear_init(keys[2], HIDDEN_VAE[0], ACTION_DIM)
    # Actor_disturb: (SC+action) -> Hq0 -> Hq1 -> action_dim
    params += _linear_init(keys[3], AC_IN, HIDDEN_Q[0])
    params += _linear_init(keys[4], HIDDEN_Q[0], HIDDEN_Q[1])
    params += _linear_init(keys[5], HIDDEN_Q[1], ACTION_DIM)
    # Critic Q1
    params += _linear_init(keys[6], AC_IN, HIDDEN_Q[0])
    params += _linear_init(keys[7], HIDDEN_Q[0], HIDDEN_Q[1])
    params += _linear_init(keys[8], HIDDEN_Q[1], 1)
    # Critic Q2
    params += _linear_init(keys[9], AC_IN, HIDDEN_Q[0])
    params += _linear_init(keys[10], HIDDEN_Q[0], HIDDEN_Q[1])
    params += _linear_init(keys[11], HIDDEN_Q[1], 1)
    return tuple(params)


def pack_params(raw):
    """Repack raw params into the split-weight / fused-critic layout the kernel wants."""
    (wd1, bd1, wd2, bd2, wd3, bd3,
     wa1, ba1, wa2, ba2, wa3, ba3,
     w11, b11, w12, b12, w13, b13,
     w21, b21, w22, b22, w23, b23) = raw
    H0, H1 = HIDDEN_Q
    f32 = jnp.float32

    # Actor first layer: x @ wa1x (z rows zeroed) + a @ wa1a  == cat(sc, a) @ wa1
    wa1x = jnp.concatenate([wa1[:SC_DIM], jnp.zeros((LATENT_DIM, H0), f32)], axis=0)
    wa1a = wa1[SC_DIM:]

    # Fused critic: [Q1 | Q2] side by side, then block-diagonal layers.
    wq1 = jnp.concatenate([w11, w21], axis=1)                        # (AC_IN, 2*H0)
    wq1x = jnp.concatenate([wq1[:SC_DIM],
                            jnp.zeros((LATENT_DIM, 2 * H0), f32)], axis=0)
    wq1a = wq1[SC_DIM:]
    bq1 = jnp.concatenate([b11, b21], axis=1)                        # (1, 2*H0)

    wq2 = jnp.zeros((2 * H0, 2 * H1), f32)
    wq2 = wq2.at[:H0, :H1].set(w12)
    wq2 = wq2.at[H0:, H1:].set(w22)
    bq2 = jnp.concatenate([b12, b22], axis=1)                        # (1, 2*H1)

    wq3 = jnp.zeros((2 * H1, 2), f32)
    wq3 = wq3.at[:H1, 0:1].set(w13)
    wq3 = wq3.at[H1:, 1:2].set(w23)
    bq3 = jnp.concatenate([b13, b23], axis=1)                        # (1, 2)

    return (wd1, bd1, wd2, bd2, wd3, bd3,
            wa1x, wa1a, ba1, wa2, ba2, wa3, ba3,
            wq1x, wq1a, bq1, wq2, bq2, wq3, bq3)


# --------------------------- BCQCD.forward wrapper ---------------------------
def bcqcd_forward(packed_params, states, key, countdown=ROLLOUT):
    states = jnp.reshape(states, (-1, STATE_DIM)).astype(jnp.float32)
    bs = states.shape[0]
    countdowns = jnp.full((bs, 1), float(countdown), jnp.float32) / 1000.0

    batch_states = jnp.repeat(states, N_SAMPLES, axis=0)        # repeat_interleave
    batch_cd = jnp.repeat(countdowns, N_SAMPLES, axis=0)

    # torch.randn(...).clamp(-0.5, 0.5) inside VAE.call_samples
    z = jnp.clip(jax.random.normal(key, (bs * N_SAMPLES, LATENT_DIM), jnp.float32),
                 -0.5, 0.5)

    # single lane-dense kernel input: [states | countdown/1000 | z]
    x = jnp.concatenate([batch_states, batch_cd, z], axis=1)    # (bs*N, DEC_IN)

    actions, q = bcq_batch_eval(x, packed_params)

    # index-selection glue: pick, per state, the candidate action with max min-Q
    idx = jnp.argmax(q.reshape(bs, N_SAMPLES), axis=1)
    acts = actions.reshape(bs, N_SAMPLES, ACTION_DIM)
    ret = jnp.take_along_axis(acts, idx[:, None, None], axis=1)
    return jnp.squeeze(ret)


# ----------------------------- pure-JAX reference ----------------------------
def _ref_eval(sc, z, raw):
    (wd1, bd1, wd2, bd2, wd3, bd3,
     wa1, ba1, wa2, ba2, wa3, ba3,
     w11, b11, w12, b12, w13, b13,
     w21, b21, w22, b22, w23, b23) = raw
    relu = lambda v: jnp.maximum(v, 0.0)
    x = jnp.concatenate([sc, z], axis=1)
    a = jnp.tanh(relu(relu(x @ wd1 + bd1) @ wd2 + bd2) @ wd3 + bd3)
    xa = jnp.concatenate([sc, a], axis=1)
    p = jnp.tanh(relu(relu(xa @ wa1 + ba1) @ wa2 + ba2) @ wa3 + ba3)
    act = jnp.clip(PHI * p + a, -1.0, 1.0)
    xq = jnp.concatenate([sc, act], axis=1)
    q1 = relu(relu(xq @ w11 + b11) @ w12 + b12) @ w13 + b13
    q2 = relu(relu(xq @ w21 + b21) @ w22 + b22) @ w23 + b23
    return act, jnp.minimum(q1, q2)


if __name__ == "__main__":
    key = jax.random.PRNGKey(0)
    k_params, k_states, k_z = jax.random.split(key, 3)

    raw_params = init_params(k_params)
    packed_params = pack_params(raw_params)

    bs = 4                                            # small batch
    states = jax.random.normal(k_states, (bs, STATE_DIM), jnp.float32)

    # Run the Pallas-backed forward once.
    ret = bcqcd_forward(packed_params, states, k_z)
    ret = jax.block_until_ready(ret)
    assert ret.shape == (bs, ACTION_DIM)

    # Sanity-check kernel outputs against a pure-JAX reference (raw params).
    countdowns = jnp.full((bs, 1), float(ROLLOUT), jnp.float32) / 1000.0
    sc = jnp.concatenate([jnp.repeat(states, N_SAMPLES, axis=0),
                          jnp.repeat(countdowns, N_SAMPLES, axis=0)], axis=1)
    z = jnp.clip(jax.random.normal(k_z, (bs * N_SAMPLES, LATENT_DIM), jnp.float32),
                 -0.5, 0.5)
    x = jnp.concatenate([sc, z], axis=1)
    act_k, q_k = bcq_batch_eval(x, packed_params)
    act_r, q_r = _ref_eval(sc, z, raw_params)
    assert jnp.allclose(act_k, act_r, atol=1e-4, rtol=1e-4)
    assert jnp.allclose(q_k, q_r, atol=1e-4, rtol=1e-4)

    print("KERNEL_OK")
</pallas_src>

<mosaic_0001>
module attributes {stable_mosaic.version = 11 : i64} {
  func.func @_bcq_kernel(%arg0: i32, %arg1: memref<256x22xf32, #tpu.memory_space<vmem>>, %arg2: memref<22x64xf32, #tpu.memory_space<vmem>>, %arg3: memref<1x64xf32, #tpu.memory_space<vmem>>, %arg4: memref<64x64xf32, #tpu.memory_space<vmem>>, %arg5: memref<1x64xf32, #tpu.memory_space<vmem>>, %arg6: memref<64x3xf32, #tpu.memory_space<vmem>>, %arg7: memref<1x3xf32, #tpu.memory_space<vmem>>, %arg8: memref<22x64xf32, #tpu.memory_space<vmem>>, %arg9: memref<3x64xf32, #tpu.memory_space<vmem>>, %arg10: memref<1x64xf32, #tpu.memory_space<vmem>>, %arg11: memref<64x32xf32, #tpu.memory_space<vmem>>, %arg12: memref<1x32xf32, #tpu.memory_space<vmem>>, %arg13: memref<32x3xf32, #tpu.memory_space<vmem>>, %arg14: memref<1x3xf32, #tpu.memory_space<vmem>>, %arg15: memref<22x128xf32, #tpu.memory_space<vmem>>, %arg16: memref<3x128xf32, #tpu.memory_space<vmem>>, %arg17: memref<1x128xf32, #tpu.memory_space<vmem>>, %arg18: memref<128x64xf32, #tpu.memory_space<vmem>>, %arg19: memref<1x64xf32, #tpu.memory_space<vmem>>, %arg20: memref<64x2xf32, #tpu.memory_space<vmem>>, %arg21: memref<1x2xf32, #tpu.memory_space<vmem>>, %arg22: memref<256x128xf32, #tpu.memory_space<vmem>>) attributes {dimension_semantics = [#tpu.dimension_semantics<parallel>], iteration_bounds = array<i64: 1>, scalar_prefetch = 0 : i64, scratch_operands = 0 : i64, tpu.core_type = #tpu.core_type<tc>, window_params = [{transform_indices = @transform_0, window_bounds = array<i64: 256, 22>}, {pipeline_mode = #tpu.pipeline_mode<synchronous>, transform_indices = @transform_1, window_bounds = array<i64: 22, 64>}, {pipeline_mode = #tpu.pipeline_mode<synchronous>, transform_indices = @transform_2, window_bounds = array<i64: 1, 64>}, {pipeline_mode = #tpu.pipeline_mode<synchronous>, transform_indices = @transform_3, window_bounds = array<i64: 64, 64>}, {pipeline_mode = #tpu.pipeline_mode<synchronous>, transform_indices = @transform_4, window_bounds = array<i64: 1, 64>}, {pipeline_mode = #tpu.pipeline_mode<synchronous>, transform_indices = @transform_5, window_bounds = array<i64: 64, 3>}, {pipeline_mode = #tpu.pipeline_mode<synchronous>, transform_indices = @transform_6, window_bounds = array<i64: 1, 3>}, {pipeline_mode = #tpu.pipeline_mode<synchronous>, transform_indices = @transform_7, window_bounds = array<i64: 22, 64>}, {pipeline_mode = #tpu.pipeline_mode<synchronous>, transform_indices = @transform_8, window_bounds = array<i64: 3, 64>}, {pipeline_mode = #tpu.pipeline_mode<synchronous>, transform_indices = @transform_9, window_bounds = array<i64: 1, 64>}, {pipeline_mode = #tpu.pipeline_mode<synchronous>, transform_indices = @transform_10, window_bounds = array<i64: 64, 32>}, {pipeline_mode = #tpu.pipeline_mode<synchronous>, transform_indices = @transform_11, window_bounds = array<i64: 1, 32>}, {pipeline_mode = #tpu.pipeline_mode<synchronous>, transform_indices = @transform_12, window_bounds = array<i64: 32, 3>}, {pipeline_mode = #tpu.pipeline_mode<synchronous>, transform_indices = @transform_13, window_bounds = array<i64: 1, 3>}, {pipeline_mode = #tpu.pipeline_mode<synchronous>, transform_indices = @transform_14, window_bounds = array<i64: 22, 128>}, {pipeline_mode = #tpu.pipeline_mode<synchronous>, transform_indices = @transform_15, window_bounds = array<i64: 3, 128>}, {pipeline_mode = #tpu.pipeline_mode<synchronous>, transform_indices = @transform_16, window_bounds = array<i64: 1, 128>}, {pipeline_mode = #tpu.pipeline_mode<synchronous>, transform_indices = @transform_17, window_bounds = array<i64: 128, 64>}, {pipeline_mode = #tpu.pipeline_mode<synchronous>, transform_indices = @transform_18, window_bounds = array<i64: 1, 64>}, {pipeline_mode = #tpu.pipeline_mode<synchronous>, transform_indices = @transform_19, window_bounds = array<i64: 64, 2>}, {pipeline_mode = #tpu.pipeline_mode<synchronous>, transform_indices = @transform_20, window_bounds = array<i64: 1, 2>}, {transform_indices = @transform_21, window_bounds = array<i64: 256, 128>}]} {
    %c0 = arith.constant 0 : index
    %c0_0 = arith.constant 0 : index
    %0 = vector.load %arg1[%c0, %c0_0] : memref<256x22xf32, #tpu.memory_space<vmem>>, vector<256x22xf32>
    %c0_1 = arith.constant 0 : index
    %c0_2 = arith.constant 0 : index
    %1 = vector.load %arg2[%c0_1, %c0_2] : memref<22x64xf32, #tpu.memory_space<vmem>>, vector<22x64xf32>
    %cst = arith.constant dense<0.000000e+00> : vector<256x64xf32>
    %2 = tpu.matmul %0, %1, %cst {dimension_numbers = #tpu.dot_dimension_numbers<[1], [0], [0], [1], [0, 0, 1, 1], [], []>} : vector<256x22xf32>, vector<22x64xf32>, vector<256x64xf32> -> vector<256x64xf32>
    %c0_3 = arith.constant 0 : index
    %c0_4 = arith.constant 0 : index
    %3 = vector.load %arg3[%c0_3, %c0_4] : memref<1x64xf32, #tpu.memory_space<vmem>>, vector<1x64xf32>
    %4 = vector.broadcast %3 : vector<1x64xf32> to vector<256x64xf32>
    %5 = arith.addf %2, %4 : vector<256x64xf32>
    %cst_5 = arith.constant 0.000000e+00 : f32
    %6 = vector.broadcast %cst_5 : f32 to vector<256x64xf32>
    %7 = arith.maximumf %5, %6 : vector<256x64xf32>
    %c0_6 = arith.constant 0 : index
    %c0_7 = arith.constant 0 : index
    %8 = vector.load %arg4[%c0_6, %c0_7] : memref<64x64xf32, #tpu.memory_space<vmem>>, vector<64x64xf32>
    %cst_8 = arith.constant dense<0.000000e+00> : vector<256x64xf32>
    %9 = tpu.matmul %7, %8, %cst_8 {dimension_numbers = #tpu.dot_dimension_numbers<[1], [0], [0], [1], [0, 0, 1, 1], [], []>} : vector<256x64xf32>, vector<64x64xf32>, vector<256x64xf32> -> vector<256x64xf32>
    %c0_9 = arith.constant 0 : index
    %c0_10 = arith.constant 0 : index
    %10 = vector.load %arg5[%c0_9, %c0_10] : memref<1x64xf32, #tpu.memory_space<vmem>>, vector<1x64xf32>
    %11 = vector.broadcast %10 : vector<1x64xf32> to vector<256x64xf32>
    %12 = arith.addf %9, %11 : vector<256x64xf32>
    %cst_11 = arith.constant 0.000000e+00 : f32
    %13 = vector.broadcast %cst_11 : f32 to vector<256x64xf32>
    %14 = arith.maximumf %12, %13 : vector<256x64xf32>
    %c0_12 = arith.constant 0 : index
    %c0_13 = arith.constant 0 : index
    %15 = vector.load %arg6[%c0_12, %c0_13] : memref<64x3xf32, #tpu.memory_space<vmem>>, vector<64x3xf32>
    %cst_14 = arith.constant dense<0.000000e+00> : vector<256x3xf32>
    %16 = tpu.matmul %14, %15, %cst_14 {dimension_numbers = #tpu.dot_dimension_numbers<[1], [0], [0], [1], [0, 0, 1, 1], [], []>} : vector<256x64xf32>, vector<64x3xf32>, vector<256x3xf32> -> vector<256x3xf32>
    %c0_15 = arith.constant 0 : index
    %c0_16 = arith.constant 0 : index
    %17 = vector.load %arg7[%c0_15, %c0_16] : memref<1x3xf32, #tpu.memory_space<vmem>>, vector<1x3xf32>
    %18 = vector.broadcast %17 : vector<1x3xf32> to vector<256x3xf32>
    %19 = arith.addf %16, %18 : vector<256x3xf32>
    %20 = math.tanh %19 : vector<256x3xf32>
    %c0_17 = arith.constant 0 : index
    %c0_18 = arith.constant 0 : index
    %21 = vector.load %arg8[%c0_17, %c0_18] : memref<22x64xf32, #tpu.memory_space<vmem>>, vector<22x64xf32>
    %cst_19 = arith.constant dense<0.000000e+00> : vector<256x64xf32>
    %22 = tpu.matmul %0, %21, %cst_19 {dimension_numbers = #tpu.dot_dimension_numbers<[1], [0], [0], [1], [0, 0, 1, 1], [], []>} : vector<256x22xf32>, vector<22x64xf32>, vector<256x64xf32> -> vector<256x64xf32>
    %c0_20 = arith.constant 0 : index
    %c0_21 = arith.constant 0 : index
    %23 = vector.load %arg9[%c0_20, %c0_21] : memref<3x64xf32, #tpu.memory_space<vmem>>, vector<3x64xf32>
    %cst_22 = arith.constant dense<0.000000e+00> : vector<256x64xf32>
    %24 = tpu.matmul %20, %23, %cst_22 {dimension_numbers = #tpu.dot_dimension_numbers<[1], [0], [0], [1], [0, 0, 1, 1], [], []>} : vector<256x3xf32>, vector<3x64xf32>, vector<256x64xf32> -> vector<256x64xf32>
    %25 = arith.addf %22, %24 : vector<256x64xf32>
    %c0_23 = arith.constant 0 : index
    %c0_24 = arith.constant 0 : index
    %26 = vector.load %arg10[%c0_23, %c0_24] : memref<1x64xf32, #tpu.memory_space<vmem>>, vector<1x64xf32>
    %27 = vector.broadcast %26 : vector<1x64xf32> to vector<256x64xf32>
    %28 = arith.addf %25, %27 : vector<256x64xf32>
    %cst_25 = arith.constant 0.000000e+00 : f32
    %29 = vector.broadcast %cst_25 : f32 to vector<256x64xf32>
    %30 = arith.maximumf %28, %29 : vector<256x64xf32>
    %c0_26 = arith.constant 0 : index
    %c0_27 = arith.constant 0 : index
    %31 = vector.load %arg11[%c0_26, %c0_27] : memref<64x32xf32, #tpu.memory_space<vmem>>, vector<64x32xf32>
    %cst_28 = arith.constant dense<0.000000e+00> : vector<256x32xf32>
    %32 = tpu.matmul %30, %31, %cst_28 {dimension_numbers = #tpu.dot_dimension_numbers<[1], [0], [0], [1], [0, 0, 1, 1], [], []>} : vector<256x64xf32>, vector<64x32xf32>, vector<256x32xf32> -> vector<256x32xf32>
    %c0_29 = arith.constant 0 : index
    %c0_30 = arith.constant 0 : index
    %33 = vector.load %arg12[%c0_29, %c0_30] : memref<1x32xf32, #tpu.memory_space<vmem>>, vector<1x32xf32>
    %34 = vector.broadcast %33 : vector<1x32xf32> to vector<256x32xf32>
    %35 = arith.addf %32, %34 : vector<256x32xf32>
    %cst_31 = arith.constant 0.000000e+00 : f32
    %36 = vector.broadcast %cst_31 : f32 to vector<256x32xf32>
    %37 = arith.maximumf %35, %36 : vector<256x32xf32>
    %c0_32 = arith.constant 0 : index
    %c0_33 = arith.constant 0 : index
    %38 = vector.load %arg13[%c0_32, %c0_33] : memref<32x3xf32, #tpu.memory_space<vmem>>, vector<32x3xf32>
    %cst_34 = arith.constant dense<0.000000e+00> : vector<256x3xf32>
    %39 = tpu.matmul %37, %38, %cst_34 {dimension_numbers = #tpu.dot_dimension_numbers<[1], [0], [0], [1], [0, 0, 1, 1], [], []>} : vector<256x32xf32>, vector<32x3xf32>, vector<256x3xf32> -> vector<256x3xf32>
    %c0_35 = arith.constant 0 : index
    %c0_36 = arith.constant 0 : index
    %40 = vector.load %arg14[%c0_35, %c0_36] : memref<1x3xf32, #tpu.memory_space<vmem>>, vector<1x3xf32>
    %41 = vector.broadcast %40 : vector<1x3xf32> to vector<256x3xf32>
    %42 = arith.addf %39, %41 : vector<256x3xf32>
    %43 = math.tanh %42 : vector<256x3xf32>
    %cst_37 = arith.constant 5.000000e-02 : f32
    %44 = vector.broadcast %cst_37 : f32 to vector<256x3xf32>
    %45 = arith.mulf %44, %43 : vector<256x3xf32>
    %46 = arith.addf %45, %20 : vector<256x3xf32>
    %cst_38 = arith.constant -1.000000e+00 : f32
    %cst_39 = arith.constant 1.000000e+00 : f32
    %47 = vector.broadcast %cst_38 : f32 to vector<256x3xf32>
    %48 = arith.maximumf %47, %46 : vector<256x3xf32>
    %49 = vector.broadcast %cst_39 : f32 to vector<256x3xf32>
    %50 = arith.minimumf %49, %48 : vector<256x3xf32>
    %c0_40 = arith.constant 0 : index
    %c0_41 = arith.constant 0 : index
    %51 = vector.load %arg15[%c0_40, %c0_41] : memref<22x128xf32, #tpu.memory_space<vmem>>, vector<22x128xf32>
    %cst_42 = arith.constant dense<0.000000e+00> : vector<256x128xf32>
    %52 = tpu.matmul %0, %51, %cst_42 {dimension_numbers = #tpu.dot_dimension_numbers<[1], [0], [0], [1], [0, 0, 1, 1], [], []>} : vector<256x22xf32>, vector<22x128xf32>, vector<256x128xf32> -> vector<256x128xf32>
    %c0_43 = arith.constant 0 : index
    %c0_44 = arith.constant 0 : index
    %53 = vector.load %arg16[%c0_43, %c0_44] : memref<3x128xf32, #tpu.memory_space<vmem>>, vector<3x128xf32>
    %cst_45 = arith.constant dense<0.000000e+00> : vector<256x128xf32>
    %54 = tpu.matmul %50, %53, %cst_45 {dimension_numbers = #tpu.dot_dimension_numbers<[1], [0], [0], [1], [0, 0, 1, 1], [], []>} : vector<256x3xf32>, vector<3x128xf32>, vector<256x128xf32> -> vector<256x128xf32>
    %55 = arith.addf %52, %54 : vector<256x128xf32>
    %c0_46 = arith.constant 0 : index
    %c0_47 = arith.constant 0 : index
    %56 = vector.load %arg17[%c0_46, %c0_47] : memref<1x128xf32, #tpu.memory_space<vmem>>, vector<1x128xf32>
    %57 = vector.broadcast %56 : vector<1x128xf32> to vector<256x128xf32>
    %58 = arith.addf %55, %57 : vector<256x128xf32>
    %cst_48 = arith.constant 0.000000e+00 : f32
    %59 = vector.broadcast %cst_48 : f32 to vector<256x128xf32>
    %60 = arith.maximumf %58, %59 : vector<256x128xf32>
    %c0_49 = arith.constant 0 : index
    %c0_50 = arith.constant 0 : index
    %61 = vector.load %arg18[%c0_49, %c0_50] : memref<128x64xf32, #tpu.memory_space<vmem>>, vector<128x64xf32>
    %cst_51 = arith.constant dense<0.000000e+00> : vector<256x64xf32>
    %62 = tpu.matmul %60, %61, %cst_51 {dimension_numbers = #tpu.dot_dimension_numbers<[1], [0], [0], [1], [0, 0, 1, 1], [], []>} : vector<256x128xf32>, vector<128x64xf32>, vector<256x64xf32> -> vector<256x64xf32>
    %c0_52 = arith.constant 0 : index
    %c0_53 = arith.constant 0 : index
    %63 = vector.load %arg19[%c0_52, %c0_53] : memref<1x64xf32, #tpu.memory_space<vmem>>, vector<1x64xf32>
    %64 = vector.broadcast %63 : vector<1x64xf32> to vector<256x64xf32>
    %65 = arith.addf %62, %64 : vector<256x64xf32>
    %cst_54 = arith.constant 0.000000e+00 : f32
    %66 = vector.broadcast %cst_54 : f32 to vector<256x64xf32>
    %67 = arith.maximumf %65, %66 : vector<256x64xf32>
    %c0_55 = arith.constant 0 : index
    %c0_56 = arith.constant 0 : index
    %68 = vector.load %arg20[%c0_55, %c0_56] : memref<64x2xf32, #tpu.memory_space<vmem>>, vector<64x2xf32>
    %cst_57 = arith.constant dense<0.000000e+00> : vector<256x2xf32>
    %69 = tpu.matmul %67, %68, %cst_57 {dimension_numbers = #tpu.dot_dimension_numbers<[1], [0], [0], [1], [0, 0, 1, 1], [], []>} : vector<256x64xf32>, vector<64x2xf32>, vector<256x2xf32> -> vector<256x2xf32>
    %c0_58 = arith.constant 0 : index
    %c0_59 = arith.constant 0 : index
    %70 = vector.load %arg21[%c0_58, %c0_59] : memref<1x2xf32, #tpu.memory_space<vmem>>, vector<1x2xf32>
    %71 = vector.broadcast %70 : vector<1x2xf32> to vector<256x2xf32>
    %72 = arith.addf %69, %71 : vector<256x2xf32>
    %cst_60 = arith.constant dense<0x7F800000> : vector<256xf32>
    %73 = vector.multi_reduction <minimumf>, %72, %cst_60 [1] : vector<256x2xf32> to vector<256xf32>
    %74 = vector.shape_cast %73 : vector<256xf32> to vector<256x1xf32>
    %cst_61 = arith.constant 0.000000e+00 : f32
    %75 = vector.broadcast %cst_61 : f32 to vector<256x124xf32>
    %76 = tpu.concatenate %50, %74, %75 in 1 : vector<256x3xf32>, vector<256x1xf32>, vector<256x124xf32> -> vector<256x128xf32>
    %c0_62 = arith.constant 0 : index
    %c0_63 = arith.constant 0 : index
    %77 = vector.load %arg22[%c0_62, %c0_63] : memref<256x128xf32, #tpu.memory_space<vmem>>, vector<256x128xf32>
    tpu.vector_store %arg22[%c0_62, %c0_63], %76 {strides = array<i32>} : memref<256x128xf32, #tpu.memory_space<vmem>>, vector<256x128xf32>,
    return
  }
  func.func @transform_0(%arg0: i32) -> (i32, i32) {
    %c0_i32 = arith.constant 0 : i32
    %c0_i32_0 = arith.constant 0 : i32
    return %arg0, %c0_i32 : i32, i32
  }
  func.func @transform_1(%arg0: i32) -> (i32, i32) {
    %c0_i32 = arith.constant 0 : i32
    %c0_i32_0 = arith.constant 0 : i32
    %c0_i32_1 = arith.constant 0 : i32
    return %c0_i32, %c0_i32_0 : i32, i32
  }
  func.func @transform_2(%arg0: i32) -> (i32, i32) {
    %c0_i32 = arith.constant 0 : i32
    %c0_i32_0 = arith.constant 0 : i32
    %c0_i32_1 = arith.constant 0 : i32
    return %c0_i32, %c0_i32_0 : i32, i32
  }
  func.func @transform_3(%arg0: i32) -> (i32, i32) {
    %c0_i32 = arith.constant 0 : i32
    %c0_i32_0 = arith.constant 0 : i32
    %c0_i32_1 = arith.constant 0 : i32
    return %c0_i32, %c0_i32_0 : i32, i32
  }
  func.func @transform_4(%arg0: i32) -> (i32, i32) {
    %c0_i32 = arith.constant 0 : i32
    %c0_i32_0 = arith.constant 0 : i32
    %c0_i32_1 = arith.constant 0 : i32
    return %c0_i32, %c0_i32_0 : i32, i32
  }
  func.func @transform_5(%arg0: i32) -> (i32, i32) {
    %c0_i32 = arith.constant 0 : i32
    %c0_i32_0 = arith.constant 0 : i32
    %c0_i32_1 = arith.constant 0 : i32
    return %c0_i32, %c0_i32_0 : i32, i32
  }
  func.func @transform_6(%arg0: i32) -> (i32, i32) {
    %c0_i32 = arith.constant 0 : i32
    %c0_i32_0 = arith.constant 0 : i32
    %c0_i32_1 = arith.constant 0 : i32
    return %c0_i32, %c0_i32_0 : i32, i32
  }
  func.func @transform_7(%arg0: i32) -> (i32, i32) {
    %c0_i32 = arith.constant 0 : i32
    %c0_i32_0 = arith.constant 0 : i32
    %c0_i32_1 = arith.constant 0 : i32
    return %c0_i32, %c0_i32_0 : i32, i32
  }
  func.func @transform_8(%arg0: i32) -> (i32, i32) {
    %c0_i32 = arith.constant 0 : i32
    %c0_i32_0 = arith.constant 0 : i32
    %c0_i32_1 = arith.constant 0 : i32
    return %c0_i32, %c0_i32_0 : i32, i32
  }
  func.func @transform_9(%arg0: i32) -> (i32, i32) {
    %c0_i32 = arith.constant 0 : i32
    %c0_i32_0 = arith.constant 0 : i32
    %c0_i32_1 = arith.constant 0 : i32
    return %c0_i32, %c0_i32_0 : i32, i32
  }
  func.func @transform_10(%arg0: i32) -> (i32, i32) {
    %c0_i32 = arith.constant 0 : i32
    %c0_i32_0 = arith.constant 0 : i32
    %c0_i32_1 = arith.constant 0 : i32
    return %c0_i32, %c0_i32_0 : i32, i32
  }
  func.func @transform_11(%arg0: i32) -> (i32, i32) {
    %c0_i32 = arith.constant 0 : i32
    %c0_i32_0 = arith.constant 0 : i32
    %c0_i32_1 = arith.constant 0 : i32
    return %c0_i32, %c0_i32_0 : i32, i32
  }
  func.func @transform_12(%arg0: i32) -> (i32, i32) {
    %c0_i32 = arith.constant 0 : i32
    %c0_i32_0 = arith.constant 0 : i32
    %c0_i32_1 = arith.constant 0 : i32
    return %c0_i32, %c0_i32_0 : i32, i32
  }
  func.func @transform_13(%arg0: i32) -> (i32, i32) {
    %c0_i32 = arith.constant 0 : i32
    %c0_i32_0 = arith.constant 0 : i32
    %c0_i32_1 = arith.constant 0 : i32
    return %c0_i32, %c0_i32_0 : i32, i32
  }
  func.func @transform_14(%arg0: i32) -> (i32, i32) {
    %c0_i32 = arith.constant 0 : i32
    %c0_i32_0 = arith.constant 0 : i32
    %c0_i32_1 = arith.constant 0 : i32
    return %c0_i32, %c0_i32_0 : i32, i32
  }
  func.func @transform_15(%arg0: i32) -> (i32, i32) {
    %c0_i32 = arith.constant 0 : i32
    %c0_i32_0 = arith.constant 0 : i32
    %c0_i32_1 = arith.constant 0 : i32
    return %c0_i32, %c0_i32_0 : i32, i32
  }
  func.func @transform_16(%arg0: i32) -> (i32, i32) {
    %c0_i32 = arith.constant 0 : i32
    %c0_i32_0 = arith.constant 0 : i32
    %c0_i32_1 = arith.constant 0 : i32
    return %c0_i32, %c0_i32_0 : i32, i32
  }
  func.func @transform_17(%arg0: i32) -> (i32, i32) {
    %c0_i32 = arith.constant 0 : i32
    %c0_i32_0 = arith.constant 0 : i32
    %c0_i32_1 = arith.constant 0 : i32
    return %c0_i32, %c0_i32_0 : i32, i32
  }
  func.func @transform_18(%arg0: i32) -> (i32, i32) {
    %c0_i32 = arith.constant 0 : i32
    %c0_i32_0 = arith.constant 0 : i32
    %c0_i32_1 = arith.constant 0 : i32
    return %c0_i32, %c0_i32_0 : i32, i32
  }
  func.func @transform_19(%arg0: i32) -> (i32, i32) {
    %c0_i32 = arith.constant 0 : i32
    %c0_i32_0 = arith.constant 0 : i32
    %c0_i32_1 = arith.constant 0 : i32
    return %c0_i32, %c0_i32_0 : i32, i32
  }
  func.func @transform_20(%arg0: i32) -> (i32, i32) {
    %c0_i32 = arith.constant 0 : i32
    %c0_i32_0 = arith.constant 0 : i32
    %c0_i32_1 = arith.constant 0 : i32
    return %c0_i32, %c0_i32_0 : i32, i32
  }
  func.func @transform_21(%arg0: i32) -> (i32, i32) {
    %c0_i32 = arith.constant 0 : i32
    %c0_i32_0 = arith.constant 0 : i32
    return %arg0, %c0_i32 : i32, i32
  }
}

</mosaic_0001>

<bundles_post_ra>
// kernel: tpu_custom_call.1
= control target key start
LH: loop header
LB: loop body
LE: loop exit
PB: predicated region body
PF: predicated region fallthrough
CT: control target
= control target key end

     0   :  { %s7580_s0 = inlined_call_operand.vmem [shape: f32[256,22], index: 0, kind: input, shape index: {}]   ;;  %s7581_s1 = inlined_call_operand.vmem [shape: f32[22,64], index: 1, kind: input, shape index: {}]   ;;  %s7582_s2 = inlined_call_operand.vmem [shape: f32[1,64], index: 2, kind: input, shape index: {}]   ;;  %s7583_s3 = inlined_call_operand.vmem [shape: f32[64,64], index: 3, kind: input, shape index: {}]   ;;  %s7584_s4 = inlined_call_operand.vmem [shape: f32[1,64], index: 4, kind: input, shape index: {}]   ;;  %s7585_s5 = inlined_call_operand.vmem [shape: f32[64,3], index: 5, kind: input, shape index: {}]   ;;  %s7586_s6 = inlined_call_operand.vmem [shape: f32[1,3], index: 6, kind: input, shape index: {}]   ;;  %s7587_s7 = inlined_call_operand.vmem [shape: f32[22,64], index: 7, kind: input, shape index: {}]   ;;  %s7588_s8 = inlined_call_operand.vmem [shape: f32[3,64], index: 8, kind: input, shape index: {}]   ;;  %s7589_s9 = inlined_call_operand.vmem [shape: f32[1,64], index: 9, kind: input, shape index: {}]   ;;  %s7590_s10 = inlined_call_operand.vmem [shape: f32[64,32], index: 10, kind: input, shape index: {}]   ;;  %s7591_s11 = inlined_call_operand.vmem [shape: f32[1,32], index: 11, kind: input, shape index: {}]   ;;  %s7592_s12 = inlined_call_operand.vmem [shape: f32[32,3], index: 12, kind: input, shape index: {}]   ;;  %s7593_s13 = inlined_call_operand.vmem [shape: f32[1,3], index: 13, kind: input, shape index: {}]   ;;  %s7594_s14 = inlined_call_operand.vmem [shape: f32[22,128], index: 14, kind: input, shape index: {}]   ;;  %s7595_s15 = inlined_call_operand.vmem [shape: f32[3,128], index: 15, kind: input, shape index: {}]   ;;  %s7596_s16 = inlined_call_operand.vmem [shape: f32[1,128], index: 16, kind: input, shape index: {}]   ;;  %s7597_s17 = inlined_call_operand.vmem [shape: f32[128,64], index: 17, kind: input, shape index: {}]   ;;  %s7598_s18 = inlined_call_operand.vmem [shape: f32[1,64], index: 18, kind: input, shape index: {}]   ;;  %s7599_s19 = inlined_call_operand.vmem [shape: f32[64,2], index: 19, kind: input, shape index: {}]   ;;  %s7600_s20 = inlined_call_operand.vmem [shape: f32[1,2], index: 20, kind: input, shape index: {}]   ;;  %s7601_s21 = inlined_call_operand.hbm [shape: f32[256,128], index: 21, kind: output, shape index: {}]  }
   0x1   :  { %7641 = sst [smem:[#allocation7_spill]] %s7580_s0 }
   0x2   :  { %7642 = sst [smem:[#allocation8_spill]] %s7581_s1 }
   0x3   :  { %7643 = sst [smem:[#allocation9_spill]] %s7582_s2 }
   0x4   :  { %7644 = sst [smem:[#allocation10_spill]] %s7583_s3 }
   0x5   :  { %7645 = sst [smem:[#allocation11_spill]] %s7584_s4 }
   0x6   :  { %7646 = sst [smem:[#allocation12_spill]] %s7585_s5 }
   0x7   :  { %s7647_s26 = sld [smem:[#allocation8_spill]]  ;;  %vm208_vm0 = vcmask 1045504   ;;  %vm111_vm1 = vcmask 179200  }
   0x8   :  { %s7648_s0 = sld [smem:[#allocation7_spill]] }
   0x9   :  { %s7649_s25 = sld [smem:[#allocation10_spill]] }
   0xd   :  { %v103_v0 = vld [vmem:[%s7647_s26 + $0x10] sm:$0x3f]  ;;  %v102_v1 = vld [vmem:[%s7647_s26 + $0x8] sm:$0xff]  ;;  %v101_v3 = vld [vmem:[%s7647_s26] sm:$0xff] }
   0xe   :  { %4930 = vmatprep.subr.msk.mxu0 %vm208_vm0, %v103_v0  ;;  %v5898_v2 = vld [vmem:[%s7648_s0] sm:$0xff]  ;;  %5584 = vmatprep.subr.msk.mxu1 %vm208_vm0, %v103_v0  ;;  %v5911_v4 = vld [vmem:[%s7648_s0 + $0x8] sm:$0xff]  ;;  %v5916_v5 = vld [vmem:[%s7648_s0 + $0x10] sm:$0xff] }
   0xf   :  { %4931 = vmatpush3.msk.msra.mxu0 %vm208_vm0, %v103_v0  ;;  %4936 = vmatprep.mubr.msk.f32.mxu0 %vm111_vm1, %v5898_v2  ;;  %v5921_v6 = vld [vmem:[%s7648_s0 + $0x80] sm:$0xff]  ;;  %v5926_v7 = vld [vmem:[%s7648_s0 + $0x88] sm:$0xff]  ;;  %v5933_v8 = vld [vmem:[%s7648_s0 + $0x90] sm:$0xff] }
  0x10   :  { %4932 = vmatprep.subr.mxu0 %v102_v1  ;;  %5587 = vmatpush3.msk.msra.mxu1 %vm208_vm0, %v103_v0  ;;  %v5940_v9 = vld [vmem:[%s7648_s0 + $0x18] sm:$0xff]  ;;  %v5947_v10 = vld [vmem:[%s7648_s0 + $0x20] sm:$0xff]  ;;  %v5973_v14 = vld [vmem:[%s7648_s0 + $0x28] sm:$0xff] }
  0x11   :  { %4933 = vmatpush3.msra.mxu0 %v102_v1  ;;  %5585 = vmatprep.subr.mxu1 %v102_v1  ;;  %v5956_v11 = vld [vmem:[%s7648_s0 + $0x98] sm:$0xff]  ;;  %v5963_v12 = vld [vmem:[%s7648_s0 + $0xa0] sm:$0xff]  ;;  %v475_v15 = vld [vmem:[%s7649_s25 + $0x30] sm:$0xff] }
  0x12   :  { %4934 = vmatprep.subr.mxu0 %v101_v3  ;;  %5588 = vmatpush3.msra.mxu1 %v102_v1  ;;  %v476_v13 = vld [vmem:[%s7649_s25 + $0x38] sm:$0xff]  ;;  %v5981_v16 = vld [vmem:[%s7648_s0 + $0x30] sm:$0xff]  ;;  %v5990_v17 = vld [vmem:[%s7648_s0 + $0xa8] sm:$0xff] }
  0x13   :  { %4935 = vmatpush3.msra.mxu0 %v101_v3  ;;  %5586 = vmatprep.subr.mxu1 %v101_v3  ;;  %v474_v18 = vld [vmem:[%s7649_s25 + $0x28] sm:$0xff] }
  0x14   :  { %4937 = vmatmul.mubr.msk.f32.vlgmr.msra.gmra.mxu0 %vm111_vm1, %v5911_v4  ;;  %5589 = vmatpush3.msra.mxu1 %v101_v3 }
  0x15   :  { %4939 = vmatprep.mubr.msk.f32.mxu0 %vm111_vm1, %v5916_v5  ;;  %4960 = vmatprep.mubr.msk.f32.mxu1 %vm111_vm1, %v5921_v6 }
  0x16   :  { %4961 = vmatmul.mubr.msk.f32.vlgmr.msra.gmra.mxu1 %vm111_vm1, %v5926_v7  ;;  %4984 = vmatprep.subr.mxu1 %v476_v13 }
  0x17   :  { %4963 = vmatprep.mubr.msk.f32.mxu1 %vm111_vm1, %v5933_v8  ;;  %4985 = vmatpush3.msra.mxu1 %v476_v13 }
  0x18   :  { %4940 = vmatmul.mubr.msk.f32.gmra.mxu0 %vm111_vm1, %v5940_v9 }
  0x19   :  { %4942 = vmatprep.mubr.msk.f32.mxu0 %vm111_vm1, %v5947_v10 }
  0x1a   :  { %4964 = vmatmul.mubr.msk.f32.gmra.mxu1 %vm111_vm1, %v5956_v11 }
  0x1b   :  { %4966 = vmatprep.mubr.msk.f32.mxu1 %vm111_vm1, %v5963_v12 }
  0x1c   :  { %26 = vsyncpa [#allocation3], 0  ;;  %4943 = vmatmul.mubr.msk.f32.gmra.mxu0 %vm111_vm1, %v5973_v14  ;;  %v6000_v19 = vld [vmem:[%s7648_s0 + $0xb0] sm:$0xff]  ;;  %4986 = vmatprep.subr.mxu1 %v475_v15  ;;  %v6007_v20 = vld [vmem:[%s7648_s0 + $0x38] sm:$0xff]  ;;  %s7650_s22 = sld [smem:[#allocation12_spill]]  ;;  %vm484_vm2 = vcmask 523264  }
  0x1d   :  { %4945 = vmatprep.mubr.msk.f32.mxu0 %vm111_vm1, %v5981_v16  ;;  %4987 = vmatpush3.msra.mxu1 %v475_v15  ;;  %v473_v21 = vld [vmem:[%s7649_s25 + $0x20] sm:$0xff]  ;;  %v6024_v23 = vld [vmem:[%s7648_s0 + $0xb8] sm:$0xff]  ;;  %v6041_v26 = vld [vmem:[%s7648_s0 + $0x48] sm:$0xff]  ;;  %s7651_s1 = sld [smem:[#allocation9_spill]]  ;;  %vm1307_vm3 = vcmask 1042432   ;;  %vm1210_vm4 = vcmask 23552  }
  0x1e   :  { %v6015_v22 = vld [vmem:[%s7648_s0 + $0x40] sm:$0xff]  ;;  %4967 = vmatmul.mubr.msk.f32.gmra.mxu1 %vm111_vm1, %v5990_v17  ;;  %4988 = vmatprep.subr.mxu1 %v474_v18  ;;  %v472_v24 = vld [vmem:[%s7649_s25 + $0x18] sm:$0xff]  ;;  %v471_v27 = vld [vmem:[%s7649_s25 + $0x10] sm:$0xff]  ;;  %vm2214_vm5 = vcmask 261120   ;;  %vm3939_vm6 = vcmask 15360   ;;  %vm4068_vm7 = vcmask 31744  }
  0x1f   :  { %4969 = vmatprep.mubr.msk.f32.mxu1 %vm111_vm1, %v6000_v19  ;;  %4989 = vmatpush3.msra.mxu1 %v474_v18  ;;  %v6034_v25 = vld [vmem:[%s7648_s0 + $0xc0] sm:$0xff]  ;;  %v6049_v28 = vld [vmem:[%s7648_s0 + $0x50] sm:$0xff]  ;;  %v6058_v29 = vld [vmem:[%s7648_s0 + $0xc8] sm:$0xff] }
  0x20   :  { %4946 = vmatmul.mubr.msk.f32.gmra.mxu0 %vm111_vm1, %v6007_v20  ;;  %4990 = vmatprep.subr.mxu1 %v473_v21  ;;  %v470_v30 = vld [vmem:[%s7649_s25 + $0x8] sm:$0xff]  ;;  %v6068_v31 = vld [vmem:[%s7648_s0 + $0xd0] sm:$0xff]  ;;  %v6075_v32 = vld [vmem:[%s7648_s0 + $0x58] sm:$0xff] }
  0x21   :  { %4948 = vmatprep.mubr.msk.f32.mxu0 %vm111_vm1, %v6015_v22  ;;  %4991 = vmatpush3.msra.mxu1 %v473_v21  ;;  %v6080_v33 = vld [vmem:[%s7648_s0 + $0x60] sm:$0xff]  ;;  %v6089_v34 = vld [vmem:[%s7648_s0 + $0xd8] sm:$0xff]  ;;  %v6103_v36 = vld [vmem:[%s7648_s0 + $0x68] sm:$0xff] }
  0x22   :  { %4970 = vmatmul.mubr.msk.f32.gmra.mxu1 %vm111_vm1, %v6024_v23  ;;  %4992 = vmatprep.subr.mxu1 %v472_v24  ;;  %v6096_v35 = vld [vmem:[%s7648_s0 + $0xe0] sm:$0xff]  ;;  %v6108_v37 = vld [vmem:[%s7648_s0 + $0x70] sm:$0xff]  ;;  %v6117_v38 = vld [vmem:[%s7648_s0 + $0xe8] sm:$0xff] }
  0x23   :  { %4972 = vmatprep.mubr.msk.f32.mxu1 %vm111_vm1, %v6034_v25  ;;  %4993 = vmatpush3.msra.mxu1 %v472_v24  ;;  %v6124_v39 = vld [vmem:[%s7648_s0 + $0xf0] sm:$0xff]  ;;  %v6131_v40 = vld [vmem:[%s7648_s0 + $0x78] sm:$0xff]  ;;  %v469_v42 = vld [vmem:[%s7649_s25] sm:$0xff] }
  0x24   :  { %4949 = vmatmul.mubr.msk.f32.gmra.mxu0 %vm111_vm1, %v6041_v26  ;;  %4994 = vmatprep.subr.mxu1 %v471_v27  ;;  %v6140_v41 = vld [vmem:[%s7648_s0 + $0xf8] sm:$0xff]  ;;  %v844_v44 = vld [vmem:[%s7650_s22 + $0x30] sm:$0xff]  ;;  %v843_v45 = vld [vmem:[%s7650_s22 + $0x28] sm:$0xff] }
  0x25   :  { %4951 = vmatprep.mubr.msk.f32.mxu0 %vm111_vm1, %v6049_v28  ;;  %4995 = vmatpush3.msra.mxu1 %v471_v27  ;;  %v845_v43 = vld [vmem:[%s7650_s22 + $0x38] sm:$0xff]  ;;  %v842_v46 = vld [vmem:[%s7650_s22 + $0x20] sm:$0xff]  ;;  %v840_v48 = vld [vmem:[%s7650_s22 + $0x10] sm:$0xff] }
  0x26   :  { %4973 = vmatmul.mubr.msk.f32.gmra.mxu1 %vm111_vm1, %v6058_v29  ;;  %4996 = vmatprep.subr.mxu1 %v470_v30  ;;  %v841_v47 = vld [vmem:[%s7650_s22 + $0x18] sm:$0xff]  ;;  %v839_v49 = vld [vmem:[%s7650_s22 + $0x8] sm:$0xff]  ;;  %v6173_v50 = vld [vmem:[%s7651_s1] ss:$0 sm:$0xff] }
  0x27   :  { %4975 = vmatprep.mubr.msk.f32.mxu1 %vm111_vm1, %v6068_v31  ;;  %4997 = vmatpush3.msra.mxu1 %v470_v30 }
  0x28   :  { %4952 = vmatmul.mubr.msk.f32.gmra.mxu0 %vm111_vm1, %v6075_v32  ;;  %4998 = vmatprep.subr.mxu1 %v469_v42 }
  0x29   :  { %4954 = vmatprep.mubr.msk.f32.mxu0 %vm111_vm1, %v6080_v33  ;;  %4999 = vmatpush3.msra.mxu1 %v469_v42 }
  0x2a   :  { %4976 = vmatmul.mubr.msk.f32.gmra.mxu1 %vm111_vm1, %v6089_v34  ;;  %5048 = vmatprep.subr.mxu0 %v845_v43 }
  0x2b   :  { %4978 = vmatprep.mubr.msk.f32.mxu1 %vm111_vm1, %v6096_v35  ;;  %5049 = vmatpush3.msra.mxu0 %v845_v43 }
  0x2c   :  { %4955 = vmatmul.mubr.msk.f32.gmra.mxu0 %vm111_vm1, %v6103_v36  ;;  %5050 = vmatprep.subr.mxu0 %v844_v44 }
  0x2d   :  { %4957 = vmatprep.mubr.msk.f32.mxu0 %vm111_vm1, %v6108_v37  ;;  %5051 = vmatpush3.msra.mxu0 %v844_v44 }
  0x2e   :  { %4979 = vmatmul.mubr.msk.f32.gmra.mxu1 %vm111_vm1, %v6117_v38  ;;  %5052 = vmatprep.subr.mxu0 %v843_v45 }
  0x2f   :  { %4981 = vmatprep.mubr.msk.f32.mxu1 %vm111_vm1, %v6124_v39  ;;  %5053 = vmatpush3.msra.mxu0 %v843_v45 }
  0x30   :  { %4958 = vmatmul.mubr.msk.f32.gmra.mxu0 %vm111_vm1, %v6131_v40  ;;  %5054 = vmatprep.subr.mxu0 %v842_v46 }
  0x31   :  { %5055 = vmatpush3.msra.mxu0 %v842_v46 }
  0x32   :  { %4982 = vmatmul.mubr.msk.f32.gmra.mxu1 %vm111_vm1, %v6140_v41  ;;  %5056 = vmatprep.subr.mxu0 %v841_v47 }
  0x33   :  { %5057 = vmatpush3.msra.mxu0 %v841_v47 }
  0x34   :  { %5058 = vmatprep.subr.mxu0 %v840_v48 }
  0x35   :  { %5059 = vmatpush3.msra.mxu0 %v840_v48 }
  0x36   :  { %5060 = vmatprep.subr.mxu0 %v839_v49 }
  0x37   :  { %5061 = vmatpush3.msra.mxu0 %v839_v49 }
  0xd4   :  { %v4938_v51 = vpop.f32.mrf.mxu0 }
  0xd5   :  { %v284_v52 = vadd.f32 %v4938_v51, %v6173_v50 }
  0xd6   :  { %v278_v53 = vpop.f32.mrf.mxu0  ;;  %v6176_v54 = vpop.f32.mrf.mxu1 }
  0xd7   :  { %v279_v55 = vadd.f32 %v6173_v50, %v278_v53  ;;  %v438_v59 = vmax.f32 %v284_v52, 0.0 }
  0xd8   :  { %v4941_v56 = vpop.f32.mrf.mxu0  ;;  %v358_v57 = vpop.f32.mrf.mxu1 }
  0xd9   :  { %v437_v58 = vmax.f32 %v279_v55, 0.0  ;;  %v294_v60 = vadd.f32 %v4941_v56, %v6173_v50 }
  0xda   :  { %v288_v61 = vpop.f32.mrf.mxu0  ;;  %v6180_v62 = vpop.f32.mrf.mxu1 }
  0xdb   :  { %v289_v63 = vadd.f32 %v6173_v50, %v288_v61  ;;  %5000 = vmatprep.mubr.msk.f32.mxu1 %vm484_vm2, %v437_v58  ;;  %v440_v15 = vmax.f32 %v294_v60, 0.0 }
  0xdc   :  { %v4944_v0 = vpop.f32.mrf.mxu0  ;;  %5001 = vmatmul.mubr.msk.f32.vlgmr.msra.gmra.mxu1 %vm484_vm2, %v438_v59  ;;  %v368_v1 = vpop.f32.mrf.mxu1 }
  0xdd   :  { %v439_v3 = vmax.f32 %v289_v63, 0.0  ;;  %v304_v13 = vadd.f32 %v4944_v0, %v6173_v50 }
  0xde   :  { %v298_v18 = vpop.f32.mrf.mxu0  ;;  %v6186_v21 = vpop.f32.mrf.mxu1 }
  0xdf   :  { %v299_v24 = vadd.f32 %v6173_v50, %v298_v18  ;;  %5003 = vmatprep.mubr.msk.f32.mxu1 %vm484_vm2, %v439_v3  ;;  %v442_v27 = vmax.f32 %v304_v13, 0.0 }
  0xe0   :  { %v4947_v30 = vpop.f32.mrf.mxu0  ;;  %5004 = vmatmul.mubr.msk.f32.gmra.mxu1 %vm484_vm2, %v440_v15  ;;  %v378_v45 = vpop.f32.mrf.mxu1 }
  0xe1   :  { %v441_v42 = vmax.f32 %v299_v24, 0.0  ;;  %v314_v43 = vadd.f32 %v4947_v30, %v6173_v50 }
  0xe2   :  { %v308_v44 = vpop.f32.mrf.mxu0  ;;  %v4971_v53 = vpop.f32.mrf.mxu1 }
  0xe3   :  { %v309_v46 = vadd.f32 %v6173_v50, %v308_v44  ;;  %5006 = vmatprep.mubr.msk.f32.mxu1 %vm484_vm2, %v441_v42  ;;  %v444_v47 = vmax.f32 %v314_v43, 0.0 }
  0xe4   :  { %v4950_v48 = vpop.f32.mrf.mxu0  ;;  %5007 = vmatmul.mubr.msk.f32.gmra.mxu1 %vm484_vm2, %v442_v27  ;;  %v388_v63 = vpop.f32.mrf.mxu1 }
  0xe5   :  { %v443_v49 = vmax.f32 %v309_v46, 0.0  ;;  %v324_v51 = vadd.f32 %v4950_v48, %v6173_v50 }
  0xe6   :  { %v318_v52 = vpop.f32.mrf.mxu0  ;;  %v4974_v27 = vpop.f32.mrf.mxu1 }
  0xe7   :  { %v319_v55 = vadd.f32 %v6173_v50, %v318_v52  ;;  %5009 = vmatprep.mubr.msk.f32.mxu1 %vm484_vm2, %v443_v49  ;;  %v446_v56 = vmax.f32 %v324_v51, 0.0 }
  0xe8   :  { %v4953_v58 = vpop.f32.mrf.mxu0  ;;  %5010 = vmatmul.mubr.msk.f32.gmra.mxu1 %vm484_vm2, %v444_v47  ;;  %v359_v47 = vadd.f32 %v6173_v50, %v358_v57  ;;  %v398_v49 = vpop.f32.mrf.mxu1 }
  0xe9   :  { %v445_v59 = vmax.f32 %v319_v55, 0.0  ;;  %v334_v60 = vadd.f32 %v4953_v58, %v6173_v50  ;;  %v364_v55 = vadd.f32 %v6176_v54, %v6173_v50  ;;  %v379_v54 = vadd.f32 %v6173_v50, %v378_v45 }
  0xea   :  { %v328_v61 = vpop.f32.mrf.mxu0  ;;  %v453_v58 = vmax.f32 %v359_v47, 0.0  ;;  %v399_v45 = vadd.f32 %v6173_v50, %v398_v49 }
  0xeb   :  { %v329_v0 = vadd.f32 %v6173_v50, %v328_v61  ;;  %5012 = vmatprep.mubr.msk.f32.mxu1 %vm484_vm2, %v445_v59  ;;  %v448_v3 = vmax.f32 %v334_v60, 0.0  ;;  %v369_v59 = vadd.f32 %v6173_v50, %v368_v1  ;;  %v4977_v60 = vpop.f32.mrf.mxu1  ;;  %v454_v57 = vmax.f32 %v364_v55, 0.0 }
  0xec   :  { %v4956_v13 = vpop.f32.mrf.mxu0  ;;  %5013 = vmatmul.mubr.msk.f32.gmra.mxu1 %vm484_vm2, %v446_v56  ;;  %v374_v61 = vadd.f32 %v6180_v62, %v6173_v50  ;;  %v457_v1 = vmax.f32 %v379_v54, 0.0  ;;  %v1208_v54 = vld [vmem:[%s7587_s7 + $0x10] sm:$0x3f] }
  0xed   :  { %v447_v15 = vmax.f32 %v329_v0, 0.0  ;;  %v344_v18 = vadd.f32 %v4956_v13, %v6173_v50  ;;  %v455_v0 = vmax.f32 %v369_v59, 0.0 }
  0xee   :  { %v338_v24 = vpop.f32.mrf.mxu0  ;;  %v456_v13 = vmax.f32 %v374_v61, 0.0 }
  0xef   :  { %v339_v30 = vadd.f32 %v6173_v50, %v338_v24  ;;  %5015 = vmatprep.mubr.msk.f32.mxu1 %vm484_vm2, %v447_v15  ;;  %v450_v42 = vmax.f32 %v344_v18, 0.0  ;;  %v384_v15 = vadd.f32 %v6186_v21, %v6173_v50  ;;  %v389_v18 = vadd.f32 %v6173_v50, %v388_v63 }
  0xf0   :  { %v4959_v43 = vpop.f32.mrf.mxu0  ;;  %5016 = vmatmul.mubr.msk.f32.gmra.mxu1 %vm484_vm2, %v448_v3  ;;  %v408_v3 = vpop.f32.mrf.mxu1 }
  0xf1   :  { %v449_v44 = vmax.f32 %v339_v30, 0.0  ;;  %v354_v46 = vadd.f32 %v4959_v43, %v6173_v50  ;;  %v458_v24 = vmax.f32 %v384_v15, 0.0  ;;  %v394_v30 = vadd.f32 %v4971_v53, %v6173_v50 }
  0xf2   :  { %v348_v48 = vpop.f32.mrf.mxu0  ;;  %v4980_v62 = vpop.f32.mrf.mxu1  ;;  %v409_v63 = vadd.f32 %v6173_v50, %v408_v3 }
  0xf3   :  { %v349_v51 = vadd.f32 %v6173_v50, %v348_v48  ;;  %5018 = vmatprep.mubr.msk.f32.mxu1 %vm484_vm2, %v449_v44  ;;  %v452_v52 = vmax.f32 %v354_v46, 0.0  ;;  %v460_v21 = vmax.f32 %v394_v30, 0.0  ;;  %v404_v44 = vadd.f32 %v4974_v27, %v6173_v50 }
  0xf4   :  { %5019 = vmatmul.mubr.msk.f32.gmra.mxu1 %vm484_vm2, %v450_v42  ;;  %v459_v42 = vmax.f32 %v389_v18, 0.0  ;;  %v418_v43 = vpop.f32.mrf.mxu1  ;;  %v461_v46 = vmax.f32 %v399_v45, 0.0  ;;  %v414_v48 = vadd.f32 %v4977_v60, %v6173_v50  ;;  %v424_v55 = vadd.f32 %v4980_v62, %v6173_v50 }
  0xf5   :  { %v451_v56 = vmax.f32 %v349_v51, 0.0  ;;  %v462_v53 = vmax.f32 %v404_v44, 0.0  ;;  %v463_v51 = vmax.f32 %v409_v63, 0.0  ;;  %v419_v49 = vadd.f32 %v6173_v50, %v418_v43  ;;  %v1206_v63 = vld [vmem:[%s7587_s7] sm:$0xff] }
  0xf6   :  { %v4983_v47 = vpop.f32.mrf.mxu1  ;;  %v464_v27 = vmax.f32 %v414_v48, 0.0  ;;  %v466_v59 = vmax.f32 %v424_v55, 0.0 }
  0xf7   :  { %5021 = vmatprep.mubr.msk.f32.mxu1 %vm484_vm2, %v451_v56  ;;  %v465_v56 = vmax.f32 %v419_v49, 0.0  ;;  %v434_v60 = vadd.f32 %v4983_v47, %v6173_v50 }
  0xf8   :  { %5022 = vmatmul.mubr.msk.f32.gmra.mxu1 %vm484_vm2, %v452_v52  ;;  %v428_v52 = vpop.f32.mrf.mxu1 }
  0xf9   :  { %5024 = vmatprep.mubr.msk.f32.mxu1 %vm484_vm2, %v453_v58  ;;  %v429_v58 = vadd.f32 %v6173_v50, %v428_v52  ;;  %v468_v61 = vmax.f32 %v434_v60, 0.0  ;;  %v1209_v50 = vld [vmem:[%s7588_s8] sm:$0x7] }
  0xfa   :  { %5112 = vmatprep.subr.msk.mxu1 %vm1307_vm3, %v1209_v50 }
  0xfb   :  { %5113 = vmatpush3.msk.msra.mxu1 %vm1307_vm3, %v1209_v50 }
  0xfc   :  { %5025 = vmatmul.mubr.msk.f32.gmra.mxu1 %vm484_vm2, %v454_v57  ;;  %v467_v57 = vmax.f32 %v429_v58, 0.0 }
  0xfd   :  { %5027 = vmatprep.mubr.msk.f32.mxu1 %vm484_vm2, %v455_v0  ;;  %v838_v0 = vld [vmem:[%s7650_s22] sm:$0xff]  ;;  %s7652_s22 = sld [smem:[#allocation11_spill]] }
  0xfe   :  { %5062 = vmatprep.subr.mxu0 %v838_v0 }
  0xff   :  { %5063 = vmatpush3.msra.mxu0 %v838_v0 }
 0x100   :  { %5028 = vmatmul.mubr.msk.f32.gmra.mxu1 %vm484_vm2, %v456_v13  ;;  %5162 = vmatprep.subr.msk.mxu0 %vm208_vm0, %v1208_v54 }
 0x101   :  { %5030 = vmatprep.mubr.msk.f32.mxu1 %vm484_vm2, %v457_v1 }
 0x103   :  { %v6263_v3 = vld [vmem:[%s7652_s22] ss:$0 sm:$0xff] }
 0x104   :  { %5031 = vmatmul.mubr.msk.f32.gmra.mxu1 %vm484_vm2, %v458_v24 }
 0x105   :  { %5033 = vmatprep.mubr.msk.f32.mxu1 %vm484_vm2, %v459_v42 }
 0x108   :  { %5034 = vmatmul.mubr.msk.f32.gmra.mxu1 %vm484_vm2, %v460_v21  ;;  %v1207_v21 = vld [vmem:[%s7587_s7 + $0x8] sm:$0xff] }
 0x109   :  { %5036 = vmatprep.mubr.msk.f32.mxu1 %vm484_vm2, %v461_v46 }
 0x10c   :  { %5037 = vmatmul.mubr.msk.f32.gmra.mxu1 %vm484_vm2, %v462_v53 }
 0x10d   :  { %5039 = vmatprep.mubr.msk.f32.mxu1 %vm484_vm2, %v463_v51 }
 0x110   :  { %5040 = vmatmul.mubr.msk.f32.gmra.mxu1 %vm484_vm2, %v464_v27 }
 0x111   :  { %5042 = vmatprep.mubr.msk.f32.mxu1 %vm484_vm2, %v465_v56 }
 0x114   :  { %5043 = vmatmul.mubr.msk.f32.gmra.mxu1 %vm484_vm2, %v466_v59 }
 0x115   :  { %5045 = vmatprep.mubr.msk.f32.mxu1 %vm484_vm2, %v467_v57 }
 0x118   :  { %5046 = vmatmul.mubr.msk.f32.gmra.mxu1 %vm484_vm2, %v468_v61 }
 0x19c   :  { %v5002_v13 = vpop.f32.mrf.mxu1 }
 0x19d   :  { %v653_v15 = vadd.f32 %v5002_v13, %v6263_v3 }
 0x19e   :  { %v647_v1 = vpop.f32.mrf.mxu1 }
 0x19f   :  { %v648_v18 = vadd.f32 %v6263_v3, %v647_v1  ;;  %v807_v30 = vmax.f32 %v653_v15, 0.0 }
 0x1a0   :  { %v5005_v62 = vpop.f32.mrf.mxu1 }
 0x1a1   :  { %v806_v24 = vmax.f32 %v648_v18, 0.0  ;;  %v663_v42 = vadd.f32 %v5005_v62, %v6263_v3 }
 0x1a2   :  { %v657_v45 = vpop.f32.mrf.mxu1 }
 0x1a3   :  { %v658_v43 = vadd.f32 %v6263_v3, %v657_v45  ;;  %5064 = vmatprep.mubr.msk.f32.mxu0 %vm484_vm2, %v806_v24  ;;  %v809_v47 = vmax.f32 %v663_v42, 0.0 }
 0x1a4   :  { %v5008_v44 = vpop.f32.mrf.mxu1  ;;  %5065 = vmatmul.mubr.msk.f32.vlgmr.msra.gmra.mxu0 %vm484_vm2, %v807_v30 }
 0x1a5   :  { %v808_v46 = vmax.f32 %v658_v43, 0.0  ;;  %5163 = vmatpush3.msk.msra.mxu0 %vm208_vm0, %v1208_v54  ;;  %v673_v53 = vadd.f32 %v5008_v44, %v6263_v3 }
 0x1a6   :  { %v667_v48 = vpop.f32.mrf.mxu1  ;;  %5164 = vmatprep.subr.mxu0 %v1207_v21 }
 0x1a7   :  { %v668_v51 = vadd.f32 %v6263_v3, %v667_v48  ;;  %5067 = vmatprep.mubr.msk.f32.mxu0 %vm484_vm2, %v808_v46  ;;  %5165 = vmatpush3.msra.mxu0 %v1207_v21  ;;  %v811_v27 = vmax.f32 %v673_v53, 0.0 }
 0x1a8   :  { %v5011_v49 = vpop.f32.mrf.mxu1  ;;  %5068 = vmatmul.mubr.msk.f32.gmra.mxu0 %vm484_vm2, %v809_v47  ;;  %5166 = vmatprep.subr.mxu0 %v1206_v63 }
 0x1a9   :  { %v810_v52 = vmax.f32 %v668_v51, 0.0  ;;  %5167 = vmatpush3.msra.mxu0 %v1206_v63  ;;  %v683_v55 = vadd.f32 %v5011_v49, %v6263_v3 }
 0x1aa   :  { %v677_v56 = vpop.f32.mrf.mxu1 }
 0x1ab   :  { %v678_v58 = vadd.f32 %v6263_v3, %v677_v56  ;;  %5070 = vmatprep.mubr.msk.f32.mxu0 %vm484_vm2, %v810_v52  ;;  %v813_v57 = vmax.f32 %v683_v55, 0.0 }
 0x1ac   :  { %v5014_v59 = vpop.f32.mrf.mxu1  ;;  %5071 = vmatmul.mubr.msk.f32.gmra.mxu0 %vm484_vm2, %v811_v27 }
 0x1ad   :  { %v812_v60 = vmax.f32 %v678_v58, 0.0  ;;  %v693_v61 = vadd.f32 %v5014_v59, %v6263_v3 }
 0x1ae   :  { %v687_v0 = vpop.f32.mrf.mxu1 }
 0x1af   :  { %v688_v50 = vadd.f32 %v6263_v3, %v687_v0  ;;  %5073 = vmatprep.mubr.msk.f32.mxu0 %vm484_vm2, %v812_v60  ;;  %v815_v15 = vmax.f32 %v693_v61, 0.0 }
 0x1b0   :  { %v5017_v54 = vpop.f32.mrf.mxu1  ;;  %5074 = vmatmul.mubr.msk.f32.gmra.mxu0 %vm484_vm2, %v813_v57 }
 0x1b1   :  { %v814_v13 = vmax.f32 %v688_v50, 0.0  ;;  %v703_v1 = vadd.f32 %v5017_v54, %v6263_v3 }
 0x1b2   :  { %v697_v18 = vpop.f32.mrf.mxu1 }
 0x1b3   :  { %v698_v62 = vadd.f32 %v6263_v3, %v697_v18  ;;  %5076 = vmatprep.mubr.msk.f32.mxu0 %vm484_vm2, %v814_v13  ;;  %v817_v42 = vmax.f32 %v703_v1, 0.0 }
 0x1b4   :  { %v5020_v24 = vpop.f32.mrf.mxu1  ;;  %5077 = vmatmul.mubr.msk.f32.gmra.mxu0 %vm484_vm2, %v815_v15 }
 0x1b5   :  { %v816_v30 = vmax.f32 %v698_v62, 0.0  ;;  %v713_v45 = vadd.f32 %v5020_v24, %v6263_v3 }
 0x1b6   :  { %v707_v43 = vpop.f32.mrf.mxu1 }
 0x1b7   :  { %v708_v21 = vadd.f32 %v6263_v3, %v707_v43  ;;  %5079 = vmatprep.mubr.msk.f32.mxu0 %vm484_vm2, %v816_v30  ;;  %v819_v63 = vmax.f32 %v713_v45, 0.0 }
 0x1b8   :  { %v5023_v44 = vpop.f32.mrf.mxu1  ;;  %5080 = vmatmul.mubr.msk.f32.gmra.mxu0 %vm484_vm2, %v817_v42 }
 0x1b9   :  { %v818_v46 = vmax.f32 %v708_v21, 0.0  ;;  %v723_v47 = vadd.f32 %v5023_v44, %v6263_v3 }
 0x1ba   :  { %v717_v53 = vpop.f32.mrf.mxu1 }
 0x1bb   :  { %v718_v48 = vadd.f32 %v6263_v3, %v717_v53  ;;  %5082 = vmatprep.mubr.msk.f32.mxu0 %vm484_vm2, %v818_v46  ;;  %v821_v52 = vmax.f32 %v723_v47, 0.0 }
 0x1bc   :  { %v5026_v51 = vpop.f32.mrf.mxu1  ;;  %5083 = vmatmul.mubr.msk.f32.gmra.mxu0 %vm484_vm2, %v819_v63 }
 0x1bd   :  { %v820_v49 = vmax.f32 %v718_v48, 0.0  ;;  %v733_v27 = vadd.f32 %v5026_v51, %v6263_v3 }
 0x1be   :  { %v727_v55 = vpop.f32.mrf.mxu1 }
 0x1bf   :  { %v728_v56 = vadd.f32 %v6263_v3, %v727_v55  ;;  %5085 = vmatprep.mubr.msk.f32.mxu0 %vm484_vm2, %v820_v49  ;;  %v823_v60 = vmax.f32 %v733_v27, 0.0 }
 0x1c0   :  { %v5029_v58 = vpop.f32.mrf.mxu1  ;;  %5086 = vmatmul.mubr.msk.f32.gmra.mxu0 %vm484_vm2, %v821_v52 }
 0x1c1   :  { %v822_v59 = vmax.f32 %v728_v56, 0.0  ;;  %v743_v57 = vadd.f32 %v5029_v58, %v6263_v3 }
 0x1c2   :  { %v737_v61 = vpop.f32.mrf.mxu1 }
 0x1c3   :  { %v738_v0 = vadd.f32 %v6263_v3, %v737_v61  ;;  %5088 = vmatprep.mubr.msk.f32.mxu0 %vm484_vm2, %v822_v59  ;;  %v825_v13 = vmax.f32 %v743_v57, 0.0 }
 0x1c4   :  { %v5032_v50 = vpop.f32.mrf.mxu1  ;;  %5089 = vmatmul.mubr.msk.f32.gmra.mxu0 %vm484_vm2, %v823_v60 }
 0x1c5   :  { %v824_v54 = vmax.f32 %v738_v0, 0.0  ;;  %v753_v15 = vadd.f32 %v5032_v50, %v6263_v3 }
 0x1c6   :  { %v747_v1 = vpop.f32.mrf.mxu1 }
 0x1c7   :  { %v748_v18 = vadd.f32 %v6263_v3, %v747_v1  ;;  %5091 = vmatprep.mubr.msk.f32.mxu0 %vm484_vm2, %v824_v54  ;;  %v827_v30 = vmax.f32 %v753_v15, 0.0 }
 0x1c8   :  { %v5035_v62 = vpop.f32.mrf.mxu1  ;;  %5092 = vmatmul.mubr.msk.f32.gmra.mxu0 %vm484_vm2, %v825_v13 }
 0x1c9   :  { %v826_v24 = vmax.f32 %v748_v18, 0.0  ;;  %v763_v42 = vadd.f32 %v5035_v62, %v6263_v3 }
 0x1ca   :  { %v757_v45 = vpop.f32.mrf.mxu1 }
 0x1cb   :  { %v758_v43 = vadd.f32 %v6263_v3, %v757_v45  ;;  %5094 = vmatprep.mubr.msk.f32.mxu0 %vm484_vm2, %v826_v24  ;;  %v829_v46 = vmax.f32 %v763_v42, 0.0 }
 0x1cc   :  { %v5038_v21 = vpop.f32.mrf.mxu1  ;;  %5095 = vmatmul.mubr.msk.f32.gmra.mxu0 %vm484_vm2, %v827_v30  ;;  %v1838_v30 = vld [vmem:[%s7590_s10 + $0x18] sm:$0xff] }
 0x1cd   :  { %v828_v44 = vmax.f32 %v758_v43, 0.0  ;;  %v773_v63 = vadd.f32 %v5038_v21, %v6263_v3 }
 0x1ce   :  { %v767_v47 = vpop.f32.mrf.mxu1 }
 0x1cf   :  { %v768_v53 = vadd.f32 %v6263_v3, %v767_v47  ;;  %5097 = vmatprep.mubr.msk.f32.mxu0 %vm484_vm2, %v828_v44  ;;  %v831_v49 = vmax.f32 %v773_v63, 0.0  ;;  %v1836_v47 = vld [vmem:[%s7590_s10 + $0x8] sm:$0xff] }
 0x1d0   :  { %v5041_v48 = vpop.f32.mrf.mxu1  ;;  %5098 = vmatmul.mubr.msk.f32.gmra.mxu0 %vm484_vm2, %v829_v46  ;;  %v1837_v46 = vld [vmem:[%s7590_s10 + $0x10] sm:$0xff] }
 0x1d1   :  { %v830_v51 = vmax.f32 %v768_v53, 0.0  ;;  %v783_v52 = vadd.f32 %v5041_v48, %v6263_v3 }
 0x1d2   :  { %v777_v27 = vpop.f32.mrf.mxu1 }
 0x1d3   :  { %v778_v55 = vadd.f32 %v6263_v3, %v777_v27  ;;  %5100 = vmatprep.mubr.msk.f32.mxu0 %vm484_vm2, %v830_v51  ;;  %v833_v59 = vmax.f32 %v783_v52, 0.0 }
 0x1d4   :  { %v5044_v56 = vpop.f32.mrf.mxu1  ;;  %5101 = vmatmul.mubr.msk.f32.gmra.mxu0 %vm484_vm2, %v831_v49 }
 0x1d5   :  { %v832_v58 = vmax.f32 %v778_v55, 0.0  ;;  %v793_v60 = vadd.f32 %v5044_v56, %v6263_v3 }
 0x1d6   :  { %v787_v57 = vpop.f32.mrf.mxu1 }
 0x1d7   :  { %v788_v61 = vadd.f32 %v6263_v3, %v787_v57  ;;  %5103 = vmatprep.mubr.msk.f32.mxu0 %vm484_vm2, %v832_v58  ;;  %v835_v54 = vmax.f32 %v793_v60, 0.0 }
 0x1d8   :  { %v5047_v0 = vpop.f32.mrf.mxu1  ;;  %5104 = vmatmul.mubr.msk.f32.gmra.mxu0 %vm484_vm2, %v833_v59 }
 0x1d9   :  { %v834_v50 = vmax.f32 %v788_v61, 0.0  ;;  %v803_v13 = vadd.f32 %v5047_v0, %v6263_v3 }
 0x1da   :  { %v797_v15 = vpop.f32.mrf.mxu1 }
 0x1db   :  { %v798_v1 = vadd.f32 %v6263_v3, %v797_v15  ;;  %5106 = vmatprep.mubr.msk.f32.mxu0 %vm484_vm2, %v834_v50  ;;  %v837_v62 = vmax.f32 %v803_v13, 0.0  ;;  %v1839_v3 = vld [vmem:[%s7590_s10 + $0x20] sm:$0xff] }
 0x1dc   :  { %5107 = vmatmul.mubr.msk.f32.gmra.mxu0 %vm484_vm2, %v835_v54 }
 0x1dd   :  { %v836_v18 = vmax.f32 %v798_v1, 0.0 }
 0x1df   :  { %5109 = vmatprep.mubr.msk.f32.mxu0 %vm484_vm2, %v836_v18 }
 0x1e0   :  { %5110 = vmatmul.mubr.msk.f32.gmra.mxu0 %vm484_vm2, %v837_v62 }
 0x1e1   :  { %5168 = vmatprep.mubr.msk.f32.mxu0 %vm111_vm1, %v5898_v2  ;;  %v1842_v2 = vld [vmem:[%s7590_s10 + $0x38] sm:$0xff] }
 0x1e2   :  { %5216 = vmatprep.subr.mxu1 %v1842_v2 }
 0x1e4   :  { %5169 = vmatmul.mubr.msk.f32.vlgmr.msra.gmra.mxu0 %vm111_vm1, %v5911_v4  ;;  %v6406_v4 = vld [vmem:[%s7586_s6] ss:$0 sm:$0xff] }
 0x1e5   :  { %5171 = vmatprep.mubr.msk.f32.mxu0 %vm111_vm1, %v5916_v5 }
 0x1e8   :  { %5172 = vmatmul.mubr.msk.f32.gmra.mxu0 %vm111_vm1, %v5940_v9 }
 0x1e9   :  { %5174 = vmatprep.mubr.msk.f32.mxu0 %vm111_vm1, %v5947_v10 }
 0x1ec   :  { %5175 = vmatmul.mubr.msk.f32.gmra.mxu0 %vm111_vm1, %v5973_v14 }
 0x1ed   :  { %5177 = vmatprep.mubr.msk.f32.mxu0 %vm111_vm1, %v5981_v16 }
 0x1f0   :  { %5178 = vmatmul.mubr.msk.f32.gmra.mxu0 %vm111_vm1, %v6007_v20 }
 0x1f1   :  { %5180 = vmatprep.mubr.msk.f32.mxu0 %vm111_vm1, %v6015_v22 }
 0x1f4   :  { %5181 = vmatmul.mubr.msk.f32.gmra.mxu0 %vm111_vm1, %v6041_v26 }
 0x1f5   :  { %5183 = vmatprep.mubr.msk.f32.mxu0 %vm111_vm1, %v6049_v28 }
 0x1f8   :  { %5184 = vmatmul.mubr.msk.f32.gmra.mxu0 %vm111_vm1, %v6075_v32 }
 0x1f9   :  { %5186 = vmatprep.mubr.msk.f32.mxu0 %vm111_vm1, %v6080_v33 }
 0x1fc   :  { %5187 = vmatmul.mubr.msk.f32.gmra.mxu0 %vm111_vm1, %v6103_v36  ;;  %v1840_v36 = vld [vmem:[%s7590_s10 + $0x28] sm:$0xff] }
 0x1fd   :  { %5189 = vmatprep.mubr.msk.f32.mxu0 %vm111_vm1, %v6108_v37 }
 0x200   :  { %5190 = vmatmul.mubr.msk.f32.gmra.mxu0 %vm111_vm1, %v6131_v40 }
 0x201   :  { %5192 = vmatprep.mubr.msk.f32.mxu0 %vm111_vm1, %v5921_v6 }
 0x204   :  { %5193 = vmatmul.mubr.msk.f32.gmra.mxu0 %vm111_vm1, %v5926_v7 }
 0x205   :  { %5195 = vmatprep.mubr.msk.f32.mxu0 %vm111_vm1, %v5933_v8 }
 0x208   :  { %5196 = vmatmul.mubr.msk.f32.gmra.mxu0 %vm111_vm1, %v5956_v11 }
 0x209   :  { %5198 = vmatprep.mubr.msk.f32.mxu0 %vm111_vm1, %v5963_v12 }
 0x20c   :  { %5199 = vmatmul.mubr.msk.f32.gmra.mxu0 %vm111_vm1, %v5990_v17 }
 0x20d   :  { %5201 = vmatprep.mubr.msk.f32.mxu0 %vm111_vm1, %v6000_v19 }
 0x210   :  { %5202 = vmatmul.mubr.msk.f32.gmra.mxu0 %vm111_vm1, %v6024_v23 }
 0x211   :  { %5204 = vmatprep.mubr.msk.f32.mxu0 %vm111_vm1, %v6034_v25 }
 0x214   :  { %5205 = vmatmul.mubr.msk.f32.gmra.mxu0 %vm111_vm1, %v6058_v29 }
 0x215   :  { %5207 = vmatprep.mubr.msk.f32.mxu0 %vm111_vm1, %v6068_v31 }
 0x218   :  { %5208 = vmatmul.mubr.msk.f32.gmra.mxu0 %vm111_vm1, %v6089_v34  ;;  %v1841_v34 = vld [vmem:[%s7590_s10 + $0x30] sm:$0xff] }
 0x219   :  { %5210 = vmatprep.mubr.msk.f32.mxu0 %vm111_vm1, %v6096_v35 }
 0x21c   :  { %5211 = vmatmul.mubr.msk.f32.gmra.mxu0 %vm111_vm1, %v6117_v38 }
 0x21d   :  { %5213 = vmatprep.mubr.msk.f32.mxu0 %vm111_vm1, %v6124_v39 }
 0x220   :  { %5214 = vmatmul.mubr.msk.f32.gmra.mxu0 %vm111_vm1, %v6140_v41 }
 0x264   :  { %v5066_v5 = vpop.f32.mrf.mxu0 }
 0x265   :  { %v1021_v6 = vadd.f32 %v5066_v5, %v6406_v4 }
 0x266   :  { %v1015_v7 = vpop.f32.mrf.mxu0 }
 0x267   :  { %v1016_v8 = vadd.f32 %v6406_v4, %v1015_v7 }
 0x268   :  { %v5069_v9 = vpop.f32.mrf.mxu0 }
 0x269   :  { %5593 = vtanh.f32 %v1016_v8  ;;  %v1031_v10 = vadd.f32 %v5069_v9, %v6406_v4 }
 0x26a   :  { %5595 = vtanh.f32 %v1021_v6  ;;  %v1025_v11 = vpop.f32.mrf.mxu0 }
 0x26b   :  { %v1026_v12 = vadd.f32 %v6406_v4, %v1025_v11 }
 0x26c   :  { %v5072_v14 = vpop.f32.mrf.mxu0 }
 0x26d   :  { %5597 = vtanh.f32 %v1026_v12  ;;  %v1041_v16 = vadd.f32 %v5072_v14, %v6406_v4 }
 0x26e   :  { %5599 = vtanh.f32 %v1031_v10  ;;  %v1035_v17 = vpop.f32.mrf.mxu0 }
 0x26f   :  { %v1036_v19 = vadd.f32 %v6406_v4, %v1035_v17 }
 0x270   :  { %v5075_v20 = vpop.f32.mrf.mxu0 }
 0x271   :  { %5601 = vtanh.f32 %v1036_v19  ;;  %v1051_v22 = vadd.f32 %v5075_v20, %v6406_v4 }
 0x272   :  { %5603 = vtanh.f32 %v1041_v16  ;;  %v1045_v23 = vpop.f32.mrf.mxu0 }
 0x273   :  { %v1046_v25 = vadd.f32 %v6406_v4, %v1045_v23 }
 0x274   :  { %v5078_v26 = vpop.f32.mrf.mxu0 }
 0x275   :  { %5605 = vtanh.f32 %v1046_v25  ;;  %v1061_v29 = vadd.f32 %v5078_v26, %v6406_v4 }
 0x276   :  { %v6416_v28 = vpop.eup %5593  ;;  %5607 = vtanh.f32 %v1051_v22  ;;  %v1055_v31 = vpop.f32.mrf.mxu0 }
 0x277   :  { %v6419_v32 = vpop.eup %5595  ;;  %v1056_v33 = vadd.f32 %v6406_v4, %v1055_v31  ;;  %5114 = vmatprep.mubr.msk.f32.mxu1 %vm1210_vm4, %v6416_v28 }
 0x278   :  { %v5081_v35 = vpop.f32.mrf.mxu0  ;;  %5115 = vmatmul.mubr.msk.f32.vlgmr.msra.gmra.mxu1 %vm1210_vm4, %v6419_v32 }
 0x279   :  { %5609 = vtanh.f32 %v1056_v33  ;;  %5217 = vmatpush3.msra.mxu1 %v1842_v2  ;;  %v1071_v38 = vadd.f32 %v5081_v35, %v6406_v4 }
 0x27a   :  { %v6432_v37 = vpop.eup %5597  ;;  %5611 = vtanh.f32 %v1061_v29  ;;  %v1065_v39 = vpop.f32.mrf.mxu0  ;;  %5218 = vmatprep.subr.mxu1 %v1841_v34 }
 0x27b   :  { %v6435_v40 = vpop.eup %5599  ;;  %v1066_v41 = vadd.f32 %v6406_v4, %v1065_v39  ;;  %5117 = vmatprep.mubr.msk.f32.mxu1 %vm1210_vm4, %v6432_v37  ;;  %5219 = vmatpush3.msra.mxu1 %v1841_v34 }
 0x27c   :  { %v5084_v24 = vpop.f32.mrf.mxu0  ;;  %5118 = vmatmul.mubr.msk.f32.gmra.mxu1 %vm1210_vm4, %v6435_v40  ;;  %5220 = vmatprep.subr.mxu1 %v1840_v36 }
 0x27d   :  { %5613 = vtanh.f32 %v1066_v41  ;;  %5221 = vmatpush3.msra.mxu1 %v1840_v36  ;;  %v1081_v45 = vadd.f32 %v5084_v24, %v6406_v4 }
 0x27e   :  { %v6448_v42 = vpop.eup %5601  ;;  %5615 = vtanh.f32 %v1071_v38  ;;  %v1075_v43 = vpop.f32.mrf.mxu0  ;;  %5222 = vmatprep.subr.mxu1 %v1839_v3 }
 0x27f   :  { %v6451_v21 = vpop.eup %5603  ;;  %v1076_v44 = vadd.f32 %v6406_v4, %v1075_v43  ;;  %5120 = vmatprep.mubr.msk.f32.mxu1 %vm1210_vm4, %v6448_v42  ;;  %5223 = vmatpush3.msra.mxu1 %v1839_v3 }
 0x280   :  { %v5087_v63 = vpop.f32.mrf.mxu0  ;;  %5121 = vmatmul.mubr.msk.f32.gmra.mxu1 %vm1210_vm4, %v6451_v21  ;;  %5224 = vmatprep.subr.mxu1 %v1838_v30 }
 0x281   :  { %5617 = vtanh.f32 %v1076_v44  ;;  %5225 = vmatpush3.msra.mxu1 %v1838_v30  ;;  %v1091_v48 = vadd.f32 %v5087_v63, %v6406_v4 }
 0x282   :  { %v6464_v53 = vpop.eup %5605  ;;  %5619 = vtanh.f32 %v1081_v45  ;;  %v1085_v51 = vpop.f32.mrf.mxu0  ;;  %5226 = vmatprep.subr.mxu1 %v1837_v46 }
 0x283   :  { %v6467_v49 = vpop.eup %5607  ;;  %v1086_v52 = vadd.f32 %v6406_v4, %v1085_v51  ;;  %5123 = vmatprep.mubr.msk.f32.mxu1 %vm1210_vm4, %v6464_v53  ;;  %5227 = vmatpush3.msra.mxu1 %v1837_v46 }
 0x284   :  { %v5090_v27 = vpop.f32.mrf.mxu0  ;;  %5124 = vmatmul.mubr.msk.f32.gmra.mxu1 %vm1210_vm4, %v6467_v49  ;;  %5228 = vmatprep.subr.mxu1 %v1836_v47 }
 0x285   :  { %5621 = vtanh.f32 %v1086_v52  ;;  %5229 = vmatpush3.msra.mxu1 %v1836_v47  ;;  %v1101_v56 = vadd.f32 %v5090_v27, %v6406_v4  ;;  %v1835_v27 = vld [vmem:[%s7590_s10] sm:$0xff] }
 0x286   :  { %v6474_v55 = vpop.eup %5609  ;;  %5623 = vtanh.f32 %v1091_v48  ;;  %v1095_v58 = vpop.f32.mrf.mxu0  ;;  %5230 = vmatprep.subr.mxu1 %v1835_v27 }
 0x287   :  { %v6477_v59 = vpop.eup %5611  ;;  %v1096_v60 = vadd.f32 %v6406_v4, %v1095_v58  ;;  %5126 = vmatprep.mubr.msk.f32.mxu1 %vm1210_vm4, %v6474_v55  ;;  %5231 = vmatpush3.msra.mxu1 %v1835_v27 }
 0x288   :  { %v5093_v57 = vpop.f32.mrf.mxu0  ;;  %5127 = vmatmul.mubr.msk.f32.gmra.mxu1 %vm1210_vm4, %v6477_v59 }
 0x289   :  { %5625 = vtanh.f32 %v1096_v60  ;;  %v1111_v0 = vadd.f32 %v5093_v57, %v6406_v4  ;;  %v2206_v60 = vld [vmem:[%s7592_s12 + $0x18] sm:$0xff]  ;;  %v2205_v57 = vld [vmem:[%s7592_s12 + $0x10] sm:$0xff] }
 0x28a   :  { %v6484_v61 = vpop.eup %5613  ;;  %5627 = vtanh.f32 %v1101_v56  ;;  %v1105_v50 = vpop.f32.mrf.mxu0  ;;  %5280 = vmatprep.subr.mxu0 %v2206_v60 }
 0x28b   :  { %v6487_v54 = vpop.eup %5615  ;;  %v1106_v13 = vadd.f32 %v6406_v4, %v1105_v50  ;;  %5129 = vmatprep.mubr.msk.f32.mxu1 %vm1210_vm4, %v6484_v61  ;;  %5281 = vmatpush3.msra.mxu0 %v2206_v60 }
 0x28c   :  { %v5096_v15 = vpop.f32.mrf.mxu0  ;;  %5130 = vmatmul.mubr.msk.f32.gmra.mxu1 %vm1210_vm4, %v6487_v54  ;;  %5282 = vmatprep.subr.mxu0 %v2205_v57 }
 0x28d   :  { %5629 = vtanh.f32 %v1106_v13  ;;  %v1121_v18 = vadd.f32 %v5096_v15, %v6406_v4  ;;  %5283 = vmatpush3.msra.mxu0 %v2205_v57  ;;  %v2203_v13 = vld [vmem:[%s7592_s12] sm:$0xff] }
 0x28e   :  { %v6494_v1 = vpop.eup %5617  ;;  %5631 = vtanh.f32 %v1111_v0  ;;  %v1115_v62 = vpop.f32.mrf.mxu0  ;;  %v2204_v0 = vld [vmem:[%s7592_s12 + $0x8] sm:$0xff] }
 0x28f   :  { %v6497_v2 = vpop.eup %5619  ;;  %v1116_v5 = vadd.f32 %v6406_v4, %v1115_v62  ;;  %5132 = vmatprep.mubr.msk.f32.mxu1 %vm1210_vm4, %v6494_v1  ;;  %5284 = vmatprep.subr.mxu0 %v2204_v0 }
 0x290   :  { %v5099_v6 = vpop.f32.mrf.mxu0  ;;  %5133 = vmatmul.mubr.msk.f32.gmra.mxu1 %vm1210_vm4, %v6497_v2  ;;  %5285 = vmatpush3.msra.mxu0 %v2204_v0 }
 0x291   :  { %5633 = vtanh.f32 %v1116_v5  ;;  %v1131_v8 = vadd.f32 %v5099_v6, %v6406_v4  ;;  %5286 = vmatprep.subr.mxu0 %v2203_v13 }
 0x292   :  { %v6504_v7 = vpop.eup %5621  ;;  %5635 = vtanh.f32 %v1121_v18  ;;  %v1125_v9 = vpop.f32.mrf.mxu0  ;;  %5287 = vmatpush3.msra.mxu0 %v2203_v13 }
 0x293   :  { %v6507_v10 = vpop.eup %5623  ;;  %v1126_v11 = vadd.f32 %v6406_v4, %v1125_v9  ;;  %5135 = vmatprep.mubr.msk.f32.mxu1 %vm1210_vm4, %v6504_v7 }
 0x294   :  { %v5102_v12 = vpop.f32.mrf.mxu0  ;;  %5136 = vmatmul.mubr.msk.f32.gmra.mxu1 %vm1210_vm4, %v6507_v10 }
 0x295   :  { %5637 = vtanh.f32 %v1126_v11  ;;  %v1141_v16 = vadd.f32 %v5102_v12, %v6406_v4 }
 0x296   :  { %v6514_v14 = vpop.eup %5625  ;;  %5639 = vtanh.f32 %v1131_v8  ;;  %v1135_v17 = vpop.f32.mrf.mxu0 }
 0x297   :  { %v6517_v19 = vpop.eup %5627  ;;  %v1136_v20 = vadd.f32 %v6406_v4, %v1135_v17  ;;  %5138 = vmatprep.mubr.msk.f32.mxu1 %vm1210_vm4, %v6514_v14 }
 0x298   :  { %v5105_v22 = vpop.f32.mrf.mxu0  ;;  %5139 = vmatmul.mubr.msk.f32.gmra.mxu1 %vm1210_vm4, %v6517_v19 }
 0x299   :  { %5641 = vtanh.f32 %v1136_v20  ;;  %v1151_v25 = vadd.f32 %v5105_v22, %v6406_v4 }
 0x29a   :  { %v6524_v23 = vpop.eup %5629  ;;  %5643 = vtanh.f32 %v1141_v16  ;;  %v1145_v26 = vpop.f32.mrf.mxu0 }
 0x29b   :  { %v6527_v29 = vpop.eup %5631  ;;  %v1146_v31 = vadd.f32 %v6406_v4, %v1145_v26  ;;  %5141 = vmatprep.mubr.msk.f32.mxu1 %vm1210_vm4, %v6524_v23 }
 0x29c   :  { %v5108_v33 = vpop.f32.mrf.mxu0  ;;  %5142 = vmatmul.mubr.msk.f32.gmra.mxu1 %vm1210_vm4, %v6527_v29 }
 0x29d   :  { %5645 = vtanh.f32 %v1146_v31  ;;  %v1161_v35 = vadd.f32 %v5108_v33, %v6406_v4  ;;  %v6614_v33 = vld [vmem:[%s7589_s9] ss:$0 sm:$0xff] }
 0x29e   :  { %v6534_v34 = vpop.eup %5633  ;;  %5647 = vtanh.f32 %v1151_v25  ;;  %v1155_v36 = vpop.f32.mrf.mxu0 }
 0x29f   :  { %v6537_v38 = vpop.eup %5635  ;;  %v1156_v39 = vadd.f32 %v6406_v4, %v1155_v36  ;;  %5144 = vmatprep.mubr.msk.f32.mxu1 %vm1210_vm4, %v6534_v34 }
 0x2a0   :  { %v5111_v41 = vpop.f32.mrf.mxu0  ;;  %5145 = vmatmul.mubr.msk.f32.gmra.mxu1 %vm1210_vm4, %v6537_v38 }
 0x2a1   :  { %5649 = vtanh.f32 %v1156_v39  ;;  %v1171_v24 = vadd.f32 %v5111_v41, %v6406_v4 }
 0x2a2   :  { %v6544_v3 = vpop.eup %5637  ;;  %5651 = vtanh.f32 %v1161_v35  ;;  %v1165_v30 = vpop.f32.mrf.mxu0 }
 0x2a3   :  { %v6547_v45 = vpop.eup %5639  ;;  %v1166_v43 = vadd.f32 %v6406_v4, %v1165_v30  ;;  %5147 = vmatprep.mubr.msk.f32.mxu1 %vm1210_vm4, %v6544_v3 }
 0x2a4   :  { %5148 = vmatmul.mubr.msk.f32.gmra.mxu1 %vm1210_vm4, %v6547_v45  ;;  %v5170_v56 = vpop.f32.mrf.mxu0 }
 0x2a5   :  { %5653 = vtanh.f32 %v1166_v43 }
 0x2a6   :  { %v6554_v44 = vpop.eup %5641  ;;  %5655 = vtanh.f32 %v1171_v24  ;;  %v1605_v58 = vpop.f32.mrf.mxu0 }
 0x2a7   :  { %v6556_v46 = vpop.eup %5643  ;;  %5150 = vmatprep.mubr.msk.f32.mxu1 %vm1210_vm4, %v6554_v44 }
 0x2a8   :  { %5151 = vmatmul.mubr.msk.f32.gmra.mxu1 %vm1210_vm4, %v6556_v46  ;;  %v5173_v50 = vpop.f32.mrf.mxu0 }
 0x2aa   :  { %v6562_v63 = vpop.eup %5645  ;;  %v1615_v15 = vpop.f32.mrf.mxu0 }
 0x2ab   :  { %v6564_v4 = vpop.eup %5647  ;;  %5153 = vmatprep.mubr.msk.f32.mxu1 %vm1210_vm4, %v6562_v63 }
 0x2ac   :  { %5154 = vmatmul.mubr.msk.f32.gmra.mxu1 %vm1210_vm4, %v6564_v4  ;;  %v5176_v18 = vpop.f32.mrf.mxu0 }
 0x2ae   :  { %v6570_v47 = vpop.eup %5649  ;;  %v1625_v62 = vpop.f32.mrf.mxu0 }
 0x2af   :  { %v6572_v48 = vpop.eup %5651  ;;  %5156 = vmatprep.mubr.msk.f32.mxu1 %vm1210_vm4, %v6570_v47 }
 0x2b0   :  { %5157 = vmatmul.mubr.msk.f32.gmra.mxu1 %vm1210_vm4, %v6572_v48  ;;  %v5179_v5 = vpop.f32.mrf.mxu0 }
 0x2b2   :  { %v6578_v51 = vpop.eup %5653  ;;  %v1635_v6 = vpop.f32.mrf.mxu0 }
 0x2b3   :  { %7653 = vst [vmem:[#allocation5_spill] sm:$0xff] %v6578_v51  ;;  %v6580_v52 = vpop.eup %5655  ;;  %5159 = vmatprep.mubr.msk.f32.mxu1 %vm1210_vm4, %v6578_v51 }
 0x2b4   :  { %5160 = vmatmul.mubr.msk.f32.gmra.mxu1 %vm1210_vm4, %v6580_v52  ;;  %v5182_v8 = vpop.f32.mrf.mxu0 }
 0x2b6   :  { %v1645_v9 = vpop.f32.mrf.mxu0 }
 0x2b8   :  { %v5185_v11 = vpop.f32.mrf.mxu0 }
 0x2ba   :  { %v1655_v12 = vpop.f32.mrf.mxu0 }
 0x2bc   :  { %v6601_v16 = vpop.f32.mrf.mxu0 }
 0x2be   :  { %v6603_v17 = vpop.f32.mrf.mxu0 }
 0x2c0   :  { %v6605_v20 = vpop.f32.mrf.mxu0 }
 0x2c2   :  { %v6607_v22 = vpop.f32.mrf.mxu0 }
 0x2c4   :  { %v6609_v26 = vpop.f32.mrf.mxu0 }
 0x2c6   :  { %v6617_v24 = vpop.f32.mrf.mxu0 }
 0x338   :  { %v5116_v25 = vpop.f32.mrf.mxu1 }
 0x339   :  { %v1611_v31 = vadd.f32 %v5170_v56, %v5116_v25  ;;  %v6621_v25 = vpop.f32.mrf.mxu0 }
 0x33a   :  { %v1377_v35 = vpop.f32.mrf.mxu1 }
 0x33b   :  { %v1606_v36 = vadd.f32 %v1605_v58, %v1377_v35  ;;  %v1772_v39 = vadd.f32 %v6614_v33, %v1611_v31 }
 0x33c   :  { %v5119_v41 = vpop.f32.mrf.mxu1 }
 0x33d   :  { %v1771_v30 = vadd.f32 %v6614_v33, %v1606_v36  ;;  %v1621_v43 = vadd.f32 %v5173_v50, %v5119_v41  ;;  %v1804_v0 = vmax.f32 %v1772_v39, 0.0  ;;  %v6627_v39 = vpop.f32.mrf.mxu0 }
 0x33e   :  { %v1387_v27 = vpop.f32.mrf.mxu1 }
 0x33f   :  { %v1803_v60 = vmax.f32 %v1771_v30, 0.0  ;;  %v1616_v57 = vadd.f32 %v1615_v15, %v1387_v27  ;;  %v1774_v56 = vadd.f32 %v6614_v33, %v1621_v43 }
 0x340   :  { %v5122_v13 = vpop.f32.mrf.mxu1 }
 0x341   :  { %v1773_v51 = vadd.f32 %v6614_v33, %v1616_v57  ;;  %v1631_v58 = vadd.f32 %v5176_v18, %v5122_v13  ;;  %5232 = vmatprep.mubr.msk.f32.mxu1 %vm484_vm2, %v1803_v60  ;;  %v1806_v50 = vmax.f32 %v1774_v56, 0.0 }
 0x342   :  { %v1397_v31 = vpop.f32.mrf.mxu1  ;;  %5233 = vmatmul.mubr.msk.f32.vlgmr.msra.gmra.mxu1 %vm484_vm2, %v1804_v0  ;;  %v6633_v0 = vpop.f32.mrf.mxu0 }
 0x343   :  { %v1805_v35 = vmax.f32 %v1773_v51, 0.0  ;;  %v1626_v36 = vadd.f32 %v1625_v62, %v1397_v31  ;;  %v1776_v41 = vadd.f32 %v6614_v33, %v1631_v58 }
 0x344   :  { %v5125_v15 = vpop.f32.mrf.mxu1 }
 0x345   :  { %v1775_v30 = vadd.f32 %v6614_v33, %v1626_v36  ;;  %v1641_v43 = vadd.f32 %v5179_v5, %v5125_v15  ;;  %5235 = vmatprep.mubr.msk.f32.mxu1 %vm484_vm2, %v1805_v35  ;;  %v1808_v57 = vmax.f32 %v1776_v41, 0.0 }
 0x346   :  { %v1407_v27 = vpop.f32.mrf.mxu1  ;;  %5236 = vmatmul.mubr.msk.f32.gmra.mxu1 %vm484_vm2, %v1806_v50  ;;  %v1705_v50 = vpop.f32.mrf.mxu0 }
 0x347   :  { %v1807_v18 = vmax.f32 %v1775_v30, 0.0  ;;  %v1636_v60 = vadd.f32 %v1635_v6, %v1407_v27  ;;  %v1778_v51 = vadd.f32 %v6614_v33, %v1641_v43 }
 0x348   :  { %v5128_v62 = vpop.f32.mrf.mxu1 }
 0x349   :  { %v1777_v56 = vadd.f32 %v6614_v33, %v1636_v60  ;;  %v1651_v13 = vadd.f32 %v5182_v8, %v5128_v62  ;;  %5238 = vmatprep.mubr.msk.f32.mxu1 %vm484_vm2, %v1807_v18  ;;  %v1810_v35 = vmax.f32 %v1778_v51, 0.0 }
 0x34a   :  { %v1417_v58 = vpop.f32.mrf.mxu1  ;;  %5239 = vmatmul.mubr.msk.f32.gmra.mxu1 %vm484_vm2, %v1808_v57 }
 0x34b   :  { %v1809_v5 = vmax.f32 %v1777_v56, 0.0  ;;  %v1646_v31 = vadd.f32 %v1645_v9, %v1417_v58  ;;  %v1780_v36 = vadd.f32 %v6614_v33, %v1651_v13  ;;  %v5203_v9 = vpop.f32.mrf.mxu0 }
 0x34c   :  { %v5131_v6 = vpop.f32.mrf.mxu1 }
 0x34d   :  { %v1779_v41 = vadd.f32 %v6614_v33, %v1646_v31  ;;  %v1661_v15 = vadd.f32 %v5185_v11, %v5131_v6  ;;  %5241 = vmatprep.mubr.msk.f32.mxu1 %vm484_vm2, %v1809_v5  ;;  %v1812_v27 = vmax.f32 %v1780_v36, 0.0  ;;  %v1715_v5 = vpop.f32.mrf.mxu0 }
 0x34e   :  { %v1427_v30 = vpop.f32.mrf.mxu1  ;;  %5242 = vmatmul.mubr.msk.f32.gmra.mxu1 %vm484_vm2, %v1810_v35 }
 0x34f   :  { %v1811_v8 = vmax.f32 %v1779_v41, 0.0  ;;  %v1656_v43 = vadd.f32 %v1655_v12, %v1427_v30  ;;  %v1782_v18 = vadd.f32 %v6614_v33, %v1661_v15  ;;  %v5206_v30 = vpop.f32.mrf.mxu0 }
 0x350   :  { %v5134_v60 = vpop.f32.mrf.mxu1 }
 0x351   :  { %v1781_v57 = vadd.f32 %v6614_v33, %v1656_v43  ;;  %v1671_v51 = vadd.f32 %v6601_v16, %v5134_v60  ;;  %5244 = vmatprep.mubr.msk.f32.mxu1 %vm484_vm2, %v1811_v8  ;;  %v1814_v13 = vmax.f32 %v1782_v18, 0.0 }
 0x352   :  { %v1437_v62 = vpop.f32.mrf.mxu1  ;;  %5245 = vmatmul.mubr.msk.f32.gmra.mxu1 %vm484_vm2, %v1812_v27 }
 0x353   :  { %v1813_v11 = vmax.f32 %v1781_v57, 0.0  ;;  %v1666_v56 = vadd.f32 %v6603_v17, %v1437_v62  ;;  %v1784_v12 = vadd.f32 %v6614_v33, %v1671_v51  ;;  %v1725_v51 = vpop.f32.mrf.mxu0 }
 0x354   :  { %v5137_v58 = vpop.f32.mrf.mxu1 }
 0x355   :  { %v1783_v31 = vadd.f32 %v6614_v33, %v1666_v56  ;;  %v1681_v35 = vadd.f32 %v6605_v20, %v5137_v58  ;;  %5247 = vmatprep.mubr.msk.f32.mxu1 %vm484_vm2, %v1813_v11  ;;  %v1816_v41 = vmax.f32 %v1784_v12, 0.0 }
 0x356   :  { %v1447_v16 = vpop.f32.mrf.mxu1  ;;  %5248 = vmatmul.mubr.msk.f32.gmra.mxu1 %vm484_vm2, %v1814_v13 }
 0x357   :  { %v1815_v36 = vmax.f32 %v1783_v31, 0.0  ;;  %v1676_v6 = vadd.f32 %v6607_v22, %v1447_v16  ;;  %v1786_v17 = vadd.f32 %v6614_v33, %v1681_v35  ;;  %v5209_v31 = vpop.f32.mrf.mxu0 }
 0x358   :  { %v5140_v15 = vpop.f32.mrf.mxu1 }
 0x359   :  { %v1785_v8 = vadd.f32 %v6614_v33, %v1676_v6  ;;  %v1691_v43 = vadd.f32 %v6609_v26, %v5140_v15  ;;  %5250 = vmatprep.mubr.msk.f32.mxu1 %vm484_vm2, %v1815_v36  ;;  %v1818_v60 = vmax.f32 %v1786_v17, 0.0  ;;  %v1735_v15 = vpop.f32.mrf.mxu0 }
 0x35a   :  { %v1457_v20 = vpop.f32.mrf.mxu1  ;;  %5251 = vmatmul.mubr.msk.f32.gmra.mxu1 %vm484_vm2, %v1816_v41 }
 0x35b   :  { %v1817_v27 = vmax.f32 %v1785_v8, 0.0  ;;  %v1686_v18 = vadd.f32 %v6617_v24, %v1457_v20  ;;  %v1788_v22 = vadd.f32 %v6614_v33, %v1691_v43 }
 0x35c   :  { %v5143_v57 = vpop.f32.mrf.mxu1 }
 0x35d   :  { %v1787_v62 = vadd.f32 %v6614_v33, %v1686_v18  ;;  %v1701_v11 = vadd.f32 %v6621_v25, %v5143_v57  ;;  %5253 = vmatprep.mubr.msk.f32.mxu1 %vm484_vm2, %v1817_v27  ;;  %v1820_v12 = vmax.f32 %v1788_v22, 0.0 }
 0x35e   :  { %v1467_v26 = vpop.f32.mrf.mxu1  ;;  %5254 = vmatmul.mubr.msk.f32.gmra.mxu1 %vm484_vm2, %v1818_v60 }
 0x35f   :  { %v1819_v56 = vmax.f32 %v1787_v62, 0.0  ;;  %v1696_v13 = vadd.f32 %v6627_v39, %v1467_v26  ;;  %v1790_v24 = vadd.f32 %v6614_v33, %v1701_v11 }
 0x360   :  { %v5146_v58 = vpop.f32.mrf.mxu1 }
 0x361   :  { %v1789_v35 = vadd.f32 %v6614_v33, %v1696_v13  ;;  %v1711_v16 = vadd.f32 %v6633_v0, %v5146_v58  ;;  %5256 = vmatprep.mubr.msk.f32.mxu1 %vm484_vm2, %v1819_v56  ;;  %v1822_v41 = vmax.f32 %v1790_v24, 0.0 }
 0x362   :  { %v1477_v25 = vpop.f32.mrf.mxu1  ;;  %5257 = vmatmul.mubr.msk.f32.gmra.mxu1 %vm484_vm2, %v1820_v12 }
 0x363   :  { %v1821_v36 = vmax.f32 %v1789_v35, 0.0  ;;  %v1706_v6 = vadd.f32 %v1705_v50, %v1477_v25  ;;  %v1792_v17 = vadd.f32 %v6614_v33, %v1711_v16  ;;  %v5212_v50 = vpop.f32.mrf.mxu0 }
 0x364   :  { %v5149_v39 = vpop.f32.mrf.mxu1 }
 0x365   :  { %v1791_v8 = vadd.f32 %v6614_v33, %v1706_v6  ;;  %v1721_v43 = vadd.f32 %v5203_v9, %v5149_v39  ;;  %5259 = vmatprep.mubr.msk.f32.mxu1 %vm484_vm2, %v1821_v36  ;;  %v1824_v18 = vmax.f32 %v1792_v17, 0.0 }
 0x366   :  { %v1487_v20 = vpop.f32.mrf.mxu1  ;;  %5260 = vmatmul.mubr.msk.f32.gmra.mxu1 %vm484_vm2, %v1822_v41 }
 0x367   :  { %v1823_v0 = vmax.f32 %v1791_v8, 0.0  ;;  %v1716_v27 = vadd.f32 %v1715_v5, %v1487_v20  ;;  %v1794_v60 = vadd.f32 %v6614_v33, %v1721_v43  ;;  %v1745_v5 = vpop.f32.mrf.mxu0 }
 0x368   :  { %v5152_v22 = vpop.f32.mrf.mxu1 }
 0x369   :  { %v1793_v57 = vadd.f32 %v6614_v33, %v1716_v27  ;;  %v1731_v62 = vadd.f32 %v5206_v30, %v5152_v22  ;;  %5262 = vmatprep.mubr.msk.f32.mxu1 %vm484_vm2, %v1823_v0  ;;  %v1826_v56 = vmax.f32 %v1794_v60, 0.0 }
 0x36a   :  { %v1497_v11 = vpop.f32.mrf.mxu1  ;;  %5263 = vmatmul.mubr.msk.f32.gmra.mxu1 %vm484_vm2, %v1824_v18 }
 0x36b   :  { %v1825_v9 = vmax.f32 %v1793_v57, 0.0  ;;  %v1726_v26 = vadd.f32 %v1725_v51, %v1497_v11  ;;  %v1796_v13 = vadd.f32 %v6614_v33, %v1731_v62  ;;  %v5215_v51 = vpop.f32.mrf.mxu0 }
 0x36c   :  { %v5155_v12 = vpop.f32.mrf.mxu1 }
 0x36d   :  { %v1795_v24 = vadd.f32 %v6614_v33, %v1726_v26  ;;  %v1741_v58 = vadd.f32 %v5209_v31, %v5155_v12  ;;  %5265 = vmatprep.mubr.msk.f32.mxu1 %vm484_vm2, %v1825_v9  ;;  %v1828_v25 = vmax.f32 %v1796_v13, 0.0  ;;  %v2698_v13 = vld [vmem:[%s7594_s14 + $0x10] sm:$0x3f] }
 0x36e   :  { %v1507_v35 = vpop.f32.mrf.mxu1  ;;  %5266 = vmatmul.mubr.msk.f32.gmra.mxu1 %vm484_vm2, %v1826_v56  ;;  %v2699_v56 = vld [vmem:[%s7595_s15] sm:$0x7]  ;;  %5386 = vmatprep.subr.msk.mxu0 %vm208_vm0, %v2698_v13 }
 0x36f   :  { %v1827_v30 = vmax.f32 %v1795_v24, 0.0  ;;  %v1736_v16 = vadd.f32 %v1735_v15, %v1507_v35  ;;  %v1798_v36 = vadd.f32 %v6614_v33, %v1741_v58  ;;  %v1755_v15 = vpop.f32.mrf.mxu0  ;;  %5336 = vmatprep.subr.msk.mxu1 %vm1307_vm3, %v2699_v56 }
 0x370   :  { %v5158_v6 = vpop.f32.mrf.mxu1  ;;  %5337 = vmatpush3.msk.msra.mxu1 %vm1307_vm3, %v2699_v56 }
 0x371   :  { %v1797_v41 = vadd.f32 %v6614_v33, %v1736_v16  ;;  %v1751_v17 = vadd.f32 %v5212_v50, %v5158_v6  ;;  %5268 = vmatprep.mubr.msk.f32.mxu1 %vm484_vm2, %v1827_v30  ;;  %v1830_v43 = vmax.f32 %v1798_v36, 0.0 }
 0x372   :  { %v1517_v39 = vpop.f32.mrf.mxu1  ;;  %5269 = vmatmul.mubr.msk.f32.gmra.mxu1 %vm484_vm2, %v1828_v25 }
 0x373   :  { %v1829_v31 = vmax.f32 %v1797_v41, 0.0  ;;  %v1746_v8 = vadd.f32 %v1745_v5, %v1517_v39  ;;  %v1800_v20 = vadd.f32 %v6614_v33, %v1751_v17 }
 0x374   :  { %v5161_v0 = vpop.f32.mrf.mxu1 }
 0x375   :  { %v1799_v27 = vadd.f32 %v6614_v33, %v1746_v8  ;;  %v1761_v18 = vadd.f32 %v5215_v51, %v5161_v0  ;;  %5271 = vmatprep.mubr.msk.f32.mxu1 %vm484_vm2, %v1829_v31  ;;  %v1832_v57 = vmax.f32 %v1800_v20, 0.0  ;;  %v2697_v51 = vld [vmem:[%s7594_s14 + $0x8] sm:$0xff] }
 0x376   :  { %v1527_v60 = vpop.f32.mrf.mxu1  ;;  %5272 = vmatmul.mubr.msk.f32.gmra.mxu1 %vm484_vm2, %v1830_v43 }
 0x377   :  { %v1831_v22 = vmax.f32 %v1799_v27, 0.0  ;;  %v1756_v50 = vadd.f32 %v1755_v15, %v1527_v60  ;;  %v1802_v62 = vadd.f32 %v6614_v33, %v1761_v18 }
 0x379   :  { %v1801_v11 = vadd.f32 %v6614_v33, %v1756_v50  ;;  %5274 = vmatprep.mubr.msk.f32.mxu1 %vm484_vm2, %v1831_v22  ;;  %v1834_v26 = vmax.f32 %v1802_v62, 0.0  ;;  %v6709_v33 = vld [vmem:[%s7591_s11] ss:$0 sm:$0xff] }
 0x37a   :  { %5275 = vmatmul.mubr.msk.f32.gmra.mxu1 %vm484_vm2, %v1832_v57 }
 0x37b   :  { %v1833_v9 = vmax.f32 %v1801_v11, 0.0 }
 0x37d   :  { %5277 = vmatprep.mubr.msk.f32.mxu1 %vm484_vm2, %v1833_v9 }
 0x37e   :  { %5278 = vmatmul.mubr.msk.f32.gmra.mxu1 %vm484_vm2, %v1834_v26 }
 0x402   :  { %v5234_v12 = vpop.f32.mrf.mxu1 }
 0x403   :  { %v2018_v5 = vadd.f32 %v5234_v12, %v6709_v33 }
 0x404   :  { %v2012_v24 = vpop.f32.mrf.mxu1 }
 0x405   :  { %v2013_v58 = vadd.f32 %v6709_v33, %v2012_v24  ;;  %v2172_v16 = vmax.f32 %v2018_v5, 0.0 }
 0x406   :  { %v5237_v35 = vpop.f32.mrf.mxu1 }
 0x407   :  { %v2171_v30 = vmax.f32 %v2013_v58, 0.0  ;;  %v2028_v25 = vadd.f32 %v5237_v35, %v6709_v33 }
 0x408   :  { %v2022_v36 = vpop.f32.mrf.mxu1 }
 0x409   :  { %v2023_v6 = vadd.f32 %v6709_v33, %v2022_v36  ;;  %5288 = vmatprep.mubr.msk.f32.mxu0 %vm2214_vm5, %v2171_v30  ;;  %v2174_v39 = vmax.f32 %v2028_v25, 0.0 }
 0x40a   :  { %v5240_v41 = vpop.f32.mrf.mxu1  ;;  %5289 = vmatmul.mubr.msk.f32.vlgmr.msra.gmra.mxu0 %vm2214_vm5, %v2172_v16 }
 0x40b   :  { %v2173_v17 = vmax.f32 %v2023_v6, 0.0  ;;  %5387 = vmatpush3.msk.msra.mxu0 %vm208_vm0, %v2698_v13  ;;  %v2038_v31 = vadd.f32 %v5240_v41, %v6709_v33 }
 0x40c   :  { %v2032_v8 = vpop.f32.mrf.mxu1  ;;  %5388 = vmatprep.subr.mxu0 %v2697_v51 }
 0x40d   :  { %v2033_v43 = vadd.f32 %v6709_v33, %v2032_v8  ;;  %5291 = vmatprep.mubr.msk.f32.mxu0 %vm2214_vm5, %v2173_v17  ;;  %5389 = vmatpush3.msra.mxu0 %v2697_v51  ;;  %v2176_v15 = vmax.f32 %v2038_v31, 0.0 }
 0x40e   :  { %v5243_v20 = vpop.f32.mrf.mxu1  ;;  %5292 = vmatmul.mubr.msk.f32.gmra.mxu0 %vm2214_vm5, %v2174_v39 }
 0x40f   :  { %v2175_v0 = vmax.f32 %v2033_v43, 0.0  ;;  %v2048_v27 = vadd.f32 %v5243_v20, %v6709_v33 }
 0x410   :  { %v2042_v18 = vpop.f32.mrf.mxu1 }
 0x411   :  { %v2043_v60 = vadd.f32 %v6709_v33, %v2042_v18  ;;  %5294 = vmatprep.mubr.msk.f32.mxu0 %vm2214_vm5, %v2175_v0  ;;  %v2178_v57 = vmax.f32 %v2048_v27, 0.0 }
 0x412   :  { %v5246_v22 = vpop.f32.mrf.mxu1  ;;  %5295 = vmatmul.mubr.msk.f32.gmra.mxu0 %vm2214_vm5, %v2176_v15 }
 0x413   :  { %v2177_v50 = vmax.f32 %v2043_v60, 0.0  ;;  %v2058_v62 = vadd.f32 %v5246_v22, %v6709_v33 }
 0x414   :  { %v2052_v11 = vpop.f32.mrf.mxu1 }
 0x415   :  { %v2053_v9 = vadd.f32 %v6709_v33, %v2052_v11  ;;  %5297 = vmatprep.mubr.msk.f32.mxu0 %vm2214_vm5, %v2177_v50  ;;  %v2180_v13 = vmax.f32 %v2058_v62, 0.0 }
 0x416   :  { %v5249_v26 = vpop.f32.mrf.mxu1  ;;  %5298 = vmatmul.mubr.msk.f32.gmra.mxu0 %vm2214_vm5, %v2178_v57 }
 0x417   :  { %v2179_v56 = vmax.f32 %v2053_v9, 0.0  ;;  %v2068_v12 = vadd.f32 %v5249_v26, %v6709_v33 }
 0x418   :  { %v2062_v5 = vpop.f32.mrf.mxu1 }
 0x419   :  { %v2063_v24 = vadd.f32 %v6709_v33, %v2062_v5  ;;  %5300 = vmatprep.mubr.msk.f32.mxu0 %vm2214_vm5, %v2179_v56  ;;  %v2182_v30 = vmax.f32 %v2068_v12, 0.0 }
 0x41a   :  { %v5252_v58 = vpop.f32.mrf.mxu1  ;;  %5301 = vmatmul.mubr.msk.f32.gmra.mxu0 %vm2214_vm5, %v2180_v13 }
 0x41b   :  { %v2181_v35 = vmax.f32 %v2063_v24, 0.0  ;;  %v2078_v16 = vadd.f32 %v5252_v58, %v6709_v33 }
 0x41c   :  { %v2072_v25 = vpop.f32.mrf.mxu1 }
 0x41d   :  { %v2073_v36 = vadd.f32 %v6709_v33, %v2072_v25  ;;  %5303 = vmatprep.mubr.msk.f32.mxu0 %vm2214_vm5, %v2181_v35  ;;  %v2184_v41 = vmax.f32 %v2078_v16, 0.0 }
 0x41e   :  { %v5255_v6 = vpop.f32.mrf.mxu1  ;;  %5304 = vmatmul.mubr.msk.f32.gmra.mxu0 %vm2214_vm5, %v2182_v30 }
 0x41f   :  { %v2183_v51 = vmax.f32 %v2073_v36, 0.0  ;;  %v2088_v17 = vadd.f32 %v5255_v6, %v6709_v33 }
 0x420   :  { %v2082_v39 = vpop.f32.mrf.mxu1 }
 0x421   :  { %v2083_v31 = vadd.f32 %v6709_v33, %v2082_v39  ;;  %5306 = vmatprep.mubr.msk.f32.mxu0 %vm2214_vm5, %v2183_v51  ;;  %v2186_v20 = vmax.f32 %v2088_v17, 0.0 }
 0x422   :  { %v5258_v8 = vpop.f32.mrf.mxu1  ;;  %5307 = vmatmul.mubr.msk.f32.gmra.mxu0 %vm2214_vm5, %v2184_v41 }
 0x423   :  { %v2185_v43 = vmax.f32 %v2083_v31, 0.0  ;;  %v2098_v0 = vadd.f32 %v5258_v8, %v6709_v33 }
 0x424   :  { %v2092_v15 = vpop.f32.mrf.mxu1 }
 0x425   :  { %v2093_v27 = vadd.f32 %v6709_v33, %v2092_v15  ;;  %5309 = vmatprep.mubr.msk.f32.mxu0 %vm2214_vm5, %v2185_v43  ;;  %v2188_v22 = vmax.f32 %v2098_v0, 0.0 }
 0x426   :  { %v5261_v18 = vpop.f32.mrf.mxu1  ;;  %5310 = vmatmul.mubr.msk.f32.gmra.mxu0 %vm2214_vm5, %v2186_v20 }
 0x427   :  { %v2187_v60 = vmax.f32 %v2093_v27, 0.0  ;;  %v2108_v50 = vadd.f32 %v5261_v18, %v6709_v33 }
 0x428   :  { %v2102_v57 = vpop.f32.mrf.mxu1 }
 0x429   :  { %v2103_v62 = vadd.f32 %v6709_v33, %v2102_v57  ;;  %5312 = vmatprep.mubr.msk.f32.mxu0 %vm2214_vm5, %v2187_v60  ;;  %v2190_v26 = vmax.f32 %v2108_v50, 0.0 }
 0x42a   :  { %v5264_v11 = vpop.f32.mrf.mxu1  ;;  %5313 = vmatmul.mubr.msk.f32.gmra.mxu0 %vm2214_vm5, %v2188_v22 }
 0x42b   :  { %v2189_v9 = vmax.f32 %v2103_v62, 0.0  ;;  %v2118_v56 = vadd.f32 %v5264_v11, %v6709_v33 }
 0x42c   :  { %v2112_v13 = vpop.f32.mrf.mxu1 }
 0x42d   :  { %v2113_v12 = vadd.f32 %v6709_v33, %v2112_v13  ;;  %5315 = vmatprep.mubr.msk.f32.mxu0 %vm2214_vm5, %v2189_v9  ;;  %v2192_v58 = vmax.f32 %v2118_v56, 0.0 }
 0x42e   :  { %v5267_v5 = vpop.f32.mrf.mxu1  ;;  %5316 = vmatmul.mubr.msk.f32.gmra.mxu0 %vm2214_vm5, %v2190_v26 }
 0x42f   :  { %v2191_v24 = vmax.f32 %v2113_v12, 0.0  ;;  %v2128_v35 = vadd.f32 %v5267_v5, %v6709_v33  ;;  %v5721_v5 = vld [vmem:[%s7648_s0] sm:$0xff] }
 0x430   :  { %v2122_v30 = vpop.f32.mrf.mxu1 }
 0x431   :  { %v2123_v16 = vadd.f32 %v6709_v33, %v2122_v30  ;;  %5318 = vmatprep.mubr.msk.f32.mxu0 %vm2214_vm5, %v2191_v24  ;;  %v2194_v6 = vmax.f32 %v2128_v35, 0.0  ;;  %v5722_v24 = vld [vmem:[%s7648_s0 + $0x8] sm:$0xff]  ;;  %v5724_v35 = vld [vmem:[%s7648_s0 + $0x18] sm:$0xff]  ;;  %v5725_v30 = vld [vmem:[%s7648_s0 + $0x20] sm:$0xff] }
 0x432   :  { %v5270_v25 = vpop.f32.mrf.mxu1  ;;  %5319 = vmatmul.mubr.msk.f32.gmra.mxu0 %vm2214_vm5, %v2192_v58  ;;  %v5723_v58 = vld [vmem:[%s7648_s0 + $0x10] sm:$0xff] }
 0x433   :  { %v2193_v36 = vmax.f32 %v2123_v16, 0.0  ;;  %v2138_v51 = vadd.f32 %v5270_v25, %v6709_v33  ;;  %v5726_v16 = vld [vmem:[%s7648_s0 + $0x28] sm:$0xff]  ;;  %v5727_v25 = vld [vmem:[%s7648_s0 + $0x30] sm:$0xff] }
 0x434   :  { %v2132_v41 = vpop.f32.mrf.mxu1 }
 0x435   :  { %v2133_v17 = vadd.f32 %v6709_v33, %v2132_v41  ;;  %5321 = vmatprep.mubr.msk.f32.mxu0 %vm2214_vm5, %v2193_v36  ;;  %v2196_v8 = vmax.f32 %v2138_v51, 0.0  ;;  %v5728_v36 = vld [vmem:[%s7648_s0 + $0x38] sm:$0xff]  ;;  %v5730_v51 = vld [vmem:[%s7648_s0 + $0x48] sm:$0xff]  ;;  %v5731_v41 = vld [vmem:[%s7648_s0 + $0x50] sm:$0xff] }
 0x436   :  { %v5273_v39 = vpop.f32.mrf.mxu1  ;;  %5322 = vmatmul.mubr.msk.f32.gmra.mxu0 %vm2214_vm5, %v2194_v6  ;;  %v5729_v6 = vld [vmem:[%s7648_s0 + $0x40] sm:$0xff] }
 0x437   :  { %v2195_v31 = vmax.f32 %v2133_v17, 0.0  ;;  %v2148_v43 = vadd.f32 %v5273_v39, %v6709_v33  ;;  %v5732_v17 = vld [vmem:[%s7648_s0 + $0x58] sm:$0xff]  ;;  %v5733_v39 = vld [vmem:[%s7648_s0 + $0x60] sm:$0xff] }
 0x438   :  { %v2142_v20 = vpop.f32.mrf.mxu1 }
 0x439   :  { %v2143_v0 = vadd.f32 %v6709_v33, %v2142_v20  ;;  %5324 = vmatprep.mubr.msk.f32.mxu0 %vm2214_vm5, %v2195_v31  ;;  %v2198_v18 = vmax.f32 %v2148_v43, 0.0  ;;  %v5734_v31 = vld [vmem:[%s7648_s0 + $0x68] sm:$0xff]  ;;  %v5736_v43 = vld [vmem:[%s7648_s0 + $0x78] sm:$0xff]  ;;  %v5737_v20 = vld [vmem:[%s7648_s0 + $0x80] sm:$0xff] }
 0x43a   :  { %v5276_v15 = vpop.f32.mrf.mxu1  ;;  %5325 = vmatmul.mubr.msk.f32.gmra.mxu0 %vm2214_vm5, %v2196_v8  ;;  %v5735_v8 = vld [vmem:[%s7648_s0 + $0x70] sm:$0xff] }
 0x43b   :  { %v2197_v27 = vmax.f32 %v2143_v0, 0.0  ;;  %v2158_v60 = vadd.f32 %v5276_v15, %v6709_v33  ;;  %v5738_v0 = vld [vmem:[%s7648_s0 + $0x88] sm:$0xff]  ;;  %v5739_v15 = vld [vmem:[%s7648_s0 + $0x90] sm:$0xff] }
 0x43c   :  { %v2152_v22 = vpop.f32.mrf.mxu1 }
 0x43d   :  { %v2153_v50 = vadd.f32 %v6709_v33, %v2152_v22  ;;  %5327 = vmatprep.mubr.msk.f32.mxu0 %vm2214_vm5, %v2197_v27  ;;  %v2200_v11 = vmax.f32 %v2158_v60, 0.0  ;;  %v5740_v27 = vld [vmem:[%s7648_s0 + $0x98] sm:$0xff]  ;;  %v5742_v60 = vld [vmem:[%s7648_s0 + $0xa8] sm:$0xff]  ;;  %v5743_v22 = vld [vmem:[%s7648_s0 + $0xb0] sm:$0xff] }
 0x43e   :  { %v5279_v57 = vpop.f32.mrf.mxu1  ;;  %5328 = vmatmul.mubr.msk.f32.gmra.mxu0 %vm2214_vm5, %v2198_v18  ;;  %v5741_v18 = vld [vmem:[%s7648_s0 + $0xa0] sm:$0xff] }
 0x43f   :  { %v2199_v62 = vmax.f32 %v2153_v50, 0.0  ;;  %v2168_v9 = vadd.f32 %v5279_v57, %v6709_v33  ;;  %v5744_v50 = vld [vmem:[%s7648_s0 + $0xb8] sm:$0xff]  ;;  %v5745_v57 = vld [vmem:[%s7648_s0 + $0xc0] sm:$0xff] }
 0x440   :  { %v2162_v26 = vpop.f32.mrf.mxu1 }
 0x441   :  { %v2163_v56 = vadd.f32 %v6709_v33, %v2162_v26  ;;  %5330 = vmatprep.mubr.msk.f32.mxu0 %vm2214_vm5, %v2199_v62  ;;  %v2202_v12 = vmax.f32 %v2168_v9, 0.0  ;;  %v2696_v33 = vld [vmem:[%s7594_s14] sm:$0xff]  ;;  %v5746_v62 = vld [vmem:[%s7648_s0 + $0xc8] sm:$0xff]  ;;  %v5748_v9 = vld [vmem:[%s7648_s0 + $0xd8] sm:$0xff] }
 0x442   :  { %5331 = vmatmul.mubr.msk.f32.gmra.mxu0 %vm2214_vm5, %v2200_v11  ;;  %5390 = vmatprep.subr.mxu0 %v2696_v33  ;;  %v5747_v11 = vld [vmem:[%s7648_s0 + $0xd0] sm:$0xff]  ;;  %v5749_v26 = vld [vmem:[%s7648_s0 + $0xe0] sm:$0xff] }
 0x443   :  { %v2201_v13 = vmax.f32 %v2163_v56, 0.0  ;;  %5391 = vmatpush3.msra.mxu0 %v2696_v33  ;;  %v5750_v56 = vld [vmem:[%s7648_s0 + $0xe8] sm:$0xff]  ;;  %v6919_v33 = vld [vmem:[%s7593_s13] ss:$0 sm:$0xff] }
 0x445   :  { %5333 = vmatprep.mubr.msk.f32.mxu0 %vm2214_vm5, %v2201_v13  ;;  %v5751_v13 = vld [vmem:[%s7648_s0 + $0xf0] sm:$0xff] }
 0x446   :  { %5334 = vmatmul.mubr.msk.f32.gmra.mxu0 %vm2214_vm5, %v2202_v12  ;;  %v5752_v12 = vld [vmem:[%s7648_s0 + $0xf8] sm:$0xff] }
 0x447   :  { %5392 = vmatprep.mubr.msk.f32.mxu0 %vm111_vm1, %v5721_v5  ;;  %v6913_v5 = vld [vmem:[%s7597_s17 + $0x78] sm:$0xff] }
 0x448   :  { %5440 = vmatprep.subr.mxu1 %v6913_v5 }
 0x44a   :  { %5393 = vmatmul.mubr.msk.f32.vlgmr.msra.gmra.mxu0 %vm111_vm1, %v5722_v24 }
 0x44b   :  { %5395 = vmatprep.mubr.msk.f32.mxu0 %vm111_vm1, %v5723_v58 }
 0x44e   :  { %5396 = vmatmul.mubr.msk.f32.gmra.mxu0 %vm111_vm1, %v5724_v35 }
 0x44f   :  { %5398 = vmatprep.mubr.msk.f32.mxu0 %vm111_vm1, %v5725_v30 }
 0x452   :  { %5399 = vmatmul.mubr.msk.f32.gmra.mxu0 %vm111_vm1, %v5726_v16 }
 0x453   :  { %5401 = vmatprep.mubr.msk.f32.mxu0 %vm111_vm1, %v5727_v25 }
 0x456   :  { %5402 = vmatmul.mubr.msk.f32.gmra.mxu0 %vm111_vm1, %v5728_v36 }
 0x457   :  { %5404 = vmatprep.mubr.msk.f32.mxu0 %vm111_vm1, %v5729_v6 }
 0x45a   :  { %5405 = vmatmul.mubr.msk.f32.gmra.mxu0 %vm111_vm1, %v5730_v51 }
 0x45b   :  { %5407 = vmatprep.mubr.msk.f32.mxu0 %vm111_vm1, %v5731_v41 }
 0x45e   :  { %5408 = vmatmul.mubr.msk.f32.gmra.mxu0 %vm111_vm1, %v5732_v17 }
 0x45f   :  { %5410 = vmatprep.mubr.msk.f32.mxu0 %vm111_vm1, %v5733_v39 }
 0x462   :  { %5411 = vmatmul.mubr.msk.f32.gmra.mxu0 %vm111_vm1, %v5734_v31 }
 0x463   :  { %5413 = vmatprep.mubr.msk.f32.mxu0 %vm111_vm1, %v5735_v8 }
 0x466   :  { %5414 = vmatmul.mubr.msk.f32.gmra.mxu0 %vm111_vm1, %v5736_v43 }
 0x467   :  { %5416 = vmatprep.mubr.msk.f32.mxu0 %vm111_vm1, %v5737_v20 }
 0x46a   :  { %5417 = vmatmul.mubr.msk.f32.gmra.mxu0 %vm111_vm1, %v5738_v0 }
 0x46b   :  { %5419 = vmatprep.mubr.msk.f32.mxu0 %vm111_vm1, %v5739_v15 }
 0x46e   :  { %5420 = vmatmul.mubr.msk.f32.gmra.mxu0 %vm111_vm1, %v5740_v27 }
 0x46f   :  { %5422 = vmatprep.mubr.msk.f32.mxu0 %vm111_vm1, %v5741_v18 }
 0x472   :  { %5423 = vmatmul.mubr.msk.f32.gmra.mxu0 %vm111_vm1, %v5742_v60 }
 0x473   :  { %5425 = vmatprep.mubr.msk.f32.mxu0 %vm111_vm1, %v5743_v22 }
 0x476   :  { %5426 = vmatmul.mubr.msk.f32.gmra.mxu0 %vm111_vm1, %v5744_v50 }
 0x477   :  { %5428 = vmatprep.mubr.msk.f32.mxu0 %vm111_vm1, %v5745_v57 }
 0x47a   :  { %5429 = vmatmul.mubr.msk.f32.gmra.mxu0 %vm111_vm1, %v5746_v62 }
 0x47b   :  { %5431 = vmatprep.mubr.msk.f32.mxu0 %vm111_vm1, %v5747_v11 }
 0x47e   :  { %5432 = vmatmul.mubr.msk.f32.gmra.mxu0 %vm111_vm1, %v5748_v9 }
 0x47f   :  { %5434 = vmatprep.mubr.msk.f32.mxu0 %vm111_vm1, %v5749_v26 }
 0x482   :  { %5435 = vmatmul.mubr.msk.f32.gmra.mxu0 %vm111_vm1, %v5750_v56 }
 0x483   :  { %5437 = vmatprep.mubr.msk.f32.mxu0 %vm111_vm1, %v5751_v13 }
 0x486   :  { %5438 = vmatmul.mubr.msk.f32.gmra.mxu0 %vm111_vm1, %v5752_v12 }
 0x4ca   :  { %v5290_v24 = vpop.f32.mrf.mxu0 }
 0x4cb   :  { %v2383_v58 = vadd.f32 %v5290_v24, %v6919_v33 }
 0x4cc   :  { %v2377_v35 = vpop.f32.mrf.mxu0 }
 0x4cd   :  { %5657 = vtanh.f32 %v2383_v58  ;;  %v2378_v30 = vadd.f32 %v6919_v33, %v2377_v35 }
 0x4ce   :  { %v5293_v16 = vpop.f32.mrf.mxu0 }
 0x4cf   :  { %5659 = vtanh.f32 %v2378_v30  ;;  %v2393_v25 = vadd.f32 %v5293_v16, %v6919_v33 }
 0x4d0   :  { %v2387_v36 = vpop.f32.mrf.mxu0 }
 0x4d1   :  { %5661 = vtanh.f32 %v2393_v25  ;;  %v2388_v6 = vadd.f32 %v6919_v33, %v2387_v36 }
 0x4d2   :  { %v5296_v51 = vpop.f32.mrf.mxu0 }
 0x4d3   :  { %5663 = vtanh.f32 %v2388_v6  ;;  %v2403_v41 = vadd.f32 %v5296_v51, %v6919_v33  ;;  %v3337_v51 = vld [vmem:[%s7597_s17 + $0x70] sm:$0xff] }
 0x4d4   :  { %v2397_v17 = vpop.f32.mrf.mxu0 }
 0x4d5   :  { %5665 = vtanh.f32 %v2403_v41  ;;  %v2398_v39 = vadd.f32 %v6919_v33, %v2397_v17 }
 0x4d6   :  { %v5299_v31 = vpop.f32.mrf.mxu0 }
 0x4d7   :  { %5667 = vtanh.f32 %v2398_v39  ;;  %v2413_v8 = vadd.f32 %v5299_v31, %v6919_v33 }
 0x4d8   :  { %v2407_v43 = vpop.f32.mrf.mxu0 }
 0x4d9   :  { %5669 = vtanh.f32 %v2413_v8  ;;  %v2408_v20 = vadd.f32 %v6919_v33, %v2407_v43  ;;  %v3336_v8 = vld [vmem:[%s7597_s17 + $0x68] sm:$0xff] }
 0x4da   :  { %v5658_v0 = vpop.eup %5657  ;;  %v5302_v15 = vpop.f32.mrf.mxu0 }
 0x4db   :  { %v2569_v27 = vmul.f32 0.05, %v5658_v0  ;;  %5671 = vtanh.f32 %v2408_v20  ;;  %v2423_v18 = vadd.f32 %v5302_v15, %v6919_v33 }
 0x4dc   :  { %v5660_v60 = vpop.eup %5659  ;;  %v2417_v22 = vpop.f32.mrf.mxu0 }
 0x4dd   :  { %v2568_v50 = vmul.f32 0.05, %v5660_v60  ;;  %5673 = vtanh.f32 %v2423_v18  ;;  %v2418_v57 = vadd.f32 %v6919_v33, %v2417_v22  ;;  %v6932_v11 = vadd.f32 %v6419_v32, %v2569_v27 }
 0x4de   :  { %v5662_v62 = vpop.eup %5661  ;;  %v5305_v9 = vpop.f32.mrf.mxu0 }
 0x4df   :  { %v6935_v26 = vadd.f32 %v6416_v28, %v2568_v50  ;;  %v2571_v56 = vmul.f32 0.05, %v5662_v62  ;;  %5675 = vtanh.f32 %v2418_v57  ;;  %v2433_v12 = vadd.f32 %v5305_v9, %v6919_v33  ;;  %v3334_v62 = vld [vmem:[%s7597_s17 + $0x58] sm:$0xff] }
 0x4e0   :  { %v5664_v13 = vpop.eup %5663  ;;  %v2427_v24 = vpop.f32.mrf.mxu0  ;;  %v7638_v25 = vclamps-f32 %v6932_v11, 1.0 }
 0x4e1   :  { %v7636_v58 = vclamps-f32 %v6935_v26, 1.0  ;;  %v2570_v35 = vmul.f32 0.05, %v5664_v13  ;;  %v2428_v30 = vadd.f32 %v6919_v33, %v2427_v24  ;;  %v6942_v32 = vadd.f32 %v6435_v40, %v2571_v56 }
 0x4e2   :  { %v5666_v16 = vpop.eup %5665  ;;  %5677 = vtanh.f32 %v2433_v12  ;;  %v5308_v28 = vpop.f32.mrf.mxu0 }
 0x4e3   :  { %v6945_v36 = vadd.f32 %v6432_v37, %v2570_v35  ;;  %v2573_v6 = vmul.f32 0.05, %v5666_v16  ;;  %5679 = vtanh.f32 %v2428_v30  ;;  %5338 = vmatprep.mubr.msk.f32.mxu1 %vm1210_vm4, %v7636_v58  ;;  %v2443_v17 = vadd.f32 %v5308_v28, %v6919_v33  ;;  %v3333_v30 = vld [vmem:[%s7597_s17 + $0x50] sm:$0xff] }
 0x4e4   :  { %v5668_v41 = vpop.eup %5667  ;;  %v2437_v40 = vpop.f32.mrf.mxu0  ;;  %5339 = vmatmul.mubr.msk.f32.vlgmr.msra.gmra.mxu1 %vm1210_vm4, %v7638_v25  ;;  %v7637_v20 = vclamps-f32 %v6942_v32, 1.0 }
 0x4e5   :  { %v7635_v37 = vclamps-f32 %v6945_v36, 1.0  ;;  %v2572_v39 = vmul.f32 0.05, %v5668_v41  ;;  %v2438_v31 = vadd.f32 %v6919_v33, %v2437_v40  ;;  %5441 = vmatpush3.msra.mxu1 %v6913_v5  ;;  %v6965_v0 = vadd.f32 %v6451_v21, %v2573_v6  ;;  %v3335_v5 = vld [vmem:[%s7597_s17 + $0x60] sm:$0xff]  ;;  %v3332_v41 = vld [vmem:[%s7597_s17 + $0x48] sm:$0xff] }
 0x4e6   :  { %v5670_v43 = vpop.eup %5669  ;;  %5681 = vtanh.f32 %v2443_v17  ;;  %v5311_v15 = vpop.f32.mrf.mxu0  ;;  %5442 = vmatprep.subr.mxu1 %v3337_v51 }
 0x4e7   :  { %v6968_v27 = vadd.f32 %v6448_v42, %v2572_v39  ;;  %v2575_v18 = vmul.f32 0.05, %v5670_v43  ;;  %5683 = vtanh.f32 %v2438_v31  ;;  %5341 = vmatprep.mubr.msk.f32.mxu1 %vm1210_vm4, %v7635_v37  ;;  %5443 = vmatpush3.msra.mxu1 %v3337_v51  ;;  %v2453_v21 = vadd.f32 %v5311_v15, %v6919_v33 }
 0x4e8   :  { %v5672_v60 = vpop.eup %5671  ;;  %v2447_v22 = vpop.f32.mrf.mxu0  ;;  %5342 = vmatmul.mubr.msk.f32.gmra.mxu1 %vm1210_vm4, %v7637_v20  ;;  %5444 = vmatprep.subr.mxu1 %v3336_v8  ;;  %v7633_v56 = vclamps-f32 %v6965_v0, 1.0 }
 0x4e9   :  { %v7634_v42 = vclamps-f32 %v6968_v27, 1.0  ;;  %v2574_v50 = vmul.f32 0.05, %v5672_v60  ;;  %v2448_v57 = vadd.f32 %v6919_v33, %v2447_v22  ;;  %5445 = vmatpush3.msra.mxu1 %v3336_v8  ;;  %v6987_v13 = vadd.f32 %v6467_v49, %v2575_v18  ;;  %v3330_v22 = vld [vmem:[%s7597_s17 + $0x38] sm:$0xff] }
 0x4ea   :  { %v5674_v9 = vpop.eup %5673  ;;  %5685 = vtanh.f32 %v2453_v21  ;;  %v5314_v12 = vpop.f32.mrf.mxu0  ;;  %5446 = vmatprep.subr.mxu1 %v3335_v5 }
 0x4eb   :  { %v6990_v24 = vadd.f32 %v6464_v53, %v2574_v50  ;;  %v2577_v35 = vmul.f32 0.05, %v5674_v9  ;;  %5687 = vtanh.f32 %v2448_v57  ;;  %5344 = vmatprep.mubr.msk.f32.mxu1 %vm1210_vm4, %v7634_v42  ;;  %5447 = vmatpush3.msra.mxu1 %v3335_v5  ;;  %v2463_v49 = vadd.f32 %v5314_v12, %v6919_v33 }
 0x4ec   :  { %v5676_v16 = vpop.eup %5675  ;;  %v2457_v28 = vpop.f32.mrf.mxu0  ;;  %5345 = vmatmul.mubr.msk.f32.gmra.mxu1 %vm1210_vm4, %v7633_v56  ;;  %5448 = vmatprep.subr.mxu1 %v3334_v62  ;;  %v7631_v17 = vclamps-f32 %v6987_v13, 1.0 }
 0x4ed   :  { %v7632_v53 = vclamps-f32 %v6990_v24, 1.0  ;;  %v2576_v6 = vmul.f32 0.05, %v5676_v16  ;;  %v2458_v51 = vadd.f32 %v6919_v33, %v2457_v28  ;;  %5449 = vmatpush3.msra.mxu1 %v3334_v62  ;;  %v7009_v40 = vadd.f32 %v6477_v59, %v2577_v35  ;;  %v3331_v59 = vld [vmem:[%s7597_s17 + $0x40] sm:$0xff] }
 0x4ee   :  { %5689 = vtanh.f32 %v2463_v49  ;;  %v5317_v39 = vpop.f32.mrf.mxu0  ;;  %5450 = vmatprep.subr.mxu1 %v3333_v30 }
 0x4ef   :  { %v5678_v31 = vpop.eup %5677  ;;  %v7012_v8 = vadd.f32 %v6474_v55, %v2576_v6  ;;  %5691 = vtanh.f32 %v2458_v51  ;;  %v2473_v43 = vadd.f32 %v5317_v39, %v6919_v33  ;;  %5347 = vmatprep.mubr.msk.f32.mxu1 %vm1210_vm4, %v7632_v53  ;;  %5451 = vmatpush3.msra.mxu1 %v3333_v30  ;;  %v7629_v50 = vclamps-f32 %v7009_v40, 1.0  ;;  %v3329_v30 = vld [vmem:[%s7597_s17 + $0x30] sm:$0xff]  ;;  %v3328_v51 = vld [vmem:[%s7597_s17 + $0x28] sm:$0xff] }
 0x4f0   :  { %v5680_v15 = vpop.eup %5679  ;;  %v2579_v18 = vmul.f32 0.05, %v5678_v31  ;;  %v2467_v5 = vpop.f32.mrf.mxu0  ;;  %5348 = vmatmul.mubr.msk.f32.gmra.mxu1 %vm1210_vm4, %v7631_v17  ;;  %5452 = vmatprep.subr.mxu1 %v3332_v41 }
 0x4f1   :  { %v7630_v55 = vclamps-f32 %v7012_v8, 1.0  ;;  %v2578_v60 = vmul.f32 0.05, %v5680_v15  ;;  %5693 = vtanh.f32 %v2473_v43  ;;  %v2468_v21 = vadd.f32 %v6919_v33, %v2467_v5  ;;  %5453 = vmatpush3.msra.mxu1 %v3332_v41 }
 0x4f2   :  { %v7031_v57 = vadd.f32 %v6487_v54, %v2579_v18  ;;  %v5320_v62 = vpop.f32.mrf.mxu0  ;;  %5454 = vmatprep.subr.mxu1 %v3331_v59  ;;  %v3327_v18 = vld [vmem:[%s7597_s17 + $0x20] sm:$0xff] }
 0x4f3   :  { %v5682_v9 = vpop.eup %5681  ;;  %v7034_v12 = vadd.f32 %v6484_v61, %v2578_v60  ;;  %5695 = vtanh.f32 %v2468_v21  ;;  %v2483_v35 = vadd.f32 %v5320_v62, %v6919_v33  ;;  %5350 = vmatprep.mubr.msk.f32.mxu1 %vm1210_vm4, %v7630_v55  ;;  %5455 = vmatpush3.msra.mxu1 %v3331_v59  ;;  %v3326_v62 = vld [vmem:[%s7597_s17 + $0x18] sm:$0xff] }
 0x4f4   :  { %v5684_v54 = vpop.eup %5683  ;;  %v2581_v16 = vmul.f32 0.05, %v5682_v9  ;;  %v2477_v49 = vpop.f32.mrf.mxu0  ;;  %5351 = vmatmul.mubr.msk.f32.gmra.mxu1 %vm1210_vm4, %v7629_v50  ;;  %5456 = vmatprep.subr.mxu1 %v3330_v22  ;;  %v7627_v41 = vclamps-f32 %v7031_v57, 1.0 }
 0x4f5   :  { %v7628_v61 = vclamps-f32 %v7034_v12, 1.0  ;;  %v2580_v28 = vmul.f32 0.05, %v5684_v54  ;;  %5697 = vtanh.f32 %v2483_v35  ;;  %v2478_v6 = vadd.f32 %v6919_v33, %v2477_v49  ;;  %5457 = vmatpush3.msra.mxu1 %v3330_v22 }
 0x4f6   :  { %v7053_v39 = vadd.f32 %v6497_v2, %v2581_v16  ;;  %v5323_v31 = vpop.f32.mrf.mxu0  ;;  %5458 = vmatprep.subr.mxu1 %v3329_v30 }
 0x4f7   :  { %v5686_v43 = vpop.eup %5685  ;;  %v7056_v59 = vadd.f32 %v6494_v1, %v2580_v28  ;;  %5699 = vtanh.f32 %v2478_v6  ;;  %v2493_v15 = vadd.f32 %v5323_v31, %v6919_v33  ;;  %5353 = vmatprep.mubr.msk.f32.mxu1 %vm1210_vm4, %v7628_v61  ;;  %5459 = vmatpush3.msra.mxu1 %v3329_v30  ;;  %v3325_v28 = vld [vmem:[%s7597_s17 + $0x10] sm:$0xff] }
 0x4f8   :  { %v5688_v2 = vpop.eup %5687  ;;  %v2583_v5 = vmul.f32 0.05, %v5686_v43  ;;  %v2487_v60 = vpop.f32.mrf.mxu0  ;;  %5354 = vmatmul.mubr.msk.f32.gmra.mxu1 %vm1210_vm4, %v7627_v41  ;;  %5460 = vmatprep.subr.mxu1 %v3328_v51  ;;  %v7625_v9 = vclamps-f32 %v7053_v39, 1.0 }
 0x4f9   :  { %v7626_v1 = vclamps-f32 %v7056_v59, 1.0  ;;  %v2582_v21 = vmul.f32 0.05, %v5688_v2  ;;  %5701 = vtanh.f32 %v2493_v15  ;;  %v2488_v22 = vadd.f32 %v6919_v33, %v2487_v60  ;;  %5461 = vmatpush3.msra.mxu1 %v3328_v51 }
 0x4fa   :  { %v7075_v35 = vadd.f32 %v6507_v10, %v2583_v5  ;;  %v5326_v30 = vpop.f32.mrf.mxu0  ;;  %5462 = vmatprep.subr.mxu1 %v3327_v18 }
 0x4fb   :  { %v5690_v54 = vpop.eup %5689  ;;  %v7078_v16 = vadd.f32 %v6504_v7, %v2582_v21  ;;  %5703 = vtanh.f32 %v2488_v22  ;;  %v2503_v49 = vadd.f32 %v5326_v30, %v6919_v33  ;;  %5356 = vmatprep.mubr.msk.f32.mxu1 %vm1210_vm4, %v7626_v1  ;;  %5463 = vmatpush3.msra.mxu1 %v3327_v18 }
 0x4fc   :  { %v5692_v10 = vpop.eup %5691  ;;  %v2585_v6 = vmul.f32 0.05, %v5690_v54  ;;  %v2497_v51 = vpop.f32.mrf.mxu0  ;;  %5357 = vmatmul.mubr.msk.f32.gmra.mxu1 %vm1210_vm4, %v7625_v9  ;;  %5464 = vmatprep.subr.mxu1 %v3326_v62  ;;  %v7623_v18 = vclamps-f32 %v7075_v35, 1.0 }
 0x4fd   :  { %v7624_v7 = vclamps-f32 %v7078_v16, 1.0  ;;  %v2584_v31 = vmul.f32 0.05, %v5692_v10  ;;  %5705 = vtanh.f32 %v2503_v49  ;;  %v2498_v43 = vadd.f32 %v6919_v33, %v2497_v51  ;;  %5465 = vmatpush3.msra.mxu1 %v3326_v62 }
 0x4fe   :  { %v5694_v15 = vpop.eup %5693  ;;  %v7094_v2 = vadd.f32 %v6517_v19, %v2585_v6  ;;  %v5329_v5 = vpop.f32.mrf.mxu0  ;;  %5466 = vmatprep.subr.mxu1 %v3325_v28 }
 0x4ff   :  { %v7097_v60 = vadd.f32 %v6514_v14, %v2584_v31  ;;  %v2587_v21 = vmul.f32 0.05, %v5694_v15  ;;  %5707 = vtanh.f32 %v2498_v43  ;;  %v2513_v22 = vadd.f32 %v5329_v5, %v6919_v33  ;;  %5359 = vmatprep.mubr.msk.f32.mxu1 %vm1210_vm4, %v7624_v7  ;;  %5467 = vmatpush3.msra.mxu1 %v3325_v28 }
 0x500   :  { %v5696_v62 = vpop.eup %5695  ;;  %v2507_v30 = vpop.f32.mrf.mxu0  ;;  %5360 = vmatmul.mubr.msk.f32.gmra.mxu1 %vm1210_vm4, %v7623_v18  ;;  %v7621_v49 = vclamps-f32 %v7094_v2, 1.0 }
 0x501   :  { %v7622_v19 = vclamps-f32 %v7097_v60, 1.0  ;;  %v2586_v54 = vmul.f32 0.05, %v5696_v62  ;;  %5709 = vtanh.f32 %v2513_v22  ;;  %v7109_v10 = vadd.f32 %v6527_v29, %v2587_v21 }
 0x502   :  { %v5698_v14 = vpop.eup %5697  ;;  %v2508_v6 = vadd.f32 %v6919_v33, %v2507_v30  ;;  %v5332_v51 = vpop.f32.mrf.mxu0 }
 0x503   :  { %v7113_v28 = vadd.f32 %v6524_v23, %v2586_v54  ;;  %v2589_v31 = vmul.f32 0.05, %v5698_v14  ;;  %v2523_v43 = vadd.f32 %v5332_v51, %v6919_v33  ;;  %5362 = vmatprep.mubr.msk.f32.mxu1 %vm1210_vm4, %v7622_v19  ;;  %v7607_v22 = vclamps-f32 %v7109_v10, 1.0 }
 0x504   :  { %v5700_v15 = vpop.eup %5699  ;;  %5711 = vtanh.f32 %v2508_v6  ;;  %v2517_v5 = vpop.f32.mrf.mxu0  ;;  %5363 = vmatmul.mubr.msk.f32.gmra.mxu1 %vm1210_vm4, %v7621_v49 }
 0x505   :  { %v7620_v29 = vclamps-f32 %v7113_v28, 1.0  ;;  %v2588_v21 = vmul.f32 0.05, %v5700_v15  ;;  %5713 = vtanh.f32 %v2523_v43  ;;  %v7125_v62 = vadd.f32 %v6537_v38, %v2589_v31 }
 0x506   :  { %v5702_v23 = vpop.eup %5701  ;;  %v2518_v30 = vadd.f32 %v6919_v33, %v2517_v5  ;;  %v5335_v54 = vpop.f32.mrf.mxu0 }
 0x507   :  { %v7129_v14 = vadd.f32 %v6534_v34, %v2588_v21  ;;  %v2591_v6 = vmul.f32 0.05, %v5702_v23  ;;  %v2533_v51 = vadd.f32 %v5335_v54, %v6919_v33  ;;  %5365 = vmatprep.mubr.msk.f32.mxu1 %vm1210_vm4, %v7620_v29  ;;  %v7618_v5 = vclamps-f32 %v7125_v62, 1.0 }
 0x508   :  { %v5704_v43 = vpop.eup %5703  ;;  %5715 = vtanh.f32 %v2518_v30  ;;  %v2527_v15 = vpop.f32.mrf.mxu0  ;;  %5366 = vmatmul.mubr.msk.f32.gmra.mxu1 %vm1210_vm4, %v7607_v22 }
 0x509   :  { %v7619_v38 = vclamps-f32 %v7129_v14, 1.0  ;;  %v2590_v31 = vmul.f32 0.05, %v5704_v43  ;;  %5717 = vtanh.f32 %v2533_v51  ;;  %v7141_v21 = vadd.f32 %v6547_v45, %v2591_v6 }
 0x50a   :  { %v5706_v34 = vpop.eup %5705  ;;  %v2528_v23 = vadd.f32 %v6919_v33, %v2527_v15 }
 0x50b   :  { %v7145_v54 = vadd.f32 %v6544_v3, %v2590_v31  ;;  %v2593_v30 = vmul.f32 0.05, %v5706_v34  ;;  %5368 = vmatprep.mubr.msk.f32.mxu1 %vm1210_vm4, %v7619_v38  ;;  %v7608_v33 = vclamps-f32 %v7141_v21, 1.0 }
 0x50c   :  { %v5708_v22 = vpop.eup %5707  ;;  %5719 = vtanh.f32 %v2528_v23  ;;  %5369 = vmatmul.mubr.msk.f32.gmra.mxu1 %vm1210_vm4, %v7618_v5 }
 0x50d   :  { %v7609_v51 = vclamps-f32 %v7145_v54, 1.0  ;;  %v2592_v45 = vmul.f32 0.05, %v5708_v22  ;;  %v7156_v3 = vadd.f32 %v6556_v46, %v2593_v30 }
 0x50e   :  { %v5710_v6 = vpop.eup %5709 }
 0x50f   :  { %v7159_v43 = vadd.f32 %v6554_v44, %v2592_v45  ;;  %v2595_v15 = vmul.f32 0.05, %v5710_v6  ;;  %5371 = vmatprep.mubr.msk.f32.mxu1 %vm1210_vm4, %v7609_v51  ;;  %v7611_v23 = vclamps-f32 %v7156_v3, 1.0 }
 0x510   :  { %5372 = vmatmul.mubr.msk.f32.gmra.mxu1 %vm1210_vm4, %v7608_v33 }
 0x511   :  { %v5712_v31 = vpop.eup %5711  ;;  %v7610_v22 = vclamps-f32 %v7159_v43, 1.0  ;;  %v7170_v30 = vadd.f32 %v6564_v4, %v2595_v15 }
 0x512   :  { %v5714_v34 = vpop.eup %5713  ;;  %v2594_v46 = vmul.f32 0.05, %v5712_v31 }
 0x513   :  { %v2597_v44 = vmul.f32 0.05, %v5714_v34  ;;  %5374 = vmatprep.mubr.msk.f32.mxu1 %vm1210_vm4, %v7610_v22  ;;  %v7616_v4 = vclamps-f32 %v7170_v30, 1.0 }
 0x514   :  { %v7176_v45 = vadd.f32 %v6562_v63, %v2594_v46  ;;  %5375 = vmatmul.mubr.msk.f32.gmra.mxu1 %vm1210_vm4, %v7611_v23 }
 0x515   :  { %v5716_v6 = vpop.eup %5715  ;;  %v7184_v15 = vadd.f32 %v6572_v48, %v2597_v44 }
 0x516   :  { %v5718_v33 = vpop.eup %5717  ;;  %v7617_v51 = vclamps-f32 %v7176_v45, 1.0  ;;  %v2596_v31 = vmul.f32 0.05, %v5716_v6 }
 0x517   :  { %v2599_v34 = vmul.f32 0.05, %v5718_v33  ;;  %v7614_v23 = vclamps-f32 %v7184_v15, 1.0  ;;  %v7655_v33 = vld [vmem:[#allocation5_spill] sm:$0xff] }
 0x518   :  { %v7187_v22 = vadd.f32 %v6570_v47, %v2596_v31  ;;  %5377 = vmatprep.mubr.msk.f32.mxu1 %vm1210_vm4, %v7617_v51 }
 0x519   :  { %v5720_v63 = vpop.eup %5719  ;;  %5378 = vmatmul.mubr.msk.f32.gmra.mxu1 %vm1210_vm4, %v7616_v4  ;;  %v7198_v48 = vadd.f32 %v6580_v52, %v2599_v34  ;;  %v3324_v52 = vld [vmem:[%s7597_s17 + $0x8] sm:$0xff]  ;;  %v3323_v34 = vld [vmem:[%s7597_s17] sm:$0xff] }
 0x51a   :  { %v7615_v46 = vclamps-f32 %v7187_v22, 1.0  ;;  %v2598_v6 = vmul.f32 0.05, %v5720_v63  ;;  %5468 = vmatprep.subr.mxu1 %v3324_v52  ;;  %v5394_v63 = vpop.f32.mrf.mxu0 }
 0x51b   :  { %7654 = vst [vmem:[#allocation6_spill] sm:$0xff] %v7198_v48  ;;  %v7612_v31 = vclamps-f32 %v7198_v48, 1.0  ;;  %5469 = vmatpush3.msra.mxu1 %v3324_v52  ;;  %v3608_v52 = vld [vmem:[%s7599_s19 + $0x28] sm:$0xff] }
 0x51c   :  { %v7201_v47 = vadd.f32 %v7655_v33, %v2598_v6  ;;  %5380 = vmatprep.mubr.msk.f32.mxu1 %vm1210_vm4, %v7615_v46  ;;  %5470 = vmatprep.subr.mxu1 %v3323_v34  ;;  %v3093_v6 = vpop.f32.mrf.mxu0  ;;  %v3610_v33 = vld [vmem:[%s7599_s19 + $0x38] sm:$0xff] }
 0x51d   :  { %5381 = vmatmul.mubr.msk.f32.gmra.mxu1 %vm1210_vm4, %v7614_v23  ;;  %5520 = vmatprep.subr.mxu0 %v3610_v33  ;;  %v3606_v23 = vld [vmem:[%s7599_s19 + $0x18] sm:$0xff] }
 0x51e   :  { %7656 = vst [vmem:[#allocation5_spill] sm:$0xff] %v7201_v47  ;;  %v7613_v44 = vclamps-f32 %v7201_v47, 1.0  ;;  %5471 = vmatpush3.msra.mxu1 %v3323_v34  ;;  %5521 = vmatpush3.msra.mxu0 %v3610_v33  ;;  %v3607_v34 = vld [vmem:[%s7599_s19 + $0x20] sm:$0xff]  ;;  %v3605_v33 = vld [vmem:[%s7599_s19 + $0x10] sm:$0xff] }
 0x520   :  { %5383 = vmatprep.mubr.msk.f32.mxu1 %vm1210_vm4, %v7613_v44  ;;  %v5397_v44 = vpop.f32.mrf.mxu0 }
 0x521   :  { %5384 = vmatmul.mubr.msk.f32.gmra.mxu1 %vm1210_vm4, %v7612_v31  ;;  %v3609_v31 = vld [vmem:[%s7599_s19 + $0x30] sm:$0xff] }
 0x522   :  { %5522 = vmatprep.subr.mxu0 %v3609_v31  ;;  %v3103_v46 = vpop.f32.mrf.mxu0 }
 0x523   :  { %5523 = vmatpush3.msra.mxu0 %v3609_v31  ;;  %v3604_v31 = vld [vmem:[%s7599_s19 + $0x8] sm:$0xff] }
 0x524   :  { %5524 = vmatprep.subr.mxu0 %v3608_v52  ;;  %v5400_v4 = vpop.f32.mrf.mxu0 }
 0x525   :  { %5525 = vmatpush3.msra.mxu0 %v3608_v52  ;;  %v3603_v52 = vld [vmem:[%s7599_s19] sm:$0xff] }
 0x526   :  { %5526 = vmatprep.subr.mxu0 %v3607_v34  ;;  %v3113_v51 = vpop.f32.mrf.mxu0 }
 0x527   :  { %5527 = vmatpush3.msra.mxu0 %v3607_v34 }
 0x528   :  { %5528 = vmatprep.subr.mxu0 %v3606_v23  ;;  %v5403_v34 = vpop.f32.mrf.mxu0 }
 0x529   :  { %5529 = vmatpush3.msra.mxu0 %v3606_v23 }
 0x52a   :  { %5530 = vmatprep.subr.mxu0 %v3605_v33  ;;  %v3123_v5 = vpop.f32.mrf.mxu0 }
 0x52b   :  { %5531 = vmatpush3.msra.mxu0 %v3605_v33 }
 0x52c   :  { %5532 = vmatprep.subr.mxu0 %v3604_v31  ;;  %v5406_v38 = vpop.f32.mrf.mxu0 }
 0x52d   :  { %5533 = vmatpush3.msra.mxu0 %v3604_v31  ;;  %v7258_v31 = vld [vmem:[%s7596_s16] ss:$0 sm:$0xff] }
 0x52e   :  { %5534 = vmatprep.subr.mxu0 %v3603_v52  ;;  %v3133_v29 = vpop.f32.mrf.mxu0 }
 0x52f   :  { %5535 = vmatpush3.msra.mxu0 %v3603_v52 }
 0x530   :  { %v5409_v23 = vpop.f32.mrf.mxu0 }
 0x532   :  { %v3143_v49 = vpop.f32.mrf.mxu0 }
 0x534   :  { %v7247_v19 = vpop.f32.mrf.mxu0 }
 0x536   :  { %v7249_v18 = vpop.f32.mrf.mxu0 }
 0x538   :  { %v7251_v33 = vpop.f32.mrf.mxu0 }
 0x53a   :  { %v7253_v7 = vpop.f32.mrf.mxu0 }
 0x53c   :  { %v7260_v52 = vpop.f32.mrf.mxu0 }
 0x53e   :  { %v7264_v56 = vpop.f32.mrf.mxu0 }
 0x5a4   :  { %v5340_v9 = vpop.f32.mrf.mxu1 }
 0x5a5   :  { %v3099_v1 = vadd.f32 %v5394_v63, %v5340_v9 }
 0x5a6   :  { %v2865_v41 = vpop.f32.mrf.mxu1 }
 0x5a7   :  { %v3094_v61 = vadd.f32 %v3093_v6, %v2865_v41  ;;  %v3260_v50 = vadd.f32 %v7258_v31, %v3099_v1  ;;  %v7268_v41 = vpop.f32.mrf.mxu0 }
 0x5a8   :  { %v5343_v55 = vpop.f32.mrf.mxu1 }
 0x5a9   :  { %v3259_v17 = vadd.f32 %v7258_v31, %v3094_v61  ;;  %v3109_v53 = vadd.f32 %v5397_v44, %v5343_v55  ;;  %v3292_v63 = vmax.f32 %v3260_v50, 0.0 }
 0x5aa   :  { %v2875_v42 = vpop.f32.mrf.mxu1 }
 0x5ab   :  { %v3291_v37 = vmax.f32 %v3259_v17, 0.0  ;;  %v3104_v9 = vadd.f32 %v3103_v46, %v2875_v42  ;;  %v3262_v58 = vadd.f32 %v7258_v31, %v3109_v53  ;;  %v7272_v53 = vpop.f32.mrf.mxu0 }
 0x5ac   :  { %v5346_v20 = vpop.f32.mrf.mxu1 }
 0x5ad   :  { %v3261_v25 = vadd.f32 %v7258_v31, %v3104_v9  ;;  %v3119_v48 = vadd.f32 %v5400_v4, %v5346_v20  ;;  %5472 = vmatprep.mubr.f32.mxu1 %v3291_v37  ;;  %v3294_v55 = vmax.f32 %v3262_v58, 0.0 }
 0x5ae   :  { %v2885_v1 = vpop.f32.mrf.mxu1  ;;  %5473 = vmatmul.mubr.f32.vlgmr.msra.gmra.mxu1 %v3292_v63 }
 0x5af   :  { %v3293_v6 = vmax.f32 %v3261_v25, 0.0  ;;  %v3114_v61 = vadd.f32 %v3113_v51, %v2885_v1  ;;  %v3264_v44 = vadd.f32 %v7258_v31, %v3119_v48  ;;  %v7276_v51 = vpop.f32.mrf.mxu0 }
 0x5b0   :  { %v5349_v47 = vpop.f32.mrf.mxu1 }
 0x5b1   :  { %v3263_v42 = vadd.f32 %v7258_v31, %v3114_v61  ;;  %v3129_v17 = vadd.f32 %v5403_v34, %v5349_v47  ;;  %5475 = vmatprep.mubr.f32.mxu1 %v3293_v6  ;;  %v3296_v4 = vmax.f32 %v3264_v44, 0.0 }
 0x5b2   :  { %v2895_v50 = vpop.f32.mrf.mxu1  ;;  %5476 = vmatmul.mubr.f32.gmra.mxu1 %v3294_v55  ;;  %v3193_v55 = vpop.f32.mrf.mxu0 }
 0x5b3   :  { %v3295_v20 = vmax.f32 %v3263_v42, 0.0  ;;  %v3124_v37 = vadd.f32 %v3123_v5, %v2895_v50  ;;  %v3266_v46 = vadd.f32 %v7258_v31, %v3129_v17 }
 0x5b4   :  { %v5352_v9 = vpop.f32.mrf.mxu1 }
 0x5b5   :  { %v3265_v25 = vadd.f32 %v7258_v31, %v3124_v37  ;;  %v3139_v58 = vadd.f32 %v5406_v38, %v5352_v9  ;;  %5478 = vmatprep.mubr.f32.mxu1 %v3295_v20  ;;  %v3298_v63 = vmax.f32 %v3266_v46, 0.0 }
 0x5b6   :  { %v2905_v48 = vpop.f32.mrf.mxu1  ;;  %5479 = vmatmul.mubr.f32.gmra.mxu1 %v3296_v4  ;;  %v5427_v4 = vpop.f32.mrf.mxu0 }
 0x5b7   :  { %v3297_v47 = vmax.f32 %v3265_v25, 0.0  ;;  %v3134_v34 = vadd.f32 %v3133_v29, %v2905_v48  ;;  %v3268_v1 = vadd.f32 %v7258_v31, %v3139_v58 }
 0x5b8   :  { %v5355_v6 = vpop.f32.mrf.mxu1 }
 0x5b9   :  { %v3267_v5 = vadd.f32 %v7258_v31, %v3134_v34  ;;  %v3149_v61 = vadd.f32 %v5409_v23, %v5355_v6  ;;  %5481 = vmatprep.mubr.f32.mxu1 %v3297_v47  ;;  %v3300_v17 = vmax.f32 %v3268_v1, 0.0  ;;  %v3203_v34 = vpop.f32.mrf.mxu0 }
 0x5ba   :  { %v2915_v44 = vpop.f32.mrf.mxu1  ;;  %5482 = vmatmul.mubr.f32.gmra.mxu1 %v3298_v63 }
 0x5bb   :  { %v3299_v42 = vmax.f32 %v3267_v5, 0.0  ;;  %v3144_v38 = vadd.f32 %v3143_v49, %v2915_v44  ;;  %v3270_v50 = vadd.f32 %v7258_v31, %v3149_v61 }
 0x5bc   :  { %v5358_v20 = vpop.f32.mrf.mxu1 }
 0x5bd   :  { %v3269_v37 = vadd.f32 %v7258_v31, %v3144_v38  ;;  %v3159_v29 = vadd.f32 %v7247_v19, %v5358_v20  ;;  %5484 = vmatprep.mubr.f32.mxu1 %v3299_v42  ;;  %v3302_v25 = vmax.f32 %v3270_v50, 0.0  ;;  %v5430_v42 = vpop.f32.mrf.mxu0 }
 0x5be   :  { %v2925_v46 = vpop.f32.mrf.mxu1  ;;  %5485 = vmatmul.mubr.f32.gmra.mxu1 %v3300_v17 }
 0x5bf   :  { %v3301_v9 = vmax.f32 %v3269_v37, 0.0  ;;  %v3154_v23 = vadd.f32 %v7249_v18, %v2925_v46  ;;  %v3272_v58 = vadd.f32 %v7258_v31, %v3159_v29  ;;  %v3213_v46 = vpop.f32.mrf.mxu0 }
 0x5c0   :  { %v5361_v48 = vpop.f32.mrf.mxu1 }
 0x5c1   :  { %v3271_v49 = vadd.f32 %v7258_v31, %v3154_v23  ;;  %v3169_v47 = vadd.f32 %v7251_v33, %v5361_v48  ;;  %5487 = vmatprep.mubr.f32.mxu1 %v3301_v9  ;;  %v3304_v6 = vmax.f32 %v3272_v58, 0.0 }
 0x5c2   :  { %v2935_v63 = vpop.f32.mrf.mxu1  ;;  %5488 = vmatmul.mubr.f32.gmra.mxu1 %v3302_v25 }
 0x5c3   :  { %v3303_v19 = vmax.f32 %v3271_v49, 0.0  ;;  %v3164_v1 = vadd.f32 %v7253_v7, %v2935_v63  ;;  %v3274_v5 = vadd.f32 %v7258_v31, %v3169_v47  ;;  %v5433_v47 = vpop.f32.mrf.mxu0 }
 0x5c4   :  { %v5364_v61 = vpop.f32.mrf.mxu1 }
 0x5c5   :  { %v3273_v18 = vadd.f32 %v7258_v31, %v3164_v1  ;;  %v3179_v44 = vadd.f32 %v7260_v52, %v5364_v61  ;;  %5490 = vmatprep.mubr.f32.mxu1 %v3303_v19  ;;  %v3306_v50 = vmax.f32 %v3274_v5, 0.0 }
 0x5c6   :  { %v2945_v38 = vpop.f32.mrf.mxu1  ;;  %5491 = vmatmul.mubr.f32.gmra.mxu1 %v3304_v6 }
 0x5c7   :  { %v3305_v33 = vmax.f32 %v3273_v18, 0.0  ;;  %v3174_v17 = vadd.f32 %v7264_v56, %v2945_v38  ;;  %v3276_v20 = vadd.f32 %v7258_v31, %v3179_v44  ;;  %v3223_v18 = vpop.f32.mrf.mxu0 }
 0x5c8   :  { %v5367_v37 = vpop.f32.mrf.mxu1 }
 0x5c9   :  { %v3275_v7 = vadd.f32 %v7258_v31, %v3174_v17  ;;  %v3189_v29 = vadd.f32 %v7268_v41, %v5367_v37  ;;  %5493 = vmatprep.mubr.f32.mxu1 %v3305_v33  ;;  %v3308_v25 = vmax.f32 %v3276_v20, 0.0  ;;  %v5436_v37 = vpop.f32.mrf.mxu0 }
 0x5ca   :  { %v2955_v9 = vpop.f32.mrf.mxu1  ;;  %5494 = vmatmul.mubr.f32.gmra.mxu1 %v3306_v50 }
 0x5cb   :  { %v3307_v52 = vmax.f32 %v3275_v7, 0.0  ;;  %v3184_v23 = vadd.f32 %v7272_v53, %v2955_v9  ;;  %v3278_v58 = vadd.f32 %v7258_v31, %v3189_v29 }
 0x5cc   :  { %v5370_v48 = vpop.f32.mrf.mxu1 }
 0x5cd   :  { %v3277_v56 = vadd.f32 %v7258_v31, %v3184_v23  ;;  %v3199_v49 = vadd.f32 %v7276_v51, %v5370_v48  ;;  %5496 = vmatprep.mubr.f32.mxu1 %v3307_v52  ;;  %v3310_v1 = vmax.f32 %v3278_v58, 0.0 }
 0x5ce   :  { %v2965_v63 = vpop.f32.mrf.mxu1  ;;  %5497 = vmatmul.mubr.f32.gmra.mxu1 %v3308_v25 }
 0x5cf   :  { %v3309_v41 = vmax.f32 %v3277_v56, 0.0  ;;  %v3194_v19 = vadd.f32 %v3193_v55, %v2965_v63  ;;  %v3280_v6 = vadd.f32 %v7258_v31, %v3199_v49 }
 0x5d0   :  { %v5373_v5 = vpop.f32.mrf.mxu1 }
 0x5d1   :  { %v3279_v53 = vadd.f32 %v7258_v31, %v3194_v19  ;;  %v3209_v61 = vadd.f32 %v5427_v4, %v5373_v5  ;;  %5499 = vmatprep.mubr.f32.mxu1 %v3309_v41  ;;  %v3312_v51 = vmax.f32 %v3280_v6, 0.0 }
 0x5d2   :  { %v2975_v44 = vpop.f32.mrf.mxu1  ;;  %5500 = vmatmul.mubr.f32.gmra.mxu1 %v3310_v1 }
 0x5d3   :  { %v3311_v38 = vmax.f32 %v3279_v53, 0.0  ;;  %v3204_v33 = vadd.f32 %v3203_v34, %v2975_v44  ;;  %v3282_v17 = vadd.f32 %v7258_v31, %v3209_v61  ;;  %v3233_v34 = vpop.f32.mrf.mxu0 }
 0x5d4   :  { %v5376_v50 = vpop.f32.mrf.mxu1 }
 0x5d5   :  { %v3281_v20 = vadd.f32 %v7258_v31, %v3204_v33  ;;  %v3219_v55 = vadd.f32 %v5430_v42, %v5376_v50  ;;  %5502 = vmatprep.mubr.f32.mxu1 %v3311_v38  ;;  %v3314_v4 = vmax.f32 %v3282_v17, 0.0  ;;  %v5439_v19 = vpop.f32.mrf.mxu0 }
 0x5d6   :  { %v2985_v7 = vpop.f32.mrf.mxu1  ;;  %5503 = vmatmul.mubr.f32.gmra.mxu1 %v3312_v51 }
 0x5d7   :  { %v3313_v29 = vmax.f32 %v3281_v20, 0.0  ;;  %v3214_v9 = vadd.f32 %v3213_v46, %v2985_v7  ;;  %v3284_v52 = vadd.f32 %v7258_v31, %v3219_v55  ;;  %v3243_v38 = vpop.f32.mrf.mxu0 }
 0x5d9   :  { %v3283_v23 = vadd.f32 %v7258_v31, %v3214_v9  ;;  %v5379_v25 = vpop.f32.mrf.mxu1  ;;  %5505 = vmatprep.mubr.f32.mxu1 %v3313_v29  ;;  %v3316_v49 = vmax.f32 %v3284_v52, 0.0  ;;  %v7314_v9 = vld [vmem:[%s7598_s18] ss:$0 sm:$0xff] }
 0x5da   :  { %v3229_v58 = vadd.f32 %v5433_v47, %v5379_v25  ;;  %5506 = vmatmul.mubr.f32.gmra.mxu1 %v3314_v4 }
 0x5db   :  { %v3315_v48 = vmax.f32 %v3283_v23, 0.0  ;;  %v2995_v56 = vpop.f32.mrf.mxu1 }
 0x5dc   :  { %v3224_v42 = vadd.f32 %v3223_v18, %v2995_v56  ;;  %v3286_v63 = vadd.f32 %v7258_v31, %v3229_v58 }
 0x5dd   :  { %v5382_v41 = vpop.f32.mrf.mxu1  ;;  %5508 = vmatprep.mubr.f32.mxu1 %v3315_v48 }
 0x5de   :  { %v3285_v46 = vadd.f32 %v7258_v31, %v3224_v42  ;;  %v3239_v1 = vadd.f32 %v5436_v37, %v5382_v41  ;;  %5509 = vmatmul.mubr.f32.gmra.mxu1 %v3316_v49  ;;  %v3318_v61 = vmax.f32 %v3286_v63, 0.0 }
 0x5df   :  { %v3005_v6 = vpop.f32.mrf.mxu1 }
 0x5e0   :  { %v3317_v5 = vmax.f32 %v3285_v46, 0.0  ;;  %v3234_v53 = vadd.f32 %v3233_v34, %v3005_v6  ;;  %v3288_v47 = vadd.f32 %v7258_v31, %v3239_v1 }
 0x5e1   :  { %v5385_v44 = vpop.f32.mrf.mxu1 }
 0x5e2   :  { %v3287_v33 = vadd.f32 %v7258_v31, %v3234_v53  ;;  %v3249_v18 = vadd.f32 %v5439_v19, %v5385_v44  ;;  %5511 = vmatprep.mubr.f32.mxu1 %v3317_v5  ;;  %v3320_v20 = vmax.f32 %v3288_v47, 0.0 }
 0x5e3   :  { %v3015_v51 = vpop.f32.mrf.mxu1  ;;  %5512 = vmatmul.mubr.f32.gmra.mxu1 %v3318_v61 }
 0x5e4   :  { %v3319_v17 = vmax.f32 %v3287_v33, 0.0  ;;  %v3244_v50 = vadd.f32 %v3243_v38, %v3015_v51  ;;  %v3290_v55 = vadd.f32 %v7258_v31, %v3249_v18 }
 0x5e6   :  { %v3289_v37 = vadd.f32 %v7258_v31, %v3244_v50  ;;  %5514 = vmatprep.mubr.f32.mxu1 %v3319_v17  ;;  %v3322_v29 = vmax.f32 %v3290_v55, 0.0 }
 0x5e7   :  { %5515 = vmatmul.mubr.f32.gmra.mxu1 %v3320_v20 }
 0x5e8   :  { %v3321_v7 = vmax.f32 %v3289_v37, 0.0 }
 0x5ea   :  { %5517 = vmatprep.mubr.f32.mxu1 %v3321_v7 }
 0x5eb   :  { %5518 = vmatmul.mubr.f32.gmra.mxu1 %v3322_v29 }
 0x66e   :  { %v5474_v4 = vpop.f32.mrf.mxu1 }
 0x66f   :  { %v3418_v52 = vadd.f32 %v5474_v4, %v7314_v9 }
 0x670   :  { %v3412_v23 = vpop.f32.mrf.mxu1 }
 0x671   :  { %v3413_v25 = vadd.f32 %v7314_v9, %v3412_v23  ;;  %v3572_v31 = vmax.f32 %v3418_v52, 0.0 }
 0x672   :  { %v5477_v34 = vpop.f32.mrf.mxu1 }
 0x673   :  { %v3571_v58 = vmax.f32 %v3413_v25, 0.0  ;;  %v3428_v48 = vadd.f32 %v5477_v34, %v7314_v9 }
 0x674   :  { %v3422_v56 = vpop.f32.mrf.mxu1 }
 0x675   :  { %v3423_v49 = vadd.f32 %v7314_v9, %v3422_v56  ;;  %5536 = vmatprep.mubr.msk.f32.mxu0 %vm484_vm2, %v3571_v58  ;;  %v3574_v41 = vmax.f32 %v3428_v48, 0.0 }
 0x676   :  { %v5480_v42 = vpop.f32.mrf.mxu1  ;;  %5537 = vmatmul.mubr.msk.f32.vlgmr.msra.gmra.mxu0 %vm484_vm2, %v3572_v31 }
 0x677   :  { %v3573_v63 = vmax.f32 %v3423_v49, 0.0  ;;  %v3438_v19 = vadd.f32 %v5480_v42, %v7314_v9 }
 0x678   :  { %v3432_v46 = vpop.f32.mrf.mxu1 }
 0x679   :  { %v3433_v1 = vadd.f32 %v7314_v9, %v3432_v46  ;;  %5539 = vmatprep.mubr.msk.f32.mxu0 %vm484_vm2, %v3573_v63  ;;  %v3576_v53 = vmax.f32 %v3438_v19, 0.0 }
 0x67a   :  { %v5483_v6 = vpop.f32.mrf.mxu1  ;;  %5540 = vmatmul.mubr.msk.f32.gmra.mxu0 %vm484_vm2, %v3574_v41 }
 0x67b   :  { %v3575_v5 = vmax.f32 %v3433_v1, 0.0  ;;  %v3448_v61 = vadd.f32 %v5483_v6, %v7314_v9 }
 0x67c   :  { %v3442_v47 = vpop.f32.mrf.mxu1 }
 0x67d   :  { %v3443_v44 = vadd.f32 %v7314_v9, %v3442_v47  ;;  %5542 = vmatprep.mubr.msk.f32.mxu0 %vm484_vm2, %v3575_v5  ;;  %v3578_v18 = vmax.f32 %v3448_v61, 0.0 }
 0x67e   :  { %v5486_v38 = vpop.f32.mrf.mxu1  ;;  %5543 = vmatmul.mubr.msk.f32.gmra.mxu0 %vm484_vm2, %v3576_v53 }
 0x67f   :  { %v3577_v33 = vmax.f32 %v3443_v44, 0.0  ;;  %v3458_v51 = vadd.f32 %v5486_v38, %v7314_v9 }
 0x680   :  { %v3452_v17 = vpop.f32.mrf.mxu1 }
 0x681   :  { %v3453_v50 = vadd.f32 %v7314_v9, %v3452_v17  ;;  %5545 = vmatprep.mubr.msk.f32.mxu0 %vm484_vm2, %v3577_v33  ;;  %v3580_v37 = vmax.f32 %v3458_v51, 0.0 }
 0x682   :  { %v5489_v20 = vpop.f32.mrf.mxu1  ;;  %5546 = vmatmul.mubr.msk.f32.gmra.mxu0 %vm484_vm2, %v3578_v18 }
 0x683   :  { %v3579_v55 = vmax.f32 %v3453_v50, 0.0  ;;  %v3468_v7 = vadd.f32 %v5489_v20, %v7314_v9 }
 0x684   :  { %v3462_v29 = vpop.f32.mrf.mxu1 }
 0x685   :  { %v3463_v4 = vadd.f32 %v7314_v9, %v3462_v29  ;;  %5548 = vmatprep.mubr.msk.f32.mxu0 %vm484_vm2, %v3579_v55  ;;  %v3582_v25 = vmax.f32 %v3468_v7, 0.0 }
 0x686   :  { %v5492_v52 = vpop.f32.mrf.mxu1  ;;  %5549 = vmatmul.mubr.msk.f32.gmra.mxu0 %vm484_vm2, %v3580_v37 }
 0x687   :  { %v3581_v23 = vmax.f32 %v3463_v4, 0.0  ;;  %v3478_v34 = vadd.f32 %v5492_v52, %v7314_v9 }
 0x688   :  { %v3472_v58 = vpop.f32.mrf.mxu1 }
 0x689   :  { %v3473_v31 = vadd.f32 %v7314_v9, %v3472_v58  ;;  %5551 = vmatprep.mubr.msk.f32.mxu0 %vm484_vm2, %v3581_v23  ;;  %v3584_v49 = vmax.f32 %v3478_v34, 0.0 }
 0x68a   :  { %v5495_v48 = vpop.f32.mrf.mxu1  ;;  %5552 = vmatmul.mubr.msk.f32.gmra.mxu0 %vm484_vm2, %v3582_v25 }
 0x68b   :  { %v3583_v56 = vmax.f32 %v3473_v31, 0.0  ;;  %v3488_v42 = vadd.f32 %v5495_v48, %v7314_v9 }
 0x68c   :  { %v3482_v63 = vpop.f32.mrf.mxu1 }
 0x68d   :  { %v3483_v41 = vadd.f32 %v7314_v9, %v3482_v63  ;;  %5554 = vmatprep.mubr.msk.f32.mxu0 %vm484_vm2, %v3583_v56  ;;  %v3586_v1 = vmax.f32 %v3488_v42, 0.0 }
 0x68e   :  { %v5498_v19 = vpop.f32.mrf.mxu1  ;;  %5555 = vmatmul.mubr.msk.f32.gmra.mxu0 %vm484_vm2, %v3584_v49 }
 0x68f   :  { %v3585_v46 = vmax.f32 %v3483_v41, 0.0  ;;  %v3498_v6 = vadd.f32 %v5498_v19, %v7314_v9 }
 0x690   :  { %v3492_v5 = vpop.f32.mrf.mxu1 }
 0x691   :  { %v3493_v53 = vadd.f32 %v7314_v9, %v3492_v5  ;;  %5557 = vmatprep.mubr.msk.f32.mxu0 %vm484_vm2, %v3585_v46  ;;  %v3588_v44 = vmax.f32 %v3498_v6, 0.0 }
 0x692   :  { %v5501_v61 = vpop.f32.mrf.mxu1  ;;  %5558 = vmatmul.mubr.msk.f32.gmra.mxu0 %vm484_vm2, %v3586_v1 }
 0x693   :  { %v3587_v47 = vmax.f32 %v3493_v53, 0.0  ;;  %v3508_v38 = vadd.f32 %v5501_v61, %v7314_v9 }
 0x694   :  { %v3502_v33 = vpop.f32.mrf.mxu1 }
 0x695   :  { %v3503_v18 = vadd.f32 %v7314_v9, %v3502_v33  ;;  %5560 = vmatprep.mubr.msk.f32.mxu0 %vm484_vm2, %v3587_v47  ;;  %v3590_v50 = vmax.f32 %v3508_v38, 0.0 }
 0x696   :  { %v5504_v51 = vpop.f32.mrf.mxu1  ;;  %5561 = vmatmul.mubr.msk.f32.gmra.mxu0 %vm484_vm2, %v3588_v44 }
 0x697   :  { %v3589_v17 = vmax.f32 %v3503_v18, 0.0  ;;  %v3518_v20 = vadd.f32 %v5504_v51, %v7314_v9 }
 0x698   :  { %v3512_v55 = vpop.f32.mrf.mxu1 }
 0x699   :  { %v3513_v37 = vadd.f32 %v7314_v9, %v3512_v55  ;;  %5563 = vmatprep.mubr.msk.f32.mxu0 %vm484_vm2, %v3589_v17  ;;  %v3592_v4 = vmax.f32 %v3518_v20, 0.0 }
 0x69a   :  { %v5507_v7 = vpop.f32.mrf.mxu1  ;;  %5564 = vmatmul.mubr.msk.f32.gmra.mxu0 %vm484_vm2, %v3590_v50 }
 0x69b   :  { %v3591_v29 = vmax.f32 %v3513_v37, 0.0  ;;  %v3528_v52 = vadd.f32 %v5507_v7, %v7314_v9  ;;  %v7383_v37 = vld [vmem:[%s7600_s20] ss:$0 sm:$0xff]  ;;  %s5775_s20 = smov [#allocation2]  }
 0x69c   :  { %v3522_v23 = vpop.f32.mrf.mxu1  ;;  %s4138_s11 = sshll.u32 %s5775_s20, 4  ;;  %s4139_s11 = int_to_ptr.vmem [resolvable:$true] %s4138_s11 }
 0x69d   :  { %v3523_v25 = vadd.f32 %v7314_v9, %v3522_v23  ;;  %5566 = vmatprep.mubr.msk.f32.mxu0 %vm484_vm2, %v3591_v29  ;;  %v3594_v31 = vmax.f32 %v3528_v52, 0.0  ;;  %s5753_s4 = scalar_lea.vmem %s4139_s11, 4096  ;;  %p5758_p1 = scmp.lt.s32.totalorder %s4139_s11, %s4139_s11 }
 0x69e   :  { %v5510_v34 = vpop.f32.mrf.mxu1  ;;  %5567 = vmatmul.mubr.msk.f32.gmra.mxu0 %vm484_vm2, %v3592_v4  ;;  %p5754_p0 = scmp.ne.s32.totalorder %s4139_s11, %s5753_s4  ;;  %p5759_p2 = scmp.lt.s32.totalorder %s5753_s4, %s5753_s4 }
 0x69f   :  { %v3593_v58 = vmax.f32 %v3523_v25, 0.0  ;;  %v3538_v48 = vadd.f32 %v5510_v34, %v7314_v9 }
 0x6a0   :  { %v3532_v56 = vpop.f32.mrf.mxu1  ;;  %p5760_p3 = por %p5759_p2, %p5758_p1 }
 0x6a1   :  { %v3533_v49 = vadd.f32 %v7314_v9, %v3532_v56  ;;  %5569 = vmatprep.mubr.msk.f32.mxu0 %vm484_vm2, %v3593_v58  ;;  %v3596_v41 = vmax.f32 %v3538_v48, 0.0 }
 0x6a2   :  { %5570 = vmatmul.mubr.msk.f32.gmra.mxu0 %vm484_vm2, %v3594_v31  ;;  %p5761_p4 = pnand %p5760_p3, %p5754_p0 }
 0x6a3   :  { %v3595_v42 = vmax.f32 %v3533_v49, 0.0  ;;  %v5513_v63 = vpop.f32.mrf.mxu1 }
 0x6a4   :  { %v3548_v19 = vadd.f32 %v5513_v63, %v7314_v9 }
 0x6a5   :  { %v3542_v46 = vpop.f32.mrf.mxu1  ;;  %5572 = vmatprep.mubr.msk.f32.mxu0 %vm484_vm2, %v3595_v42 }
 0x6a6   :  { %v3543_v1 = vadd.f32 %v7314_v9, %v3542_v46  ;;  %5573 = vmatmul.mubr.msk.f32.gmra.mxu0 %vm484_vm2, %v3596_v41  ;;  %v3598_v53 = vmax.f32 %v3548_v19, 0.0 }
 0x6a7   :  { %v5516_v6 = vpop.f32.mrf.mxu1 }
 0x6a8   :  { %v3597_v5 = vmax.f32 %v3543_v1, 0.0  ;;  %v3558_v61 = vadd.f32 %v5516_v6, %v7314_v9 }
 0x6a9   :  { %v3552_v47 = vpop.f32.mrf.mxu1 }
 0x6aa   :  { %v3553_v44 = vadd.f32 %v7314_v9, %v3552_v47  ;;  %5575 = vmatprep.mubr.msk.f32.mxu0 %vm484_vm2, %v3597_v5  ;;  %v3600_v18 = vmax.f32 %v3558_v61, 0.0 }
 0x6ab   :  { %v5519_v38 = vpop.f32.mrf.mxu1  ;;  %5576 = vmatmul.mubr.msk.f32.gmra.mxu0 %vm484_vm2, %v3598_v53 }
 0x6ac   :  { %v3599_v33 = vmax.f32 %v3553_v44, 0.0  ;;  %v3568_v51 = vadd.f32 %v5519_v38, %v7314_v9 }
 0x6ad   :  { %v3562_v17 = vpop.f32.mrf.mxu1 }
 0x6ae   :  { %v3563_v50 = vadd.f32 %v7314_v9, %v3562_v17  ;;  %5578 = vmatprep.mubr.msk.f32.mxu0 %vm484_vm2, %v3599_v33  ;;  %v3602_v55 = vmax.f32 %v3568_v51, 0.0 }
 0x6af   :  { %5579 = vmatmul.mubr.msk.f32.gmra.mxu0 %vm484_vm2, %v3600_v18 }
 0x6b0   :  { %v3601_v20 = vmax.f32 %v3563_v50, 0.0 }
 0x6b2   :  { %5581 = vmatprep.mubr.msk.f32.mxu0 %vm484_vm2, %v3601_v20 }
 0x6b3   :  { %5582 = vmatmul.mubr.msk.f32.gmra.mxu0 %vm484_vm2, %v3602_v55 }
 0x736   :  { %v5538_v7 = vpop.f32.mrf.mxu0 }
 0x737   :  { %v3786_v29 = vadd.f32 %v5538_v7, %v7383_v37 }
 0x738   :  { %v3780_v9 = vpop.f32.mrf.mxu0 }
 0x739   :  { %v3781_v4 = vadd.f32 %v7383_v37, %v3780_v9  ;;  %v3943_v52 = vsel %vm3939_vm6, %v3786_v29, inf }
 0x73a   :  { %3944 = vmin.xlane.f32.xlu0 %v3943_v52  ;;  %v5541_v23 = vpop.f32.mrf.mxu0 }
 0x73b   :  { %v3796_v25 = vadd.f32 %v5541_v23, %v7383_v37  ;;  %v3940_v48 = vsel %vm3939_vm6, %v3781_v4, inf }
 0x73c   :  { %v3790_v34 = vpop.f32.mrf.mxu0 }
 0x73d   :  { %v3791_v58 = vadd.f32 %v7383_v37, %v3790_v34  ;;  %v3949_v31 = vsel %vm3939_vm6, %v3796_v25, inf }
 0x73e   :  { %3950 = vmin.xlane.f32.xlu1 %v3949_v31  ;;  %v5544_v56 = vpop.f32.mrf.mxu0  ;;  %3941 = vmin.xlane.f32.xlu0 %v3940_v48 }
 0x73f   :  { %v3806_v42 = vadd.f32 %v5544_v56, %v7383_v37  ;;  %v3946_v41 = vsel %vm3939_vm6, %v3791_v58, inf }
 0x740   :  { %v3800_v49 = vpop.f32.mrf.mxu0 }
 0x741   :  { %v3801_v63 = vadd.f32 %v7383_v37, %v3800_v49  ;;  %v3955_v53 = vsel %vm3939_vm6, %v3806_v42, inf }
 0x742   :  { %v5547_v19 = vpop.f32.mrf.mxu0  ;;  %3947 = vmin.xlane.f32.xlu1 %v3946_v41 }
 0x743   :  { %v3952_v46 = vsel %vm3939_vm6, %v3801_v63, inf  ;;  %v3816_v6 = vadd.f32 %v5547_v19, %v7383_v37 }
 0x744   :  { %v3810_v1 = vpop.f32.mrf.mxu0  ;;  %3953 = vmin.xlane.f32.xlu0 %v3952_v46 }
 0x745   :  { %v3811_v5 = vadd.f32 %v7383_v37, %v3810_v1  ;;  %v3961_v18 = vsel %vm3939_vm6, %v3816_v6, inf }
 0x746   :  { %v5550_v61 = vpop.f32.mrf.mxu0  ;;  %3956 = vmin.xlane.f32.xlu1 %v3955_v53 }
 0x747   :  { %v3958_v47 = vsel %vm3939_vm6, %v3811_v5, inf  ;;  %v3826_v38 = vadd.f32 %v5550_v61, %v7383_v37 }
 0x748   :  { %v3820_v44 = vpop.f32.mrf.mxu0  ;;  %3959 = vmin.xlane.f32.xlu0 %v3958_v47 }
 0x749   :  { %v3821_v33 = vadd.f32 %v7383_v37, %v3820_v44  ;;  %v3967_v7 = vsel %vm3939_vm6, %v3826_v38, inf }
 0x74a   :  { %v5553_v51 = vpop.f32.mrf.mxu0  ;;  %3962 = vmin.xlane.f32.xlu1 %v3961_v18 }
 0x74b   :  { %v3964_v17 = vsel %vm3939_vm6, %v3821_v33, inf  ;;  %v3836_v20 = vadd.f32 %v5553_v51, %v7383_v37 }
 0x74c   :  { %v3830_v50 = vpop.f32.mrf.mxu0  ;;  %3965 = vmin.xlane.f32.xlu0 %v3964_v17 }
 0x74d   :  { %v3831_v55 = vadd.f32 %v7383_v37, %v3830_v50  ;;  %v3973_v25 = vsel %vm3939_vm6, %v3836_v20, inf }
 0x74e   :  { %v5556_v29 = vpop.f32.mrf.mxu0  ;;  %3968 = vmin.xlane.f32.xlu1 %v3967_v7 }
 0x74f   :  { %v3970_v9 = vsel %vm3939_vm6, %v3831_v55, inf  ;;  %v3846_v52 = vadd.f32 %v5556_v29, %v7383_v37 }
 0x750   :  { %v3840_v4 = vpop.f32.mrf.mxu0  ;;  %3971 = vmin.xlane.f32.xlu0 %v3970_v9 }
 0x751   :  { %v3841_v23 = vadd.f32 %v7383_v37, %v3840_v4  ;;  %v3979_v49 = vsel %vm3939_vm6, %v3846_v52, inf }
 0x752   :  { %v5559_v34 = vpop.f32.mrf.mxu0  ;;  %3974 = vmin.xlane.f32.xlu1 %v3973_v25 }
 0x753   :  { %v3976_v58 = vsel %vm3939_vm6, %v3841_v23, inf  ;;  %v3856_v48 = vadd.f32 %v5559_v34, %v7383_v37 }
 0x754   :  { %v3850_v31 = vpop.f32.mrf.mxu0  ;;  %3977 = vmin.xlane.f32.xlu0 %v3976_v58 }
 0x755   :  { %v3851_v56 = vadd.f32 %v7383_v37, %v3850_v31  ;;  %v3985_v1 = vsel %vm3939_vm6, %v3856_v48, inf }
 0x756   :  { %v5562_v42 = vpop.f32.mrf.mxu0  ;;  %3980 = vmin.xlane.f32.xlu1 %v3979_v49 }
 0x757   :  { %v3982_v63 = vsel %vm3939_vm6, %v3851_v56, inf  ;;  %v3866_v19 = vadd.f32 %v5562_v42, %v7383_v37 }
 0x758   :  { %v3860_v41 = vpop.f32.mrf.mxu0  ;;  %3983 = vmin.xlane.f32.xlu0 %v3982_v63 }
 0x759   :  { %v3861_v46 = vadd.f32 %v7383_v37, %v3860_v41  ;;  %v3991_v44 = vsel %vm3939_vm6, %v3866_v19, inf }
 0x75a   :  { %v5565_v6 = vpop.f32.mrf.mxu0  ;;  %3986 = vmin.xlane.f32.xlu1 %v3985_v1 }
 0x75b   :  { %v3988_v5 = vsel %vm3939_vm6, %v3861_v46, inf  ;;  %v3876_v61 = vadd.f32 %v5565_v6, %v7383_v37 }
 0x75c   :  { %v3870_v53 = vpop.f32.mrf.mxu0  ;;  %3989 = vmin.xlane.f32.xlu0 %v3988_v5 }
 0x75d   :  { %v3871_v47 = vadd.f32 %v7383_v37, %v3870_v53  ;;  %v3997_v50 = vsel %vm3939_vm6, %v3876_v61, inf }
 0x75e   :  { %v5568_v38 = vpop.f32.mrf.mxu0  ;;  %3992 = vmin.xlane.f32.xlu1 %v3991_v44 }
 0x75f   :  { %v3994_v33 = vsel %vm3939_vm6, %v3871_v47, inf  ;;  %v3886_v51 = vadd.f32 %v5568_v38, %v7383_v37 }
 0x760   :  { %v3880_v18 = vpop.f32.mrf.mxu0  ;;  %3995 = vmin.xlane.f32.xlu0 %v3994_v33 }
 0x761   :  { %v3881_v17 = vadd.f32 %v7383_v37, %v3880_v18  ;;  %v4003_v4 = vsel %vm3939_vm6, %v3886_v51, inf }
 0x762   :  { %v5571_v20 = vpop.f32.mrf.mxu0  ;;  %3998 = vmin.xlane.f32.xlu1 %v3997_v50 }
 0x763   :  { %v4000_v55 = vsel %vm3939_vm6, %v3881_v17, inf  ;;  %v3896_v29 = vadd.f32 %v5571_v20, %v7383_v37  ;;  %v7657_v20 = vclamps-f32 %v6932_v11, 1.0 }
 0x764   :  { %v3890_v7 = vpop.f32.mrf.mxu0  ;;  %4001 = vmin.xlane.f32.xlu0 %v4000_v55 }
 0x765   :  { %v3891_v9 = vadd.f32 %v7383_v37, %v3890_v7  ;;  %v4009_v31 = vsel %vm3939_vm6, %v3896_v29, inf }
 0x766   :  { %v5574_v52 = vpop.f32.mrf.mxu0  ;;  %4004 = vmin.xlane.f32.xlu1 %v4003_v4 }
 0x767   :  { %v4006_v23 = vsel %vm3939_vm6, %v3891_v9, inf  ;;  %v3906_v34 = vadd.f32 %v5574_v52, %v7383_v37  ;;  %v7659_v52 = vclamps-f32 %v6935_v26, 1.0 }
 0x768   :  { %v3900_v25 = vpop.f32.mrf.mxu0  ;;  %4007 = vmin.xlane.f32.xlu0 %v4006_v23 }
 0x769   :  { %v3901_v58 = vadd.f32 %v7383_v37, %v3900_v25  ;;  %v4015_v63 = vsel %vm3939_vm6, %v3906_v34, inf }
 0x76a   :  { %4010 = vmin.xlane.f32.xlu1 %v4009_v31 }
 0x76b   :  { %v5577_v48 = vpop.f32.mrf.mxu0  ;;  %v4012_v56 = vsel %vm3939_vm6, %v3901_v58, inf  ;;  %v7660_v58 = vclamps-f32 %v6945_v36, 1.0 }
 0x76c   :  { %4013 = vmin.xlane.f32.xlu0 %v4012_v56  ;;  %v3916_v49 = vadd.f32 %v5577_v48, %v7383_v37  ;;  %v7661_v56 = vclamps-f32 %v6968_v27, 1.0 }
 0x76d   :  { %v3910_v42 = vpop.f32.mrf.mxu0 }
 0x76e   :  { %v3911_v41 = vadd.f32 %v7383_v37, %v3910_v42  ;;  %4016 = vmin.xlane.f32.xlu1 %v4015_v63  ;;  %v4021_v5 = vsel %vm3939_vm6, %v3916_v49, inf  ;;  %v7662_v63 = vclamps-f32 %v6965_v0, 1.0 }
 0x76f   :  { %v5580_v19 = vpop.f32.mrf.mxu0 }
 0x770   :  { %v4018_v46 = vsel %vm3939_vm6, %v3911_v41, inf  ;;  %v3926_v1 = vadd.f32 %v5580_v19, %v7383_v37 }
 0x771   :  { %v3920_v6 = vpop.f32.mrf.mxu0  ;;  %4019 = vmin.xlane.f32.xlu0 %v4018_v46  ;;  %v7663_v46 = vclamps-f32 %v6990_v24, 1.0 }
 0x772   :  { %v3921_v53 = vadd.f32 %v7383_v37, %v3920_v6  ;;  %4022 = vmin.xlane.f32.xlu1 %v4021_v5  ;;  %v4027_v33 = vsel %vm3939_vm6, %v3926_v1, inf  ;;  %v7664_v5 = vclamps-f32 %v6987_v13, 1.0 }
 0x773   :  { %v5583_v61 = vpop.f32.mrf.mxu0 }
 0x774   :  { %v3936_v47 = vadd.f32 %v5583_v61, %v7383_v37  ;;  %v4024_v44 = vsel %vm3939_vm6, %v3921_v53, inf }
 0x775   :  { %4025 = vmin.xlane.f32.xlu0 %v4024_v44  ;;  %v3930_v38 = vpop.f32.mrf.mxu0 }
 0x776   :  { %v3931_v18 = vadd.f32 %v7383_v37, %v3930_v38  ;;  %4028 = vmin.xlane.f32.xlu1 %v4027_v33  ;;  %v4033_v51 = vsel %vm3939_vm6, %v3936_v47, inf  ;;  %v7658_v37 = vclamps-f32 %v6942_v32, 1.0  ;;  %v7665_v47 = vclamps-f32 %v7012_v8, 1.0 }
 0x777   :  { %v7666_v33 = vclamps-f32 %v7009_v40, 1.0 }
 0x778   :  { %v4030_v17 = vsel %vm3939_vm6, %v3931_v18, inf }
 0x779   :  { %4031 = vmin.xlane.f32.xlu0 %v4030_v17  ;;  %v7667_v17 = vclamps-f32 %v7034_v12, 1.0 }
 0x77a   :  { %4034 = vmin.xlane.f32.xlu1 %v4033_v51 }
 0x7c3   :  { %v3945_v50 = vpop.xlane.xlu0 %3944 }
 0x7c4   :  { %v4037_v55 = vsel %vm1210_vm4, %v7657_v20, %v3945_v50 }
 0x7c5   :  { %v4070_v7 = vsel %vm4068_vm7, %v4037_v55, 0.0  ;;  %v7668_v55 = vclamps-f32 %v7031_v57, 1.0 }
 0x7c6   :  { %4102 = vst [vmem:[#allocation2 + $0x8] sm:$0xff] %v4070_v7 }
 0x7c7   :  { %v3951_v29 = vpop.xlane.xlu1 %3950  ;;  %v3942_v9 = vpop.xlane.xlu0 %3941 }
 0x7c8   :  { %v4039_v4 = vsel %vm1210_vm4, %v7658_v37, %v3951_v29  ;;  %v4036_v23 = vsel %vm1210_vm4, %v7659_v52, %v3942_v9  ;;  %v7669_v9 = vclamps-f32 %v7056_v59, 1.0  ;;  %v7670_v52 = vclamps-f32 %v7053_v39, 1.0 }
 0x7c9   :  { %v4072_v25 = vsel %vm4068_vm7, %v4039_v4, 0.0  ;;  %v4069_v34 = vsel %vm4068_vm7, %v4036_v23, 0.0 }
 0x7ca   :  { %4104 = vst [vmem:[#allocation2 + $0x18] sm:$0xff] %v4072_v25  ;;  %4101 = vst [vmem:[#allocation2] sm:$0xff] %v4069_v34  ;;  %v7671_v34 = vclamps-f32 %v7078_v16, 1.0 }
 0x7cb   :  { %v3948_v11 = vpop.xlane.xlu1 %3947 }
 0x7cc   :  { %v4038_v31 = vsel %vm1210_vm4, %v7660_v58, %v3948_v11 }
 0x7cd   :  { %v4071_v48 = vsel %vm4068_vm7, %v4038_v31, 0.0  ;;  %v3954_v32 = vpop.xlane.xlu0 %3953  ;;  %v7672_v31 = vclamps-f32 %v7075_v35, 1.0 }
 0x7ce   :  { %4103 = vst [vmem:[#allocation2 + $0x10] sm:$0xff] %v4071_v48  ;;  %v4040_v26 = vsel %vm1210_vm4, %v7661_v56, %v3954_v32  ;;  %v7673_v56 = vclamps-f32 %v7097_v60, 1.0 }
 0x7cf   :  { %v4073_v49 = vsel %vm4068_vm7, %v4040_v26, 0.0  ;;  %v3957_v42 = vpop.xlane.xlu1 %3956 }
 0x7d0   :  { %4105 = vst [vmem:[#allocation2 + $0x20] sm:$0xff] %v4073_v49  ;;  %v4041_v41 = vsel %vm1210_vm4, %v7662_v63, %v3957_v42  ;;  %v7674_v42 = vclamps-f32 %v7094_v2, 1.0 }
 0x7d1   :  { %v4074_v36 = vsel %vm4068_vm7, %v4041_v41, 0.0  ;;  %v3960_v19 = vpop.xlane.xlu0 %3959 }
 0x7d2   :  { %4106 = vst [vmem:[#allocation2 + $0x28] sm:$0xff] %v4074_v36  ;;  %v4042_v1 = vsel %vm1210_vm4, %v7663_v46, %v3960_v19  ;;  %v7675_v36 = vclamps-f32 %v7113_v28, 1.0 }
 0x7d3   :  { %v4075_v27 = vsel %vm4068_vm7, %v4042_v1, 0.0  ;;  %v3963_v6 = vpop.xlane.xlu1 %3962  ;;  %v7676_v1 = vclamps-f32 %v7109_v10, 1.0 }
 0x7d4   :  { %4107 = vst [vmem:[#allocation2 + $0x30] sm:$0xff] %v4075_v27  ;;  %v4043_v53 = vsel %vm1210_vm4, %v7664_v5, %v3963_v6  ;;  %v7677_v5 = vclamps-f32 %v7129_v14, 1.0 }
 0x7d5   :  { %v4076_v0 = vsel %vm4068_vm7, %v4043_v53, 0.0  ;;  %v3966_v61 = vpop.xlane.xlu0 %3965 }
 0x7d6   :  { %4108 = vst [vmem:[#allocation2 + $0x38] sm:$0xff] %v4076_v0  ;;  %v4044_v44 = vsel %vm1210_vm4, %v7665_v47, %v3966_v61  ;;  %v7678_v61 = vclamps-f32 %v7125_v62, 1.0 }
 0x7d7   :  { %v4077_v24 = vsel %vm4068_vm7, %v4044_v44, 0.0  ;;  %v3969_v38 = vpop.xlane.xlu1 %3968 }
 0x7d8   :  { %4109 = vst [vmem:[#allocation2 + $0x40] sm:$0xff] %v4077_v24  ;;  %v4045_v18 = vsel %vm1210_vm4, %v7666_v33, %v3969_v38  ;;  %v7679_v24 = vclamps-f32 %v7145_v54, 1.0 }
 0x7d9   :  { %v4078_v13 = vsel %vm4068_vm7, %v4045_v18, 0.0  ;;  %v3972_v51 = vpop.xlane.xlu0 %3971  ;;  %v7680_v18 = vclamps-f32 %v7141_v21, 1.0 }
 0x7da   :  { %4110 = vst [vmem:[#allocation2 + $0x48] sm:$0xff] %v4078_v13  ;;  %v4046_v50 = vsel %vm1210_vm4, %v7667_v17, %v3972_v51  ;;  %v7681_v17 = vclamps-f32 %v7159_v43, 1.0 }
 0x7db   :  { %v4079_v8 = vsel %vm4068_vm7, %v4046_v50, 0.0  ;;  %v3975_v20 = vpop.xlane.xlu1 %3974 }
 0x7dc   :  { %4111 = vst [vmem:[#allocation2 + $0x50] sm:$0xff] %v4079_v8  ;;  %v4047_v7 = vsel %vm1210_vm4, %v7668_v55, %v3975_v20  ;;  %v7682_v20 = vclamps-f32 %v7156_v3, 1.0 }
 0x7dd   :  { %v4080_v40 = vsel %vm4068_vm7, %v4047_v7, 0.0  ;;  %v3978_v29 = vpop.xlane.xlu0 %3977 }
 0x7de   :  { %4112 = vst [vmem:[#allocation2 + $0x58] sm:$0xff] %v4080_v40  ;;  %v4048_v37 = vsel %vm1210_vm4, %v7669_v9, %v3978_v29  ;;  %v7683_v40 = vclamps-f32 %v7176_v45, 1.0 }
 0x7df   :  { %v4081_v12 = vsel %vm4068_vm7, %v4048_v37, 0.0  ;;  %v3981_v4 = vpop.xlane.xlu1 %3980  ;;  %v7684_v37 = vclamps-f32 %v7170_v30, 1.0 }
 0x7e0   :  { %4113 = vst [vmem:[#allocation2 + $0x60] sm:$0xff] %v4081_v12  ;;  %v4049_v23 = vsel %vm1210_vm4, %v7670_v52, %v3981_v4  ;;  %v7685_v52 = vclamps-f32 %v7187_v22, 1.0 }
 0x7e1   :  { %v4082_v57 = vsel %vm4068_vm7, %v4049_v23, 0.0  ;;  %v3984_v25 = vpop.xlane.xlu0 %3983 }
 0x7e2   :  { %4114 = vst [vmem:[#allocation2 + $0x68] sm:$0xff] %v4082_v57  ;;  %v4050_v11 = vsel %vm1210_vm4, %v7671_v34, %v3984_v25  ;;  %v7686_v25 = vclamps-f32 %v7184_v15, 1.0 }
 0x7e3   :  { %v4083_v59 = vsel %vm4068_vm7, %v4050_v11, 0.0  ;;  %v3987_v58 = vpop.xlane.xlu1 %3986 }
 0x7e4   :  { %4115 = vst [vmem:[#allocation2 + $0x70] sm:$0xff] %v4083_v59  ;;  %v4051_v48 = vsel %vm1210_vm4, %v7672_v31, %v3987_v58  ;;  %v7687_v59 = vld [vmem:[#allocation5_spill] sm:$0xff] }
 0x7e5   :  { %v4084_v39 = vsel %vm4068_vm7, %v4051_v48, 0.0  ;;  %v3990_v32 = vpop.xlane.xlu0 %3989  ;;  %v7688_v58 = vclamps-f32 %v7687_v59, 1.0 }
 0x7e6   :  { %4116 = vst [vmem:[#allocation2 + $0x78] sm:$0xff] %v4084_v39  ;;  %v4052_v26 = vsel %vm1210_vm4, %v7673_v56, %v3990_v32  ;;  %v7689_v39 = vld [vmem:[#allocation6_spill] sm:$0xff] }
 0x7e7   :  { %v4085_v16 = vsel %vm4068_vm7, %v4052_v26, 0.0  ;;  %v3993_v49 = vpop.xlane.xlu1 %3992  ;;  %v7690_v32 = vclamps-f32 %v7689_v39, 1.0 }
 0x7e8   :  { %4117 = vst [vmem:[#allocation2 + $0x80] sm:$0xff] %v4085_v16  ;;  %v4053_v63 = vsel %vm1210_vm4, %v7674_v42, %v3993_v49 }
 0x7e9   :  { %v4086_v35 = vsel %vm4068_vm7, %v4053_v63, 0.0  ;;  %v3996_v41 = vpop.xlane.xlu0 %3995 }
 0x7ea   :  { %4118 = vst [vmem:[#allocation2 + $0x88] sm:$0xff] %v4086_v35  ;;  %v4054_v19 = vsel %vm1210_vm4, %v7675_v36, %v3996_v41 }
 0x7eb   :  { %v4087_v60 = vsel %vm4068_vm7, %v4054_v19, 0.0  ;;  %v3999_v46 = vpop.xlane.xlu1 %3998 }
 0x7ec   :  { %4119 = vst [vmem:[#allocation2 + $0x90] sm:$0xff] %v4087_v60  ;;  %v4055_v27 = vsel %vm1210_vm4, %v7676_v1, %v3999_v46 }
 0x7ed   :  { %v4088_v2 = vsel %vm4068_vm7, %v4055_v27, 0.0  ;;  %v4002_v6 = vpop.xlane.xlu0 %4001 }
 0x7ee   :  { %4120 = vst [vmem:[#allocation2 + $0x98] sm:$0xff] %v4088_v2  ;;  %v4056_v53 = vsel %vm1210_vm4, %v7677_v5, %v4002_v6 }
 0x7ef   :  { %v4089_v28 = vsel %vm4068_vm7, %v4056_v53, 0.0  ;;  %v4005_v0 = vpop.xlane.xlu1 %4004 }
 0x7f0   :  { %4121 = vst [vmem:[#allocation2 + $0xa0] sm:$0xff] %v4089_v28  ;;  %v4057_v47 = vsel %vm1210_vm4, %v7678_v61, %v4005_v0 }
 0x7f1   :  { %v4090_v10 = vsel %vm4068_vm7, %v4057_v47, 0.0  ;;  %v4008_v44 = vpop.xlane.xlu0 %4007 }
 0x7f2   :  { %4122 = vst [vmem:[#allocation2 + $0xa8] sm:$0xff] %v4090_v10  ;;  %v4058_v38 = vsel %vm1210_vm4, %v7679_v24, %v4008_v44 }
 0x7f3   :  { %v4091_v14 = vsel %vm4068_vm7, %v4058_v38, 0.0  ;;  %v4011_v33 = vpop.xlane.xlu1 %4010 }
 0x7f4   :  { %4123 = vst [vmem:[#allocation2 + $0xb0] sm:$0xff] %v4091_v14  ;;  %v4059_v13 = vsel %vm1210_vm4, %v7680_v18, %v4011_v33 }
 0x7f5   :  { %v4092_v62 = vsel %vm4068_vm7, %v4059_v13, 0.0  ;;  %v4014_v51 = vpop.xlane.xlu0 %4013 }
 0x7f6   :  { %4124 = vst [vmem:[#allocation2 + $0xb8] sm:$0xff] %v4092_v62  ;;  %v4060_v50 = vsel %vm1210_vm4, %v7681_v17, %v4014_v51 }
 0x7f7   :  { %v4093_v54 = vsel %vm4068_vm7, %v4060_v50, 0.0  ;;  %v4017_v8 = vpop.xlane.xlu1 %4016 }
 0x7f8   :  { %4125 = vst [vmem:[#allocation2 + $0xc0] sm:$0xff] %v4093_v54  ;;  %v4061_v55 = vsel %vm1210_vm4, %v7682_v20, %v4017_v8 }
 0x7f9   :  { %v4094_v21 = vsel %vm4068_vm7, %v4061_v55, 0.0 }
 0x7fa   :  { %4126 = vst [vmem:[#allocation2 + $0xc8] sm:$0xff] %v4094_v21  ;;  %v4020_v7 = vpop.xlane.xlu0 %4019 }
 0x7fb   :  { %v4062_v29 = vsel %vm1210_vm4, %v7683_v40, %v4020_v7  ;;  %v4023_v9 = vpop.xlane.xlu1 %4022 }
 0x7fc   :  { %v4095_v43 = vsel %vm4068_vm7, %v4062_v29, 0.0  ;;  %v4063_v12 = vsel %vm1210_vm4, %v7684_v37, %v4023_v9 }
 0x7fd   :  { %4127 = vst [vmem:[#allocation2 + $0xd0] sm:$0xff] %v4095_v43  ;;  %v4096_v3 = vsel %vm4068_vm7, %v4063_v12, 0.0 }
 0x7fe   :  { %4128 = vst [vmem:[#allocation2 + $0xd8] sm:$0xff] %v4096_v3  ;;  %v4026_v4 = vpop.xlane.xlu0 %4025 }
 0x7ff   :  { %v4064_v23 = vsel %vm1210_vm4, %v7685_v52, %v4026_v4  ;;  %v4029_v57 = vpop.xlane.xlu1 %4028 }
 0x800   :  { %v4097_v45 = vsel %vm4068_vm7, %v4064_v23, 0.0  ;;  %v4065_v34 = vsel %vm1210_vm4, %v7686_v25, %v4029_v57 }
 0x801   :  { %4129 = vst [vmem:[#allocation2 + $0xe0] sm:$0xff] %v4097_v45  ;;  %v4098_v30 = vsel %vm4068_vm7, %v4065_v34, 0.0 }
 0x802   :  { %4130 = vst [vmem:[#allocation2 + $0xe8] sm:$0xff] %v4098_v30  ;;  %v4032_v11 = vpop.xlane.xlu0 %4031 }
 0x803   :  { %v4066_v22 = vsel %vm1210_vm4, %v7688_v58, %v4032_v11  ;;  %v4035_v31 = vpop.xlane.xlu1 %4034 }
 0x804   :  { %v4099_v48 = vsel %vm4068_vm7, %v4066_v22, 0.0  ;;  %v4067_v15 = vsel %vm1210_vm4, %v7690_v32, %v4035_v31 }
 0x805   :  { %4131 = vst [vmem:[#allocation2 + $0xf0] sm:$0xff] %v4099_v48  ;;  %v4100_v56 = vsel %vm4068_vm7, %v4067_v15, 0.0 }
 0x806   :  { %4132 = vst [vmem:[#allocation2 + $0xf8] sm:$0xff] %v4100_v56 }
 0x807   :  { %5764 = shalt.err (!%p5761_p4)
}
 0x808   :  { %s5776_s13 = smov 128   ;;  %s5777_s0 = smov 8  }
 0x809   :  { %4144 = dma.vmem_to_hbm [thread:$0]  %s4139_s11, 4096, %s7601_s21, [#allocation3], %s5776_s13, %s5776_s13, %s5777_s0  }
 0x80a   :  { %5773 = dma.done.wait [#allocation3], 4096  }
 0x80b   :  { %5774 = vsyncadd [#allocation3], 4294963200 }
 0x80c   :  { %4148 = vsyncpa [#allocation3], 1 }

</bundles_post_ra>
